<compile_context>
chip_gen: v6e
topology: v6e:2x2x1
jax: 0.10.0
libtpu: 0.0.40
codegen_flags: <defaults>
</compile_context>

<pallas_src>
import jax
import jax.numpy as jnp
from jax.experimental import pallas as pl
from jax.experimental.pallas import tpu as pltpu


def actor_critic_kernel(x_ref, wvec_ref, convw_ref, convb_ref, fcw_ref, fcb_ref,
                        c1w_ref, c1b_ref, c2w_ref, c2b_ref, c3w_ref, c3b_ref,
                        out_ref):
    Bb, Hp, Wp, C = x_ref.shape
    H, W = Hp - 2, Wp - 2
    P = H * W
    OC = convw_ref.shape[-1]
    A = fcb_ref.shape[-1]
    WD = wvec_ref.shape[-1]

    # ---- fused im2col + 3x3 conv: 9 accumulated matmuls on collapsed [Bb*P, C] ----
    acc = jnp.zeros((Bb * P, OC), jnp.float32)
    for k in range(9):
        kh, kw = divmod(k, 3)
        slab = x_ref[:, kh:kh + H, kw:kw + W, :]            # [Bb, H, W, C] static window
        slab2d = slab.reshape(Bb * P, C)                    # collapse batch*spatial -> M
        acc = acc + jnp.dot(slab2d, convw_ref[k],
                            preferred_element_type=jnp.float32)
    conv2d = jnp.maximum(acc + convb_ref[...], 0.0)         # [Bb*P, OC]

    # ---- global average pool: sublane-aligned reshape + sublane-sum, scale by 1/P ----
    pooled = jnp.sum(conv2d.reshape(Bb, P, OC), axis=1) * (1.0 / P)   # [Bb, OC]

    # ---- actor logits: split fused fc into two tile-aligned matmuls (no lane concat) ----
    logits = (jnp.dot(pooled, fcw_ref[0:OC, :],
                      preferred_element_type=jnp.float32)
              + jnp.dot(wvec_ref[...], fcw_ref[OC:OC + WD, :],
                        preferred_element_type=jnp.float32)
              + fcb_ref[...])                                          # [Bb, A]

    # ---- critic FNN: A -> 64 -> 64 -> 1 with ReLU ----
    h = jnp.maximum(jnp.dot(logits, c1w_ref[...],
                            preferred_element_type=jnp.float32) + c1b_ref[...], 0.0)
    h = jnp.maximum(jnp.dot(h, c2w_ref[...],
                            preferred_element_type=jnp.float32) + c2b_ref[...], 0.0)
    value = jnp.dot(h, c3w_ref[...],
                    preferred_element_type=jnp.float32) + c3b_ref[...]  # [Bb, 1]

    # ---- softmax over action_dim (exact divide: rows sum to 1 at 1e-5) ----
    m = jnp.max(logits, axis=1, keepdims=True)
    e = jnp.exp(logits - m)
    action = e / jnp.sum(e, axis=1, keepdims=True)

    # ---- lane-dense output slab: [softmax | value | zero pad] -> [Bb, 128] ----
    pad = jnp.zeros((Bb, out_ref.shape[1] - A - 1), jnp.float32)
    out_ref[...] = jnp.concatenate([action, value, pad], axis=1)


def _pick_block_b(B):
    # Largest batch block (multiple of 8) that divides B; else one whole-batch block.
    for cand in (128, 64, 32, 16, 8):
        if B % cand == 0:
            return cand
    return B


def actor_critic_forward(state_nchw, weight, params):
    """PPO forward: state [B,C,H,W] f32, weight [B,WD] f32 -> (value [B,1], action [B,A])."""
    B, C, H, W = state_nchw.shape
    A = params['fc_b'].shape[-1]
    WD = weight.shape[1]
    block_b = _pick_block_b(B)
    lanes = 128 * (-(-(A + 1) // 128))           # lane-dense output width (>= A+1)

    # Minimal XLA glue: NCHW -> NHWC + zero pad (im2col itself is fused in-kernel).
    x = jnp.transpose(state_nchw, (0, 2, 3, 1))
    x_pad = jnp.pad(x, ((0, 0), (1, 1), (1, 1), (0, 0)))

    def const_spec(shape):
        return pl.BlockSpec(shape, lambda i, _n=len(shape): (0,) * _n)

    in_specs = [
        pl.BlockSpec((block_b, H + 2, W + 2, C), lambda i: (i, 0, 0, 0)),
        pl.BlockSpec((block_b, WD), lambda i: (i, 0)),
        const_spec(params['conv_w'].shape),
        const_spec(params['conv_b'].shape),
        const_spec(params['fc_w'].shape),
        const_spec(params['fc_b'].shape),
        const_spec(params['c1_w'].shape),
        const_spec(params['c1_b'].shape),
        const_spec(params['c2_w'].shape),
        const_spec(params['c2_b'].shape),
        const_spec(params['c3_w'].shape),
        const_spec(params['c3_b'].shape),
    ]

    out = pl.pallas_call(
        actor_critic_kernel,
        out_shape=jax.ShapeDtypeStruct((B, lanes), jnp.float32),
        grid_spec=pltpu.PrefetchScalarGridSpec(
            num_scalar_prefetch=0,
            grid=(B // block_b,),
            in_specs=in_specs,
            out_specs=pl.BlockSpec((block_b, lanes), lambda i: (i, 0)),
        ),
        compiler_params=pltpu.CompilerParams(
            dimension_semantics=("parallel",),
            vmem_limit_bytes=32 * 1024 * 1024,
        ),
    )(x_pad, weight,
      params['conv_w'], params['conv_b'], params['fc_w'], params['fc_b'],
      params['c1_w'], params['c1_b'], params['c2_w'], params['c2_b'],
      params['c3_w'], params['c3_b'])

    action = out[:, 0:A]
    value = out[:, A:A + 1]
    return value, action


def init_params(key, C, OC, WD, A, H1=64, H2=64):
    ks = jax.random.split(key, 7)
    s = 0.1
    # conv weight in PyTorch layout [OC, C, 3, 3] -> [9, C, OC] with k = kh*3+kw
    conv_w_pt = s * jax.random.normal(ks[0], (OC, C, 3, 3), jnp.float32)
    conv_w = jnp.transpose(conv_w_pt, (2, 3, 1, 0)).reshape(9, C, OC)
    return {
        'conv_w': conv_w,
        'conv_b': s * jax.random.normal(ks[1], (1, OC), jnp.float32),
        'fc_w':   s * jax.random.normal(ks[2], (OC + WD, A), jnp.float32),  # fused [pooled|weight] fc
        'fc_b':   s * jax.random.normal(ks[3], (1, A), jnp.float32),
        'c1_w':   s * jax.random.normal(ks[4], (A, H1), jnp.float32),
        'c1_b':   jnp.zeros((1, H1), jnp.float32),
        'c2_w':   s * jax.random.normal(ks[5], (H1, H2), jnp.float32),
        'c2_b':   jnp.zeros((1, H2), jnp.float32),
        'c3_w':   s * jax.random.normal(ks[6], (H2, 1), jnp.float32),
        'c3_b':   jnp.zeros((1, 1), jnp.float32),
    }


def reference_forward(state_nchw, weight, params):
    """Pure-JAX reference of the same forward pass."""
    B, C, H, W = state_nchw.shape
    OC = params['conv_w'].shape[-1]
    x = jnp.transpose(state_nchw, (0, 2, 3, 1))
    xp = jnp.pad(x, ((0, 0), (1, 1), (1, 1), (0, 0)))
    conv = jnp.zeros((B, H, W, OC), jnp.float32)
    for k in range(9):
        kh, kw = divmod(k, 3)
        conv = conv + jnp.einsum('bhwc,co->bhwo',
                                 xp[:, kh:kh + H, kw:kw + W, :], params['conv_w'][k])
    conv = jnp.maximum(conv + params['conv_b'][0], 0.0)
    pooled = jnp.mean(conv, axis=(1, 2))
    feat = jnp.concatenate([pooled, weight], axis=1)
    logits = feat @ params['fc_w'] + params['fc_b']
    h = jnp.maximum(logits @ params['c1_w'] + params['c1_b'], 0.0)
    h = jnp.maximum(h @ params['c2_w'] + params['c2_b'], 0.0)
    value = h @ params['c3_w'] + params['c3_b']
    action = jax.nn.softmax(logits, axis=1)
    return value, action


if __name__ == "__main__":
    B, C, H, W = 2, 4, 16, 16      # NCHW state
    OC = 8                         # conv output channels
    A = 8                          # action_dim
    WD = 8                         # per-sample `weight` vector dim

    key = jax.random.PRNGKey(0)
    k_state, k_weight, k_param = jax.random.split(key, 3)
    state = jax.random.normal(k_state, (B, C, H, W), jnp.float32)
    weight = jax.random.normal(k_weight, (B, WD), jnp.float32)
    params = init_params(k_param, C, OC, WD, A)

    value, action = jax.jit(actor_critic_forward)(state, weight, params)
    value, action = jax.block_until_ready((value, action))

    ref_value, ref_action = reference_forward(state, weight, params)

    assert value.shape == (B, 1) and action.shape == (B, A)
    assert bool(jnp.all(jnp.isfinite(value))) and bool(jnp.all(jnp.isfinite(action)))
    assert bool(jnp.allclose(jnp.sum(action, axis=1), 1.0, atol=1e-5))
    assert bool(jnp.allclose(value, ref_value, atol=1e-4, rtol=1e-4))
    assert bool(jnp.allclose(action, ref_action, atol=1e-5, rtol=1e-4))
    print("KERNEL_OK")
</pallas_src>

<mosaic_0001>
module attributes {stable_mosaic.version = 11 : i64} {
  func.func @actor_critic_kernel(%arg0: i32, %arg1: memref<2x18x18x4xf32, #tpu.memory_space<vmem>>, %arg2: memref<2x8xf32, #tpu.memory_space<vmem>>, %arg3: memref<9x4x8xf32, #tpu.memory_space<vmem>>, %arg4: memref<1x8xf32, #tpu.memory_space<vmem>>, %arg5: memref<16x8xf32, #tpu.memory_space<vmem>>, %arg6: memref<1x8xf32, #tpu.memory_space<vmem>>, %arg7: memref<8x64xf32, #tpu.memory_space<vmem>>, %arg8: memref<1x64xf32, #tpu.memory_space<vmem>>, %arg9: memref<64x64xf32, #tpu.memory_space<vmem>>, %arg10: memref<1x64xf32, #tpu.memory_space<vmem>>, %arg11: memref<64x1xf32, #tpu.memory_space<vmem>>, %arg12: memref<1x1xf32, #tpu.memory_space<vmem>>, %arg13: memref<2x128xf32, #tpu.memory_space<vmem>>) attributes {dimension_semantics = [#tpu.dimension_semantics<parallel>], iteration_bounds = array<i64: 1>, scalar_prefetch = 0 : i64, scratch_operands = 0 : i64, tpu.core_type = #tpu.core_type<tc>, window_params = [{transform_indices = @transform_0, window_bounds = array<i64: 2, 18, 18, 4>}, {transform_indices = @transform_1, window_bounds = array<i64: 2, 8>}, {pipeline_mode = #tpu.pipeline_mode<synchronous>, transform_indices = @transform_2, window_bounds = array<i64: 9, 4, 8>}, {pipeline_mode = #tpu.pipeline_mode<synchronous>, transform_indices = @transform_3, window_bounds = array<i64: 1, 8>}, {pipeline_mode = #tpu.pipeline_mode<synchronous>, transform_indices = @transform_4, window_bounds = array<i64: 16, 8>}, {pipeline_mode = #tpu.pipeline_mode<synchronous>, transform_indices = @transform_5, window_bounds = array<i64: 1, 8>}, {pipeline_mode = #tpu.pipeline_mode<synchronous>, transform_indices = @transform_6, window_bounds = array<i64: 8, 64>}, {pipeline_mode = #tpu.pipeline_mode<synchronous>, transform_indices = @transform_7, window_bounds = array<i64: 1, 64>}, {pipeline_mode = #tpu.pipeline_mode<synchronous>, transform_indices = @transform_8, window_bounds = array<i64: 64, 64>}, {pipeline_mode = #tpu.pipeline_mode<synchronous>, transform_indices = @transform_9, window_bounds = array<i64: 1, 64>}, {pipeline_mode = #tpu.pipeline_mode<synchronous>, transform_indices = @transform_10, window_bounds = array<i64: 64, 1>}, {pipeline_mode = #tpu.pipeline_mode<synchronous>, transform_indices = @transform_11, window_bounds = array<i64: 1, 1>}, {transform_indices = @transform_12, window_bounds = array<i64: 2, 128>}]} {
    %cst = arith.constant 0.000000e+00 : f32
    %0 = vector.broadcast %cst : f32 to vector<512x8xf32>
    %c0 = arith.constant 0 : index
    %c0_0 = arith.constant 0 : index
    %c0_1 = arith.constant 0 : index
    %c0_2 = arith.constant 0 : index
    %1 = vector.load %arg1[%c0, %c0_0, %c0_1, %c0_2] : memref<2x18x18x4xf32, #tpu.memory_space<vmem>>, vector<2x16x16x4xf32>
    %2 = vector.shape_cast %1 : vector<2x16x16x4xf32> to vector<512x4xf32>
    %c0_3 = arith.constant 0 : index
    %c0_4 = arith.constant 0 : index
    %c0_5 = arith.constant 0 : index
    %3 = vector.load %arg3[%c0_3, %c0_4, %c0_5] : memref<9x4x8xf32, #tpu.memory_space<vmem>>, vector<1x4x8xf32>
    %4 = vector.shape_cast %3 : vector<1x4x8xf32> to vector<4x8xf32>
    %cst_6 = arith.constant dense<0.000000e+00> : vector<512x8xf32>
    %5 = tpu.matmul %2, %4, %cst_6 {dimension_numbers = #tpu.dot_dimension_numbers<[1], [0], [0], [1], [0, 0, 1, 1], [], []>} : vector<512x4xf32>, vector<4x8xf32>, vector<512x8xf32> -> vector<512x8xf32>
    %6 = arith.addf %0, %5 : vector<512x8xf32>
    %c0_7 = arith.constant 0 : index
    %c0_8 = arith.constant 0 : index
    %c1 = arith.constant 1 : index
    %c0_9 = arith.constant 0 : index
    %7 = vector.load %arg1[%c0_7, %c0_8, %c1, %c0_9] : memref<2x18x18x4xf32, #tpu.memory_space<vmem>>, vector<2x16x16x4xf32>
    %8 = vector.shape_cast %7 : vector<2x16x16x4xf32> to vector<512x4xf32>
    %c1_10 = arith.constant 1 : index
    %c0_11 = arith.constant 0 : index
    %c0_12 = arith.constant 0 : index
    %9 = vector.load %arg3[%c1_10, %c0_11, %c0_12] : memref<9x4x8xf32, #tpu.memory_space<vmem>>, vector<1x4x8xf32>
    %10 = vector.shape_cast %9 : vector<1x4x8xf32> to vector<4x8xf32>
    %cst_13 = arith.constant dense<0.000000e+00> : vector<512x8xf32>
    %11 = tpu.matmul %8, %10, %cst_13 {dimension_numbers = #tpu.dot_dimension_numbers<[1], [0], [0], [1], [0, 0, 1, 1], [], []>} : vector<512x4xf32>, vector<4x8xf32>, vector<512x8xf32> -> vector<512x8xf32>
    %12 = arith.addf %6, %11 : vector<512x8xf32>
    %c0_14 = arith.constant 0 : index
    %c0_15 = arith.constant 0 : index
    %c2 = arith.constant 2 : index
    %c0_16 = arith.constant 0 : index
    %13 = vector.load %arg1[%c0_14, %c0_15, %c2, %c0_16] : memref<2x18x18x4xf32, #tpu.memory_space<vmem>>, vector<2x16x16x4xf32>
    %14 = vector.shape_cast %13 : vector<2x16x16x4xf32> to vector<512x4xf32>
    %c2_17 = arith.constant 2 : index
    %c0_18 = arith.constant 0 : index
    %c0_19 = arith.constant 0 : index
    %15 = vector.load %arg3[%c2_17, %c0_18, %c0_19] : memref<9x4x8xf32, #tpu.memory_space<vmem>>, vector<1x4x8xf32>
    %16 = vector.shape_cast %15 : vector<1x4x8xf32> to vector<4x8xf32>
    %cst_20 = arith.constant dense<0.000000e+00> : vector<512x8xf32>
    %17 = tpu.matmul %14, %16, %cst_20 {dimension_numbers = #tpu.dot_dimension_numbers<[1], [0], [0], [1], [0, 0, 1, 1], [], []>} : vector<512x4xf32>, vector<4x8xf32>, vector<512x8xf32> -> vector<512x8xf32>
    %18 = arith.addf %12, %17 : vector<512x8xf32>
    %c0_21 = arith.constant 0 : index
    %c1_22 = arith.constant 1 : index
    %c0_23 = arith.constant 0 : index
    %c0_24 = arith.constant 0 : index
    %19 = vector.load %arg1[%c0_21, %c1_22, %c0_23, %c0_24] : memref<2x18x18x4xf32, #tpu.memory_space<vmem>>, vector<2x16x16x4xf32>
    %20 = vector.shape_cast %19 : vector<2x16x16x4xf32> to vector<512x4xf32>
    %c3 = arith.constant 3 : index
    %c0_25 = arith.constant 0 : index
    %c0_26 = arith.constant 0 : index
    %21 = vector.load %arg3[%c3, %c0_25, %c0_26] : memref<9x4x8xf32, #tpu.memory_space<vmem>>, vector<1x4x8xf32>
    %22 = vector.shape_cast %21 : vector<1x4x8xf32> to vector<4x8xf32>
    %cst_27 = arith.constant dense<0.000000e+00> : vector<512x8xf32>
    %23 = tpu.matmul %20, %22, %cst_27 {dimension_numbers = #tpu.dot_dimension_numbers<[1], [0], [0], [1], [0, 0, 1, 1], [], []>} : vector<512x4xf32>, vector<4x8xf32>, vector<512x8xf32> -> vector<512x8xf32>
    %24 = arith.addf %18, %23 : vector<512x8xf32>
    %c0_28 = arith.constant 0 : index
    %c1_29 = arith.constant 1 : index
    %c1_30 = arith.constant 1 : index
    %c0_31 = arith.constant 0 : index
    %25 = vector.load %arg1[%c0_28, %c1_29, %c1_30, %c0_31] : memref<2x18x18x4xf32, #tpu.memory_space<vmem>>, vector<2x16x16x4xf32>
    %26 = vector.shape_cast %25 : vector<2x16x16x4xf32> to vector<512x4xf32>
    %c4 = arith.constant 4 : index
    %c0_32 = arith.constant 0 : index
    %c0_33 = arith.constant 0 : index
    %27 = vector.load %arg3[%c4, %c0_32, %c0_33] : memref<9x4x8xf32, #tpu.memory_space<vmem>>, vector<1x4x8xf32>
    %28 = vector.shape_cast %27 : vector<1x4x8xf32> to vector<4x8xf32>
    %cst_34 = arith.constant dense<0.000000e+00> : vector<512x8xf32>
    %29 = tpu.matmul %26, %28, %cst_34 {dimension_numbers = #tpu.dot_dimension_numbers<[1], [0], [0], [1], [0, 0, 1, 1], [], []>} : vector<512x4xf32>, vector<4x8xf32>, vector<512x8xf32> -> vector<512x8xf32>
    %30 = arith.addf %24, %29 : vector<512x8xf32>
    %c0_35 = arith.constant 0 : index
    %c1_36 = arith.constant 1 : index
    %c2_37 = arith.constant 2 : index
    %c0_38 = arith.constant 0 : index
    %31 = vector.load %arg1[%c0_35, %c1_36, %c2_37, %c0_38] : memref<2x18x18x4xf32, #tpu.memory_space<vmem>>, vector<2x16x16x4xf32>
    %32 = vector.shape_cast %31 : vector<2x16x16x4xf32> to vector<512x4xf32>
    %c5 = arith.constant 5 : index
    %c0_39 = arith.constant 0 : index
    %c0_40 = arith.constant 0 : index
    %33 = vector.load %arg3[%c5, %c0_39, %c0_40] : memref<9x4x8xf32, #tpu.memory_space<vmem>>, vector<1x4x8xf32>
    %34 = vector.shape_cast %33 : vector<1x4x8xf32> to vector<4x8xf32>
    %cst_41 = arith.constant dense<0.000000e+00> : vector<512x8xf32>
    %35 = tpu.matmul %32, %34, %cst_41 {dimension_numbers = #tpu.dot_dimension_numbers<[1], [0], [0], [1], [0, 0, 1, 1], [], []>} : vector<512x4xf32>, vector<4x8xf32>, vector<512x8xf32> -> vector<512x8xf32>
    %36 = arith.addf %30, %35 : vector<512x8xf32>
    %c0_42 = arith.constant 0 : index
    %c2_43 = arith.constant 2 : index
    %c0_44 = arith.constant 0 : index
    %c0_45 = arith.constant 0 : index
    %37 = vector.load %arg1[%c0_42, %c2_43, %c0_44, %c0_45] : memref<2x18x18x4xf32, #tpu.memory_space<vmem>>, vector<2x16x16x4xf32>
    %38 = vector.shape_cast %37 : vector<2x16x16x4xf32> to vector<512x4xf32>
    %c6 = arith.constant 6 : index
    %c0_46 = arith.constant 0 : index
    %c0_47 = arith.constant 0 : index
    %39 = vector.load %arg3[%c6, %c0_46, %c0_47] : memref<9x4x8xf32, #tpu.memory_space<vmem>>, vector<1x4x8xf32>
    %40 = vector.shape_cast %39 : vector<1x4x8xf32> to vector<4x8xf32>
    %cst_48 = arith.constant dense<0.000000e+00> : vector<512x8xf32>
    %41 = tpu.matmul %38, %40, %cst_48 {dimension_numbers = #tpu.dot_dimension_numbers<[1], [0], [0], [1], [0, 0, 1, 1], [], []>} : vector<512x4xf32>, vector<4x8xf32>, vector<512x8xf32> -> vector<512x8xf32>
    %42 = arith.addf %36, %41 : vector<512x8xf32>
    %c0_49 = arith.constant 0 : index
    %c2_50 = arith.constant 2 : index
    %c1_51 = arith.constant 1 : index
    %c0_52 = arith.constant 0 : index
    %43 = vector.load %arg1[%c0_49, %c2_50, %c1_51, %c0_52] : memref<2x18x18x4xf32, #tpu.memory_space<vmem>>, vector<2x16x16x4xf32>
    %44 = vector.shape_cast %43 : vector<2x16x16x4xf32> to vector<512x4xf32>
    %c7 = arith.constant 7 : index
    %c0_53 = arith.constant 0 : index
    %c0_54 = arith.constant 0 : index
    %45 = vector.load %arg3[%c7, %c0_53, %c0_54] : memref<9x4x8xf32, #tpu.memory_space<vmem>>, vector<1x4x8xf32>
    %46 = vector.shape_cast %45 : vector<1x4x8xf32> to vector<4x8xf32>
    %cst_55 = arith.constant dense<0.000000e+00> : vector<512x8xf32>
    %47 = tpu.matmul %44, %46, %cst_55 {dimension_numbers = #tpu.dot_dimension_numbers<[1], [0], [0], [1], [0, 0, 1, 1], [], []>} : vector<512x4xf32>, vector<4x8xf32>, vector<512x8xf32> -> vector<512x8xf32>
    %48 = arith.addf %42, %47 : vector<512x8xf32>
    %c0_56 = arith.constant 0 : index
    %c2_57 = arith.constant 2 : index
    %c2_58 = arith.constant 2 : index
    %c0_59 = arith.constant 0 : index
    %49 = vector.load %arg1[%c0_56, %c2_57, %c2_58, %c0_59] : memref<2x18x18x4xf32, #tpu.memory_space<vmem>>, vector<2x16x16x4xf32>
    %50 = vector.shape_cast %49 : vector<2x16x16x4xf32> to vector<512x4xf32>
    %c8 = arith.constant 8 : index
    %c0_60 = arith.constant 0 : index
    %c0_61 = arith.constant 0 : index
    %51 = vector.load %arg3[%c8, %c0_60, %c0_61] : memref<9x4x8xf32, #tpu.memory_space<vmem>>, vector<1x4x8xf32>
    %52 = vector.shape_cast %51 : vector<1x4x8xf32> to vector<4x8xf32>
    %cst_62 = arith.constant dense<0.000000e+00> : vector<512x8xf32>
    %53 = tpu.matmul %50, %52, %cst_62 {dimension_numbers = #tpu.dot_dimension_numbers<[1], [0], [0], [1], [0, 0, 1, 1], [], []>} : vector<512x4xf32>, vector<4x8xf32>, vector<512x8xf32> -> vector<512x8xf32>
    %54 = arith.addf %48, %53 : vector<512x8xf32>
    %c0_63 = arith.constant 0 : index
    %c0_64 = arith.constant 0 : index
    %55 = vector.load %arg4[%c0_63, %c0_64] : memref<1x8xf32, #tpu.memory_space<vmem>>, vector<1x8xf32>
    %56 = vector.broadcast %55 : vector<1x8xf32> to vector<512x8xf32>
    %57 = arith.addf %54, %56 : vector<512x8xf32>
    %cst_65 = arith.constant 0.000000e+00 : f32
    %58 = vector.broadcast %cst_65 : f32 to vector<512x8xf32>
    %59 = arith.maximumf %57, %58 : vector<512x8xf32>
    %60 = vector.shape_cast %59 : vector<512x8xf32> to vector<2x256x8xf32>
    %cst_66 = arith.constant dense<0.000000e+00> : vector<2x8xf32>
    %61 = vector.multi_reduction <add>, %60, %cst_66 [1] : vector<2x256x8xf32> to vector<2x8xf32>
    %cst_67 = arith.constant 3.906250e-03 : f32
    %62 = vector.broadcast %cst_67 : f32 to vector<2x8xf32>
    %63 = arith.mulf %61, %62 : vector<2x8xf32>
    %c0_68 = arith.constant 0 : index
    %c0_69 = arith.constant 0 : index
    %64 = vector.load %arg5[%c0_68, %c0_69] : memref<16x8xf32, #tpu.memory_space<vmem>>, vector<8x8xf32>
    %cst_70 = arith.constant dense<0.000000e+00> : vector<2x8xf32>
    %65 = tpu.matmul %63, %64, %cst_70 {dimension_numbers = #tpu.dot_dimension_numbers<[1], [0], [0], [1], [0, 0, 1, 1], [], []>} : vector<2x8xf32>, vector<8x8xf32>, vector<2x8xf32> -> vector<2x8xf32>
    %c0_71 = arith.constant 0 : index
    %c0_72 = arith.constant 0 : index
    %66 = vector.load %arg2[%c0_71, %c0_72] : memref<2x8xf32, #tpu.memory_space<vmem>>, vector<2x8xf32>
    %c8_73 = arith.constant 8 : index
    %c0_74 = arith.constant 0 : index
    %67 = vector.load %arg5[%c8_73, %c0_74] : memref<16x8xf32, #tpu.memory_space<vmem>>, vector<8x8xf32>
    %cst_75 = arith.constant dense<0.000000e+00> : vector<2x8xf32>
    %68 = tpu.matmul %66, %67, %cst_75 {dimension_numbers = #tpu.dot_dimension_numbers<[1], [0], [0], [1], [0, 0, 1, 1], [], []>} : vector<2x8xf32>, vector<8x8xf32>, vector<2x8xf32> -> vector<2x8xf32>
    %69 = arith.addf %65, %68 : vector<2x8xf32>
    %c0_76 = arith.constant 0 : index
    %c0_77 = arith.constant 0 : index
    %70 = vector.load %arg6[%c0_76, %c0_77] : memref<1x8xf32, #tpu.memory_space<vmem>>, vector<1x8xf32>
    %71 = vector.broadcast %70 : vector<1x8xf32> to vector<2x8xf32>
    %72 = arith.addf %69, %71 : vector<2x8xf32>
    %c0_78 = arith.constant 0 : index
    %c0_79 = arith.constant 0 : index
    %73 = vector.load %arg7[%c0_78, %c0_79] : memref<8x64xf32, #tpu.memory_space<vmem>>, vector<8x64xf32>
    %cst_80 = arith.constant dense<0.000000e+00> : vector<2x64xf32>
    %74 = tpu.matmul %72, %73, %cst_80 {dimension_numbers = #tpu.dot_dimension_numbers<[1], [0], [0], [1], [0, 0, 1, 1], [], []>} : vector<2x8xf32>, vector<8x64xf32>, vector<2x64xf32> -> vector<2x64xf32>
    %c0_81 = arith.constant 0 : index
    %c0_82 = arith.constant 0 : index
    %75 = vector.load %arg8[%c0_81, %c0_82] : memref<1x64xf32, #tpu.memory_space<vmem>>, vector<1x64xf32>
    %76 = vector.broadcast %75 : vector<1x64xf32> to vector<2x64xf32>
    %77 = arith.addf %74, %76 : vector<2x64xf32>
    %cst_83 = arith.constant 0.000000e+00 : f32
    %78 = vector.broadcast %cst_83 : f32 to vector<2x64xf32>
    %79 = arith.maximumf %77, %78 : vector<2x64xf32>
    %c0_84 = arith.constant 0 : index
    %c0_85 = arith.constant 0 : index
    %80 = vector.load %arg9[%c0_84, %c0_85] : memref<64x64xf32, #tpu.memory_space<vmem>>, vector<64x64xf32>
    %cst_86 = arith.constant dense<0.000000e+00> : vector<2x64xf32>
    %81 = tpu.matmul %79, %80, %cst_86 {dimension_numbers = #tpu.dot_dimension_numbers<[1], [0], [0], [1], [0, 0, 1, 1], [], []>} : vector<2x64xf32>, vector<64x64xf32>, vector<2x64xf32> -> vector<2x64xf32>
    %c0_87 = arith.constant 0 : index
    %c0_88 = arith.constant 0 : index
    %82 = vector.load %arg10[%c0_87, %c0_88] : memref<1x64xf32, #tpu.memory_space<vmem>>, vector<1x64xf32>
    %83 = vector.broadcast %82 : vector<1x64xf32> to vector<2x64xf32>
    %84 = arith.addf %81, %83 : vector<2x64xf32>
    %cst_89 = arith.constant 0.000000e+00 : f32
    %85 = vector.broadcast %cst_89 : f32 to vector<2x64xf32>
    %86 = arith.maximumf %84, %85 : vector<2x64xf32>
    %c0_90 = arith.constant 0 : index
    %c0_91 = arith.constant 0 : index
    %87 = vector.load %arg11[%c0_90, %c0_91] : memref<64x1xf32, #tpu.memory_space<vmem>>, vector<64x1xf32>
    %cst_92 = arith.constant dense<0.000000e+00> : vector<2x1xf32>
    %88 = tpu.matmul %86, %87, %cst_92 {dimension_numbers = #tpu.dot_dimension_numbers<[1], [0], [0], [1], [0, 0, 1, 1], [], []>} : vector<2x64xf32>, vector<64x1xf32>, vector<2x1xf32> -> vector<2x1xf32>
    %c0_93 = arith.constant 0 : index
    %c0_94 = arith.constant 0 : index
    %89 = vector.load %arg12[%c0_93, %c0_94] : memref<1x1xf32, #tpu.memory_space<vmem>>, vector<1x1xf32>
    %90 = vector.broadcast %89 : vector<1x1xf32> to vector<2x1xf32>
    %91 = arith.addf %88, %90 : vector<2x1xf32>
    %cst_95 = arith.constant dense<0xFF800000> : vector<2xf32>
    %92 = vector.multi_reduction <maximumf>, %72, %cst_95 [1] : vector<2x8xf32> to vector<2xf32>
    %93 = vector.shape_cast %92 : vector<2xf32> to vector<2x1xf32>
    %94 = vector.broadcast %93 : vector<2x1xf32> to vector<2x8xf32>
    %95 = arith.subf %72, %94 : vector<2x8xf32>
    %96 = math.exp %95 : vector<2x8xf32>
    %cst_96 = arith.constant dense<0.000000e+00> : vector<2xf32>
    %97 = vector.multi_reduction <add>, %96, %cst_96 [1] : vector<2x8xf32> to vector<2xf32>
    %98 = vector.shape_cast %97 : vector<2xf32> to vector<2x1xf32>
    %99 = vector.broadcast %98 : vector<2x1xf32> to vector<2x8xf32>
    %100 = arith.divf %96, %99 : vector<2x8xf32>
    %cst_97 = arith.constant 0.000000e+00 : f32
    %101 = vector.broadcast %cst_97 : f32 to vector<2x119xf32>
    %102 = tpu.concatenate %100, %91, %101 in 1 : vector<2x8xf32>, vector<2x1xf32>, vector<2x119xf32> -> vector<2x128xf32>
    %c0_98 = arith.constant 0 : index
    %c0_99 = arith.constant 0 : index
    %103 = vector.load %arg13[%c0_98, %c0_99] : memref<2x128xf32, #tpu.memory_space<vmem>>, vector<2x128xf32>
    tpu.vector_store %arg13[%c0_98, %c0_99], %102 {strides = array<i32>} : memref<2x128xf32, #tpu.memory_space<vmem>>, vector<2x128xf32>,
    return
  }
  func.func @transform_0(%arg0: i32) -> (i32, i32, i32, i32) {
    %c0_i32 = arith.constant 0 : i32
    %c0_i32_0 = arith.constant 0 : i32
    %c0_i32_1 = arith.constant 0 : i32
    %c0_i32_2 = arith.constant 0 : i32
    return %arg0, %c0_i32, %c0_i32_0, %c0_i32_1 : i32, i32, i32, i32
  }
  func.func @transform_1(%arg0: i32) -> (i32, i32) {
    %c0_i32 = arith.constant 0 : i32
    %c0_i32_0 = arith.constant 0 : i32
    return %arg0, %c0_i32 : i32, i32
  }
  func.func @transform_2(%arg0: i32) -> (i32, i32, i32) {
    %c0_i32 = arith.constant 0 : i32
    %c0_i32_0 = arith.constant 0 : i32
    %c0_i32_1 = arith.constant 0 : i32
    %c0_i32_2 = arith.constant 0 : i32
    return %c0_i32, %c0_i32_0, %c0_i32_1 : i32, i32, i32
  }
  func.func @transform_3(%arg0: i32) -> (i32, i32) {
    %c0_i32 = arith.constant 0 : i32
    %c0_i32_0 = arith.constant 0 : i32
    %c0_i32_1 = arith.constant 0 : i32
    return %c0_i32, %c0_i32_0 : i32, i32
  }
  func.func @transform_4(%arg0: i32) -> (i32, i32) {
    %c0_i32 = arith.constant 0 : i32
    %c0_i32_0 = arith.constant 0 : i32
    %c0_i32_1 = arith.constant 0 : i32
    return %c0_i32, %c0_i32_0 : i32, i32
  }
  func.func @transform_5(%arg0: i32) -> (i32, i32) {
    %c0_i32 = arith.constant 0 : i32
    %c0_i32_0 = arith.constant 0 : i32
    %c0_i32_1 = arith.constant 0 : i32
    return %c0_i32, %c0_i32_0 : i32, i32
  }
  func.func @transform_6(%arg0: i32) -> (i32, i32) {
    %c0_i32 = arith.constant 0 : i32
    %c0_i32_0 = arith.constant 0 : i32
    %c0_i32_1 = arith.constant 0 : i32
    return %c0_i32, %c0_i32_0 : i32, i32
  }
  func.func @transform_7(%arg0: i32) -> (i32, i32) {
    %c0_i32 = arith.constant 0 : i32
    %c0_i32_0 = arith.constant 0 : i32
    %c0_i32_1 = arith.constant 0 : i32
    return %c0_i32, %c0_i32_0 : i32, i32
  }
  func.func @transform_8(%arg0: i32) -> (i32, i32) {
    %c0_i32 = arith.constant 0 : i32
    %c0_i32_0 = arith.constant 0 : i32
    %c0_i32_1 = arith.constant 0 : i32
    return %c0_i32, %c0_i32_0 : i32, i32
  }
  func.func @transform_9(%arg0: i32) -> (i32, i32) {
    %c0_i32 = arith.constant 0 : i32
    %c0_i32_0 = arith.constant 0 : i32
    %c0_i32_1 = arith.constant 0 : i32
    return %c0_i32, %c0_i32_0 : i32, i32
  }
  func.func @transform_10(%arg0: i32) -> (i32, i32) {
    %c0_i32 = arith.constant 0 : i32
    %c0_i32_0 = arith.constant 0 : i32
    %c0_i32_1 = arith.constant 0 : i32
    return %c0_i32, %c0_i32_0 : i32, i32
  }
  func.func @transform_11(%arg0: i32) -> (i32, i32) {
    %c0_i32 = arith.constant 0 : i32
    %c0_i32_0 = arith.constant 0 : i32
    %c0_i32_1 = arith.constant 0 : i32
    return %c0_i32, %c0_i32_0 : i32, i32
  }
  func.func @transform_12(%arg0: i32) -> (i32, i32) {
    %c0_i32 = arith.constant 0 : i32
    %c0_i32_0 = arith.constant 0 : i32
    return %arg0, %c0_i32 : i32, i32
  }
}

</mosaic_0001>

<bundles_post_ra>
// kernel: actor_critic_forward.1
= control target key start
LH: loop header
LB: loop body
LE: loop exit
PB: predicated region body
PF: predicated region fallthrough
CT: control target
= control target key end

     0   :  { %vm367_vm0 = vcmask 1043456   ;;  %vm174_vm1 = vcmask 31744   ;;  %vm6443_vm2 = vcmask 64512   ;;  %vm9569_vm3 = vmmov 0   ;;  %s13851_s2 = inlined_call_operand.vmem [shape: f32[9,4,8], index: 2, kind: input, shape index: {}]   ;;  %s13852_s0 = inlined_call_operand.vmem [shape: f32[2,18,18,4], index: 0, kind: input, shape index: {}]   ;;  %s13853_s4 = inlined_call_operand.vmem [shape: f32[16,8], index: 4, kind: input, shape index: {}]   ;;  %s13854_s3 = inlined_call_operand.vmem [shape: f32[1,8], index: 3, kind: input, shape index: {}]   ;;  %s13855_s1 = inlined_call_operand.vmem [shape: f32[2,8], index: 1, kind: input, shape index: {}]   ;;  %s13856_s6 = inlined_call_operand.vmem [shape: f32[8,64], index: 6, kind: input, shape index: {}]   ;;  %s13857_s5 = inlined_call_operand.vmem [shape: f32[1,8], index: 5, kind: input, shape index: {}]   ;;  %s13858_s8 = inlined_call_operand.vmem [shape: f32[64,64], index: 8, kind: input, shape index: {}]   ;;  %s13859_s7 = inlined_call_operand.vmem [shape: f32[1,64], index: 7, kind: input, shape index: {}]   ;;  %s13860_s10 = inlined_call_operand.vmem [shape: f32[64,1], index: 10, kind: input, shape index: {}]   ;;  %s13861_s11 = inlined_call_operand.<no memory space> [shape: f32[1,1], index: 11, kind: input, shape index: {}]   ;;  %s13862_s9 = inlined_call_operand.vmem [shape: f32[1,64], index: 9, kind: input, shape index: {}]   ;;  %s13863_s12 = inlined_call_operand.vmem [shape: f32[2,128], index: 12, kind: output, shape index: {}]  }
   0x1   :  { %v7028_v0 = vld [vmem:[%s13851_s2 + $0x4] sm:$0xf]  ;;  %v109_v3 = vld [vmem:[%s13852_s0 + $0x9] sm:$0xff]  ;;  %v9661_v6 = vld [vmem:[%s13852_s0 + $0x19] sm:$0xff]  ;;  %vm6662_vm4 = vcmask 1041409   ;;  %vm7004_vm5 = vcmask 58368  }
   0x2   :  { %v108_v1 = vld [vmem:[%s13852_s0 + $0x1] sm:$0xff]  ;;  %8624 = vmatprep.subr.msk.mxu0 %vm367_vm0, %v7028_v0  ;;  %9559 = vmatprep.subr.msk.mxu1 %vm367_vm0, %v7028_v0  ;;  %v153_v4 = vld [vmem:[%s13852_s0 + $0x249] sm:$0xff]  ;;  %v154_v7 = vld [vmem:[%s13852_s0 + $0x259] sm:$0xff]  ;;  %vm6841_vm6 = vcmask 523264   ;;  %vm7021_vm7 = vcmask 72704  }
   0x3   :  { %v152_v2 = vld [vmem:[%s13852_s0 + $0x241] sm:$0xff]  ;;  %8625 = vmatpush3.msk.msra.mxu0 %vm367_vm0, %v7028_v0  ;;  %9560 = vmatpush3.msk.msra.mxu1 %vm367_vm0, %v7028_v0  ;;  %v9686_v10 = vld [vmem:[%s13852_s0 + $0x31] sm:$0xff]  ;;  %v9700_v12 = vld [vmem:[%s13852_s0 + $0x39] sm:$0xff] }
   0x4   :  { %v7159_v5 = vld [vmem:[%s13851_s2 + $0x8] sm:$0xf]  ;;  %8626 = vmatprep.mubr.msk.f32.mxu0 %vm174_vm1, %v108_v1  ;;  %8692 = vmatprep.mubr.msk.f32.mxu1 %vm174_vm1, %v152_v2  ;;  %v156_v11 = vld [vmem:[%s13852_s0 + $0x271] sm:$0xff]  ;;  %v157_v13 = vld [vmem:[%s13852_s0 + $0x279] sm:$0xff] }
   0x5   :  { %8627 = vmatmul.mubr.msk.f32.vlgmr.msra.gmra.mxu0 %vm174_vm1, %v109_v3  ;;  %8693 = vmatmul.mubr.msk.f32.vlgmr.msra.gmra.mxu1 %vm174_vm1, %v153_v4  ;;  %v9676_v8 = vld [vmem:[%s13852_s0 + $0x21] sm:$0xff]  ;;  %v9708_v14 = vld [vmem:[%s13852_s0 + $0x49] sm:$0xff]  ;;  %v9722_v16 = vld [vmem:[%s13852_s0 + $0x51] sm:$0xff] }
   0x6   :  { %8820 = vmatprep.subr.msk.mxu0 %vm367_vm0, %v7159_v5  ;;  %8629 = vmatprep.mubr.msk.f32.mxu0 %vm174_vm1, %v9661_v6  ;;  %v155_v9 = vld [vmem:[%s13852_s0 + $0x261] sm:$0xff]  ;;  %v158_v15 = vld [vmem:[%s13852_s0 + $0x289] sm:$0xff]  ;;  %v159_v17 = vld [vmem:[%s13852_s0 + $0x291] sm:$0xff] }
   0x7   :  { %8821 = vmatpush3.msk.msra.mxu0 %vm367_vm0, %v7159_v5  ;;  %8695 = vmatprep.mubr.msk.f32.mxu1 %vm174_vm1, %v154_v7  ;;  %v9730_v18 = vld [vmem:[%s13852_s0 + $0x61] sm:$0xff]  ;;  %v9748_v21 = vld [vmem:[%s13852_s0 + $0x69] sm:$0xff]  ;;  %v9756_v23 = vld [vmem:[%s13852_s0 + $0x79] sm:$0xff] }
   0x8   :  { %v160_v19 = vld [vmem:[%s13852_s0 + $0x2a1] sm:$0xff]  ;;  %v161_v22 = vld [vmem:[%s13852_s0 + $0x2a9] sm:$0xff]  ;;  %v162_v24 = vld [vmem:[%s13852_s0 + $0x2b9] sm:$0xff] }
   0x9   :  { %8630 = vmatmul.mubr.msk.f32.gmra.mxu0 %vm174_vm1, %v9676_v8  ;;  %8696 = vmatmul.mubr.msk.f32.gmra.mxu1 %vm174_vm1, %v155_v9  ;;  %v107_v20 = vld [vmem:[%s13851_s2] sm:$0xf]  ;;  %v9779_v27 = vld [vmem:[%s13852_s0 + $0x91] sm:$0xff]  ;;  %v9801_v31 = vld [vmem:[%s13852_s0 + $0xa9] sm:$0xff] }
   0xa   :  { %8632 = vmatprep.mubr.msk.f32.mxu0 %vm174_vm1, %v9686_v10  ;;  %8698 = vmatprep.mubr.msk.f32.mxu1 %vm174_vm1, %v156_v11  ;;  %v9771_v25 = vld [vmem:[%s13852_s0 + $0x81] sm:$0xff]  ;;  %v164_v28 = vld [vmem:[%s13852_s0 + $0x2d1] sm:$0xff]  ;;  %v9793_v29 = vld [vmem:[%s13852_s0 + $0x99] sm:$0xff] }
   0xb   :  { %8722 = vmatprep.subr.msk.mxu1 %vm367_vm0, %v107_v20  ;;  %v163_v26 = vld [vmem:[%s13852_s0 + $0x2c1] sm:$0xff]  ;;  %v165_v30 = vld [vmem:[%s13852_s0 + $0x2d9] sm:$0xff]  ;;  %v166_v32 = vld [vmem:[%s13852_s0 + $0x2e9] sm:$0xff] }
   0xc   :  { %8723 = vmatpush3.msk.msra.mxu1 %vm367_vm0, %v107_v20  ;;  %v9815_v33 = vld [vmem:[%s13852_s0 + $0xb1] sm:$0xff]  ;;  %v9823_v35 = vld [vmem:[%s13852_s0 + $0xc1] sm:$0xff]  ;;  %v7289_v37 = vld [vmem:[%s13851_s2 + $0xc] sm:$0xf] }
   0xd   :  { %8633 = vmatmul.mubr.msk.f32.gmra.mxu0 %vm174_vm1, %v9700_v12  ;;  %8699 = vmatmul.mubr.msk.f32.gmra.mxu1 %vm174_vm1, %v157_v13  ;;  %v167_v34 = vld [vmem:[%s13852_s0 + $0x2f1] sm:$0xff]  ;;  %v168_v36 = vld [vmem:[%s13852_s0 + $0x301] sm:$0xff]  ;;  %v9846_v39 = vld [vmem:[%s13852_s0 + $0xc9] sm:$0xff] }
   0xe   :  { %8635 = vmatprep.mubr.msk.f32.mxu0 %vm174_vm1, %v9708_v14  ;;  %8701 = vmatprep.mubr.msk.f32.mxu1 %vm174_vm1, %v158_v15  ;;  %v9838_v38 = vld [vmem:[%s13851_s2 + $0x10] sm:$0xf]  ;;  %v9854_v41 = vld [vmem:[%s13852_s0 + $0xd9] sm:$0xff]  ;;  %v9870_v43 = vld [vmem:[%s13852_s0 + $0xe1] sm:$0xff] }
   0xf   :  { %8918 = vmatprep.subr.msk.mxu1 %vm367_vm0, %v7289_v37  ;;  %v169_v40 = vld [vmem:[%s13852_s0 + $0x309] sm:$0xff]  ;;  %v170_v42 = vld [vmem:[%s13852_s0 + $0x319] sm:$0xff]  ;;  %9016 = vmatprep.subr.msk.mxu0 %vm367_vm0, %v9838_v38  ;;  %13888 = vst [vmem:[#allocation3_spill] sm:$0xff] %v9870_v43  ;;  %v171_v44 = vld [vmem:[%s13852_s0 + $0x321] sm:$0xff] }
  0x10   :  { %v9878_v45 = vld [vmem:[%s13852_s0 + $0xf1] sm:$0xff]  ;;  %v43_v46 = vld [vmem:[%s13852_s0] sm:$0xff]  ;;  %v44_v48 = vld [vmem:[%s13852_s0 + $0x8] sm:$0xff] }
  0x11   :  { %8636 = vmatmul.mubr.msk.f32.gmra.mxu0 %vm174_vm1, %v9722_v16  ;;  %8702 = vmatmul.mubr.msk.f32.gmra.mxu1 %vm174_vm1, %v159_v17  ;;  %13889 = vst [vmem:[#allocation4_spill] sm:$0xff] %v9878_v45  ;;  %v9892_v47 = vld [vmem:[%s13852_s0 + $0xf9] sm:$0xff]  ;;  %v130_v49 = vld [vmem:[%s13852_s0 + $0x109] sm:$0xff]  ;;  %v131_v51 = vld [vmem:[%s13852_s0 + $0x111] sm:$0xff] }
  0x12   :  { %8638 = vmatprep.mubr.msk.f32.mxu0 %vm174_vm1, %v9730_v18  ;;  %8704 = vmatprep.mubr.msk.f32.mxu1 %vm174_vm1, %v160_v19  ;;  %13890 = vst [vmem:[#allocation5_spill] sm:$0xff] %v9892_v47  ;;  %v9903_v50 = vld [vmem:[%s13852_s0 + $0x18] sm:$0xff]  ;;  %v9917_v52 = vld [vmem:[%s13852_s0 + $0x20] sm:$0xff]  ;;  %v9925_v54 = vld [vmem:[%s13852_s0 + $0x30] sm:$0xff] }
  0x13   :  { %v132_v53 = vld [vmem:[%s13852_s0 + $0x121] sm:$0xff]  ;;  %v133_v55 = vld [vmem:[%s13852_s0 + $0x129] sm:$0xff]  ;;  %v9940_v56 = vld [vmem:[%s13852_s0 + $0x38] sm:$0xff] }
  0x14   :  { %v134_v57 = vld [vmem:[%s13852_s0 + $0x139] sm:$0xff]  ;;  %v9948_v58 = vld [vmem:[%s13852_s0 + $0x48] sm:$0xff]  ;;  %v9962_v60 = vld [vmem:[%s13852_s0 + $0x50] sm:$0xff] }
  0x15   :  { %8639 = vmatmul.mubr.msk.f32.gmra.mxu0 %vm174_vm1, %v9748_v21  ;;  %8705 = vmatmul.mubr.msk.f32.gmra.mxu1 %vm174_vm1, %v161_v22  ;;  %v135_v59 = vld [vmem:[%s13852_s0 + $0x141] sm:$0xff]  ;;  %v136_v61 = vld [vmem:[%s13852_s0 + $0x151] sm:$0xff]  ;;  %v137_v63 = vld [vmem:[%s13852_s0 + $0x159] sm:$0xff] }
  0x16   :  { %8641 = vmatprep.mubr.msk.f32.mxu0 %vm174_vm1, %v9756_v23  ;;  %8707 = vmatprep.mubr.msk.f32.mxu1 %vm174_vm1, %v162_v24  ;;  %v9970_v62 = vld [vmem:[%s13852_s0 + $0x60] sm:$0xff]  ;;  %v9984_v0 = vld [vmem:[%s13852_s0 + $0x68] sm:$0xff]  ;;  %v9992_v2 = vld [vmem:[%s13852_s0 + $0x78] sm:$0xff] }
  0x17   :  { %v138_v1 = vld [vmem:[%s13852_s0 + $0x169] sm:$0xff]  ;;  %v139_v3 = vld [vmem:[%s13852_s0 + $0x171] sm:$0xff]  ;;  %v10006_v4 = vld [vmem:[%s13852_s0 + $0x80] sm:$0xff] }
  0x18   :  { %v140_v5 = vld [vmem:[%s13852_s0 + $0x1b1] sm:$0xff]  ;;  %v141_v9 = vld [vmem:[%s13852_s0 + $0x1b9] sm:$0xff]  ;;  %v142_v13 = vld [vmem:[%s13852_s0 + $0x1c9] sm:$0xff] }
  0x19   :  { %8642 = vmatmul.mubr.msk.f32.gmra.mxu0 %vm174_vm1, %v9771_v25  ;;  %8708 = vmatmul.mubr.msk.f32.gmra.mxu1 %vm174_vm1, %v163_v26  ;;  %v10014_v7 = vld [vmem:[%s13852_s0 + $0x90] sm:$0xff]  ;;  %v10028_v11 = vld [vmem:[%s13852_s0 + $0x98] sm:$0xff]  ;;  %v10036_v15 = vld [vmem:[%s13852_s0 + $0xa8] sm:$0xff] }
  0x1a   :  { %8644 = vmatprep.mubr.msk.f32.mxu0 %vm174_vm1, %v9779_v27  ;;  %8710 = vmatprep.mubr.msk.f32.mxu1 %vm174_vm1, %v164_v28  ;;  %v143_v17 = vld [vmem:[%s13852_s0 + $0x1d1] sm:$0xff]  ;;  %v144_v20 = vld [vmem:[%s13852_s0 + $0x1e1] sm:$0xff]  ;;  %v145_v24 = vld [vmem:[%s13852_s0 + $0x1e9] sm:$0xff] }
  0x1b   :  { %v10050_v19 = vld [vmem:[%s13852_s0 + $0xb0] sm:$0xff]  ;;  %v10058_v22 = vld [vmem:[%s13852_s0 + $0xc0] sm:$0xff]  ;;  %v10072_v26 = vld [vmem:[%s13852_s0 + $0xc8] sm:$0xff] }
  0x1c   :  { %v146_v28 = vld [vmem:[%s13852_s0 + $0x1f9] sm:$0xff] }
  0x1d   :  { %8645 = vmatmul.mubr.msk.f32.gmra.mxu0 %vm174_vm1, %v9793_v29  ;;  %8711 = vmatmul.mubr.msk.f32.gmra.mxu1 %vm174_vm1, %v165_v30  ;;  %v10080_v30 = vld [vmem:[%s13852_s0 + $0xd8] sm:$0xff] }
  0x1e   :  { %8647 = vmatprep.mubr.msk.f32.mxu0 %vm174_vm1, %v9801_v31  ;;  %8713 = vmatprep.mubr.msk.f32.mxu1 %vm174_vm1, %v166_v32  ;;  %v147_v32 = vld [vmem:[%s13852_s0 + $0x201] sm:$0xff] }
  0x21   :  { %8648 = vmatmul.mubr.msk.f32.gmra.mxu0 %vm174_vm1, %v9815_v33  ;;  %8714 = vmatmul.mubr.msk.f32.gmra.mxu1 %vm174_vm1, %v167_v34  ;;  %v10094_v34 = vld [vmem:[%s13852_s0 + $0xe0] sm:$0xff] }
  0x22   :  { %8650 = vmatprep.mubr.msk.f32.mxu0 %vm174_vm1, %v9823_v35  ;;  %8716 = vmatprep.mubr.msk.f32.mxu1 %vm174_vm1, %v168_v36  ;;  %v148_v36 = vld [vmem:[%s13852_s0 + $0x211] sm:$0xff] }
  0x25   :  { %8651 = vmatmul.mubr.msk.f32.gmra.mxu0 %vm174_vm1, %v9846_v39  ;;  %8717 = vmatmul.mubr.msk.f32.gmra.mxu1 %vm174_vm1, %v169_v40  ;;  %v149_v40 = vld [vmem:[%s13852_s0 + $0x219] sm:$0xff] }
  0x26   :  { %8653 = vmatprep.mubr.msk.f32.mxu0 %vm174_vm1, %v9854_v41  ;;  %8719 = vmatprep.mubr.msk.f32.mxu1 %vm174_vm1, %v170_v42  ;;  %v10116_v42 = vld [vmem:[%s13852_s0 + $0xf8] sm:$0xff] }
  0x29   :  { %8654 = vmatmul.mubr.msk.f32.gmra.mxu0 %vm174_vm1, %v9870_v43  ;;  %8720 = vmatmul.mubr.msk.f32.gmra.mxu1 %vm174_vm1, %v171_v44  ;;  %v150_v44 = vld [vmem:[%s13852_s0 + $0x229] sm:$0xff]  ;;  %v1357_v43 = vld [vmem:[%s13852_s0 + $0xfa] sm:$0xff] }
  0x2a   :  { %8656 = vmatprep.mubr.msk.f32.mxu0 %vm174_vm1, %v9878_v45  ;;  %8724 = vmatprep.mubr.msk.f32.mxu1 %vm174_vm1, %v43_v46  ;;  %v10124_v46 = vld [vmem:[%s13852_s0 + $0x108] sm:$0xff]  ;;  %v10373_v45 = vld [vmem:[%s13852_s0 + $0x240] sm:$0xff] }
  0x2b   :  { %13892 = vst [vmem:[#allocation7_spill] sm:$0xff] %v10373_v45 }
  0x2d   :  { %8657 = vmatmul.mubr.msk.f32.gmra.mxu0 %vm174_vm1, %v9892_v47  ;;  %8725 = vmatmul.mubr.msk.f32.vlgmr.msra.gmra.mxu1 %vm174_vm1, %v44_v48  ;;  %v151_v48 = vld [vmem:[%s13852_s0 + $0x231] sm:$0xff]  ;;  %v1355_v47 = vld [vmem:[%s13852_s0 + $0xe2] sm:$0xff] }
  0x2e   :  { %8659 = vmatprep.mubr.msk.f32.mxu0 %vm174_vm1, %v130_v49  ;;  %8727 = vmatprep.mubr.msk.f32.mxu1 %vm174_vm1, %v9903_v50  ;;  %v10138_v49 = vld [vmem:[%s13852_s0 + $0x110] sm:$0xff] }
  0x2f   :  { %8919 = vmatpush3.msk.msra.mxu1 %vm367_vm0, %v7289_v37  ;;  %v10102_v37 = vld [vmem:[%s13852_s0 + $0xf0] sm:$0xff] }
  0x31   :  { %8660 = vmatmul.mubr.msk.f32.gmra.mxu0 %vm174_vm1, %v131_v51  ;;  %8728 = vmatmul.mubr.msk.f32.gmra.mxu1 %vm174_vm1, %v9917_v52  ;;  %v10143_v51 = vld [vmem:[%s13852_s0 + $0x120] sm:$0xff] }
  0x32   :  { %8662 = vmatprep.mubr.msk.f32.mxu0 %vm174_vm1, %v132_v53  ;;  %8730 = vmatprep.mubr.msk.f32.mxu1 %vm174_vm1, %v9925_v54  ;;  %v1336_v53 = vld [vmem:[%s13852_s0 + $0x2] sm:$0xff] }
  0x35   :  { %8663 = vmatmul.mubr.msk.f32.gmra.mxu0 %vm174_vm1, %v133_v55  ;;  %8731 = vmatmul.mubr.msk.f32.gmra.mxu1 %vm174_vm1, %v9940_v56  ;;  %v10157_v55 = vld [vmem:[%s13852_s0 + $0x128] sm:$0xff] }
  0x36   :  { %8665 = vmatprep.mubr.msk.f32.mxu0 %vm174_vm1, %v134_v57  ;;  %8733 = vmatprep.mubr.msk.f32.mxu1 %vm174_vm1, %v9948_v58  ;;  %v1337_v57 = vld [vmem:[%s13852_s0 + $0xa] sm:$0xff] }
  0x39   :  { %8666 = vmatmul.mubr.msk.f32.gmra.mxu0 %vm174_vm1, %v135_v59  ;;  %8734 = vmatmul.mubr.msk.f32.gmra.mxu1 %vm174_vm1, %v9962_v60  ;;  %v10165_v59 = vld [vmem:[%s13852_s0 + $0x138] sm:$0xff] }
  0x3a   :  { %8668 = vmatprep.mubr.msk.f32.mxu0 %vm174_vm1, %v136_v61  ;;  %8736 = vmatprep.mubr.msk.f32.mxu1 %vm174_vm1, %v9970_v62  ;;  %v10170_v61 = vld [vmem:[%s13851_s2 + $0x14] sm:$0xf] }
  0x3b   :  { %9114 = vmatprep.subr.msk.mxu1 %vm367_vm0, %v10170_v61 }
  0x3d   :  { %8669 = vmatmul.mubr.msk.f32.gmra.mxu0 %vm174_vm1, %v137_v63  ;;  %8737 = vmatmul.mubr.msk.f32.gmra.mxu1 %vm174_vm1, %v9984_v0  ;;  %v1338_v63 = vld [vmem:[%s13852_s0 + $0x1a] sm:$0xff] }
  0x3e   :  { %8671 = vmatprep.mubr.msk.f32.mxu0 %vm174_vm1, %v138_v1  ;;  %8739 = vmatprep.mubr.msk.f32.mxu1 %vm174_vm1, %v9992_v2  ;;  %v10183_v1 = vld [vmem:[%s13851_s2 + $0x18] sm:$0xf] }
  0x41   :  { %8672 = vmatmul.mubr.msk.f32.gmra.mxu0 %vm174_vm1, %v139_v3  ;;  %8740 = vmatmul.mubr.msk.f32.gmra.mxu1 %vm174_vm1, %v10006_v4  ;;  %v10192_v3 = vld [vmem:[%s13852_s0 + $0x140] sm:$0xff] }
  0x42   :  { %8674 = vmatprep.mubr.msk.f32.mxu0 %vm174_vm1, %v140_v5  ;;  %8742 = vmatprep.mubr.msk.f32.mxu1 %vm174_vm1, %v10014_v7  ;;  %v1339_v5 = vld [vmem:[%s13852_s0 + $0x22] sm:$0xff] }
  0x45   :  { %8675 = vmatmul.mubr.msk.f32.gmra.mxu0 %vm174_vm1, %v141_v9  ;;  %8743 = vmatmul.mubr.msk.f32.gmra.mxu1 %vm174_vm1, %v10028_v11  ;;  %v10201_v9 = vld [vmem:[%s13852_s0 + $0x150] sm:$0xff] }
  0x46   :  { %8677 = vmatprep.mubr.msk.f32.mxu0 %vm174_vm1, %v142_v13  ;;  %8745 = vmatprep.mubr.msk.f32.mxu1 %vm174_vm1, %v10036_v15  ;;  %v10217_v13 = vld [vmem:[%s13852_s0 + $0x158] sm:$0xff] }
  0x49   :  { %8678 = vmatmul.mubr.msk.f32.gmra.mxu0 %vm174_vm1, %v143_v17  ;;  %8746 = vmatmul.mubr.msk.f32.gmra.mxu1 %vm174_vm1, %v10050_v19  ;;  %v1341_v17 = vld [vmem:[%s13852_s0 + $0x3a] sm:$0xff] }
  0x4a   :  { %8680 = vmatprep.mubr.msk.f32.mxu0 %vm174_vm1, %v144_v20  ;;  %8748 = vmatprep.mubr.msk.f32.mxu1 %vm174_vm1, %v10058_v22  ;;  %v10225_v20 = vld [vmem:[%s13852_s0 + $0x168] sm:$0xff] }
  0x4d   :  { %8681 = vmatmul.mubr.msk.f32.gmra.mxu0 %vm174_vm1, %v145_v24  ;;  %8749 = vmatmul.mubr.msk.f32.gmra.mxu1 %vm174_vm1, %v10072_v26  ;;  %v1342_v24 = vld [vmem:[%s13852_s0 + $0x4a] sm:$0xff] }
  0x4e   :  { %8683 = vmatprep.mubr.msk.f32.mxu0 %vm174_vm1, %v146_v28  ;;  %8751 = vmatprep.mubr.msk.f32.mxu1 %vm174_vm1, %v10080_v30  ;;  %v10239_v28 = vld [vmem:[%s13852_s0 + $0x170] sm:$0xff] }
  0x51   :  { %8684 = vmatmul.mubr.msk.f32.gmra.mxu0 %vm174_vm1, %v147_v32  ;;  %8752 = vmatmul.mubr.msk.f32.gmra.mxu1 %vm174_vm1, %v10094_v34  ;;  %v1343_v32 = vld [vmem:[%s13852_s0 + $0x52] sm:$0xff] }
  0x52   :  { %8686 = vmatprep.mubr.msk.f32.mxu0 %vm174_vm1, %v148_v36  ;;  %8754 = vmatprep.mubr.msk.f32.mxu1 %vm174_vm1, %v10102_v37  ;;  %v75_v36 = vld [vmem:[%s13852_s0 + $0x1b0] sm:$0xff] }
  0x55   :  { %8687 = vmatmul.mubr.msk.f32.gmra.mxu0 %vm174_vm1, %v149_v40  ;;  %8755 = vmatmul.mubr.msk.f32.gmra.mxu1 %vm174_vm1, %v10116_v42  ;;  %v1344_v40 = vld [vmem:[%s13852_s0 + $0x62] sm:$0xff] }
  0x56   :  { %8689 = vmatprep.mubr.msk.f32.mxu0 %vm174_vm1, %v150_v44  ;;  %8757 = vmatprep.mubr.msk.f32.mxu1 %vm174_vm1, %v10124_v46  ;;  %v76_v44 = vld [vmem:[%s13852_s0 + $0x1b8] sm:$0xff] }
  0x59   :  { %8690 = vmatmul.mubr.msk.f32.gmra.mxu0 %vm174_vm1, %v151_v48  ;;  %8758 = vmatmul.mubr.msk.f32.gmra.mxu1 %vm174_vm1, %v10138_v49  ;;  %v1345_v48 = vld [vmem:[%s13852_s0 + $0x6a] sm:$0xff] }
  0x5a   :  { %8760 = vmatprep.mubr.msk.f32.mxu1 %vm174_vm1, %v10143_v51  ;;  %8822 = vmatprep.mubr.msk.f32.mxu0 %vm174_vm1, %v1336_v53  ;;  %v10264_v53 = vld [vmem:[%s13852_s0 + $0x1c8] sm:$0xff] }
  0x5d   :  { %8761 = vmatmul.mubr.msk.f32.gmra.mxu1 %vm174_vm1, %v10157_v55  ;;  %8823 = vmatmul.mubr.msk.f32.vlgmr.msra.gmra.mxu0 %vm174_vm1, %v1337_v57  ;;  %v1346_v57 = vld [vmem:[%s13852_s0 + $0x7a] sm:$0xff] }
  0x5e   :  { %9017 = vmatpush3.msk.msra.mxu0 %vm367_vm0, %v9838_v38  ;;  %8763 = vmatprep.mubr.msk.f32.mxu1 %vm174_vm1, %v10165_v59  ;;  %v1340_v38 = vld [vmem:[%s13852_s0 + $0x32] sm:$0xff] }
  0x5f   :  { %8825 = vmatprep.mubr.msk.f32.mxu0 %vm174_vm1, %v1338_v63  ;;  %9212 = vmatprep.subr.msk.mxu0 %vm367_vm0, %v10183_v1  ;;  %v10277_v63 = vld [vmem:[%s13852_s0 + $0x1d0] sm:$0xff] }
  0x61   :  { %8764 = vmatmul.mubr.msk.f32.gmra.mxu1 %vm174_vm1, %v10192_v3  ;;  %8826 = vmatmul.mubr.msk.f32.gmra.mxu0 %vm174_vm1, %v1339_v5  ;;  %v1347_v5 = vld [vmem:[%s13852_s0 + $0x82] sm:$0xff] }
  0x62   :  { %8766 = vmatprep.mubr.msk.f32.mxu1 %vm174_vm1, %v10201_v9  ;;  %8828 = vmatprep.mubr.msk.f32.mxu0 %vm174_vm1, %v1340_v38  ;;  %v10285_v38 = vld [vmem:[%s13852_s0 + $0x1e0] sm:$0xff] }
  0x65   :  { %8767 = vmatmul.mubr.msk.f32.gmra.mxu1 %vm174_vm1, %v10217_v13  ;;  %8829 = vmatmul.mubr.msk.f32.gmra.mxu0 %vm174_vm1, %v1341_v17  ;;  %v1348_v17 = vld [vmem:[%s13852_s0 + $0x92] sm:$0xff] }
  0x66   :  { %8769 = vmatprep.mubr.msk.f32.mxu1 %vm174_vm1, %v10225_v20  ;;  %8831 = vmatprep.mubr.msk.f32.mxu0 %vm174_vm1, %v1342_v24  ;;  %v10299_v24 = vld [vmem:[%s13852_s0 + $0x1e8] sm:$0xff] }
  0x69   :  { %8770 = vmatmul.mubr.msk.f32.gmra.mxu1 %vm174_vm1, %v10239_v28  ;;  %8832 = vmatmul.mubr.msk.f32.gmra.mxu0 %vm174_vm1, %v1343_v32  ;;  %v1349_v32 = vld [vmem:[%s13852_s0 + $0x9a] sm:$0xff] }
  0x6a   :  { %8772 = vmatprep.mubr.msk.f32.mxu1 %vm174_vm1, %v75_v36  ;;  %8834 = vmatprep.mubr.msk.f32.mxu0 %vm174_vm1, %v1344_v40  ;;  %v10307_v36 = vld [vmem:[%s13852_s0 + $0x1f8] sm:$0xff]  ;;  %v1350_v40 = vld [vmem:[%s13852_s0 + $0xaa] sm:$0xff] }
  0x6d   :  { %8773 = vmatmul.mubr.msk.f32.gmra.mxu1 %vm174_vm1, %v76_v44  ;;  %8835 = vmatmul.mubr.msk.f32.gmra.mxu0 %vm174_vm1, %v1345_v48  ;;  %v10321_v44 = vld [vmem:[%s13852_s0 + $0x200] sm:$0xff]  ;;  %v1351_v48 = vld [vmem:[%s13852_s0 + $0xb2] sm:$0xff] }
  0x6e   :  { %8775 = vmatprep.mubr.msk.f32.mxu1 %vm174_vm1, %v10264_v53  ;;  %8837 = vmatprep.mubr.msk.f32.mxu0 %vm174_vm1, %v1346_v57  ;;  %v10329_v57 = vld [vmem:[%s13852_s0 + $0x210] sm:$0xff] }
  0x71   :  { %8776 = vmatmul.mubr.msk.f32.gmra.mxu1 %vm174_vm1, %v10277_v63  ;;  %8838 = vmatmul.mubr.msk.f32.gmra.mxu0 %vm174_vm1, %v1347_v5  ;;  %v1352_v5 = vld [vmem:[%s13852_s0 + $0xc2] sm:$0xff] }
  0x72   :  { %8778 = vmatprep.mubr.msk.f32.mxu1 %vm174_vm1, %v10285_v38  ;;  %8840 = vmatprep.mubr.msk.f32.mxu0 %vm174_vm1, %v1348_v17  ;;  %v10343_v17 = vld [vmem:[%s13852_s0 + $0x218] sm:$0xff] }
  0x75   :  { %8779 = vmatmul.mubr.msk.f32.gmra.mxu1 %vm174_vm1, %v10299_v24  ;;  %8841 = vmatmul.mubr.msk.f32.gmra.mxu0 %vm174_vm1, %v1349_v32  ;;  %v1353_v32 = vld [vmem:[%s13852_s0 + $0xca] sm:$0xff] }
  0x76   :  { %8781 = vmatprep.mubr.msk.f32.mxu1 %vm174_vm1, %v10307_v36  ;;  %8843 = vmatprep.mubr.msk.f32.mxu0 %vm174_vm1, %v1350_v40  ;;  %v10351_v40 = vld [vmem:[%s13852_s0 + $0x228] sm:$0xff] }
  0x79   :  { %8782 = vmatmul.mubr.msk.f32.gmra.mxu1 %vm174_vm1, %v10321_v44  ;;  %8844 = vmatmul.mubr.msk.f32.gmra.mxu0 %vm174_vm1, %v1351_v48  ;;  %v1354_v48 = vld [vmem:[%s13852_s0 + $0xda] sm:$0xff] }
  0x7a   :  { %8784 = vmatprep.mubr.msk.f32.mxu1 %vm174_vm1, %v10329_v57  ;;  %8846 = vmatprep.mubr.msk.f32.mxu0 %vm174_vm1, %v1352_v5  ;;  %v10365_v5 = vld [vmem:[%s13852_s0 + $0x230] sm:$0xff] }
  0x7b   :  { %13891 = vst [vmem:[#allocation6_spill] sm:$0xff] %v10365_v5 }
  0x7d   :  { %8785 = vmatmul.mubr.msk.f32.gmra.mxu1 %vm174_vm1, %v10343_v17  ;;  %8847 = vmatmul.mubr.msk.f32.gmra.mxu0 %vm174_vm1, %v1353_v32  ;;  %v1356_v32 = vld [vmem:[%s13852_s0 + $0xf2] sm:$0xff] }
  0x7e   :  { %8787 = vmatprep.mubr.msk.f32.mxu1 %vm174_vm1, %v10351_v40  ;;  %8849 = vmatprep.mubr.msk.f32.mxu0 %vm174_vm1, %v1354_v48  ;;  %v10387_v48 = vld [vmem:[%s13852_s0 + $0x248] sm:$0xff] }
  0x7f   :  { %13893 = vst [vmem:[#allocation8_spill] sm:$0xff] %v10387_v48 }
  0x81   :  { %8788 = vmatmul.mubr.msk.f32.gmra.mxu1 %vm174_vm1, %v10365_v5  ;;  %8850 = vmatmul.mubr.msk.f32.gmra.mxu0 %vm174_vm1, %v1355_v47  ;;  %v10395_v5 = vld [vmem:[%s13852_s0 + $0x258] sm:$0xff]  ;;  %v1358_v47 = vld [vmem:[%s13852_s0 + $0x10a] sm:$0xff] }
  0x82   :  { %8790 = vmatprep.mubr.msk.f32.mxu1 %vm174_vm1, %v10373_v45  ;;  %8852 = vmatprep.mubr.msk.f32.mxu0 %vm174_vm1, %v1356_v32  ;;  %13894 = vst [vmem:[#allocation9_spill] sm:$0xff] %v10395_v5  ;;  %v10409_v32 = vld [vmem:[%s13852_s0 + $0x260] sm:$0xff]  ;;  %v1359_v45 = vld [vmem:[%s13852_s0 + $0x112] sm:$0xff] }
  0x83   :  { %13895 = vst [vmem:[#allocation10_spill] sm:$0xff] %v10409_v32 }
  0x85   :  { %8791 = vmatmul.mubr.msk.f32.gmra.mxu1 %vm174_vm1, %v10387_v48  ;;  %8853 = vmatmul.mubr.msk.f32.gmra.mxu0 %vm174_vm1, %v1357_v43  ;;  %v10417_v48 = vld [vmem:[%s13852_s0 + $0x270] sm:$0xff]  ;;  %v1360_v43 = vld [vmem:[%s13852_s0 + $0x122] sm:$0xff] }
  0x86   :  { %8793 = vmatprep.mubr.msk.f32.mxu1 %vm174_vm1, %v10395_v5  ;;  %8855 = vmatprep.mubr.msk.f32.mxu0 %vm174_vm1, %v1358_v47  ;;  %13896 = vst [vmem:[#allocation11_spill] sm:$0xff] %v10417_v48  ;;  %v10431_v47 = vld [vmem:[%s13852_s0 + $0x278] sm:$0xff]  ;;  %v1361_v5 = vld [vmem:[%s13852_s0 + $0x12a] sm:$0xff] }
  0x87   :  { %13897 = vst [vmem:[#allocation12_spill] sm:$0xff] %v10431_v47 }
  0x89   :  { %8794 = vmatmul.mubr.msk.f32.gmra.mxu1 %vm174_vm1, %v10409_v32  ;;  %8856 = vmatmul.mubr.msk.f32.gmra.mxu0 %vm174_vm1, %v1359_v45  ;;  %v10439_v32 = vld [vmem:[%s13852_s0 + $0x288] sm:$0xff]  ;;  %v1362_v45 = vld [vmem:[%s13852_s0 + $0x13a] sm:$0xff] }
  0x8a   :  { %8796 = vmatprep.mubr.msk.f32.mxu1 %vm174_vm1, %v10417_v48  ;;  %8858 = vmatprep.mubr.msk.f32.mxu0 %vm174_vm1, %v1360_v43  ;;  %13898 = vst [vmem:[#allocation13_spill] sm:$0xff] %v10439_v32  ;;  %v10453_v43 = vld [vmem:[%s13852_s0 + $0x290] sm:$0xff]  ;;  %v1363_v48 = vld [vmem:[%s13852_s0 + $0x142] sm:$0xff] }
  0x8b   :  { %13899 = vst [vmem:[#allocation14_spill] sm:$0xff] %v10453_v43 }
  0x8d   :  { %8797 = vmatmul.mubr.msk.f32.gmra.mxu1 %vm174_vm1, %v10431_v47  ;;  %8859 = vmatmul.mubr.msk.f32.gmra.mxu0 %vm174_vm1, %v1361_v5  ;;  %v10461_v47 = vld [vmem:[%s13852_s0 + $0x2a0] sm:$0xff]  ;;  %v1364_v5 = vld [vmem:[%s13852_s0 + $0x152] sm:$0xff] }
  0x8e   :  { %8799 = vmatprep.mubr.msk.f32.mxu1 %vm174_vm1, %v10439_v32  ;;  %8861 = vmatprep.mubr.msk.f32.mxu0 %vm174_vm1, %v1362_v45  ;;  %13900 = vst [vmem:[#allocation15_spill] sm:$0xff] %v10461_v47  ;;  %v10475_v45 = vld [vmem:[%s13852_s0 + $0x2a8] sm:$0xff]  ;;  %v1365_v32 = vld [vmem:[%s13852_s0 + $0x15a] sm:$0xff] }
  0x8f   :  { %13901 = vst [vmem:[#allocation16_spill] sm:$0xff] %v10475_v45 }
  0x91   :  { %8800 = vmatmul.mubr.msk.f32.gmra.mxu1 %vm174_vm1, %v10453_v43  ;;  %8862 = vmatmul.mubr.msk.f32.gmra.mxu0 %vm174_vm1, %v1363_v48  ;;  %v10483_v43 = vld [vmem:[%s13852_s0 + $0x2b8] sm:$0xff]  ;;  %v1366_v48 = vld [vmem:[%s13852_s0 + $0x16a] sm:$0xff] }
  0x92   :  { %8802 = vmatprep.mubr.msk.f32.mxu1 %vm174_vm1, %v10461_v47  ;;  %8864 = vmatprep.mubr.msk.f32.mxu0 %vm174_vm1, %v1364_v5  ;;  %13902 = vst [vmem:[#allocation17_spill] sm:$0xff] %v10483_v43  ;;  %v10497_v5 = vld [vmem:[%s13852_s0 + $0x2c0] sm:$0xff]  ;;  %v1367_v47 = vld [vmem:[%s13852_s0 + $0x172] sm:$0xff] }
  0x93   :  { %13903 = vst [vmem:[#allocation18_spill] sm:$0xff] %v10497_v5 }
  0x95   :  { %8803 = vmatmul.mubr.msk.f32.gmra.mxu1 %vm174_vm1, %v10475_v45  ;;  %8865 = vmatmul.mubr.msk.f32.gmra.mxu0 %vm174_vm1, %v1365_v32  ;;  %v10505_v45 = vld [vmem:[%s13852_s0 + $0x2d0] sm:$0xff] }
  0x96   :  { %8805 = vmatprep.mubr.msk.f32.mxu1 %vm174_vm1, %v10483_v43  ;;  %8867 = vmatprep.mubr.msk.f32.mxu0 %vm174_vm1, %v1366_v48  ;;  %13904 = vst [vmem:[#allocation19_spill] sm:$0xff] %v10505_v45  ;;  %v1368_v32 = vld [vmem:[%s13852_s0 + $0x1b2] sm:$0xff]  ;;  %v1369_v43 = vld [vmem:[%s13852_s0 + $0x1ba] sm:$0xff] }
  0x97   :  { %v10519_v48 = vld [vmem:[%s13852_s0 + $0x2d8] sm:$0xff] }
  0x98   :  { %13905 = vst [vmem:[#allocation20_spill] sm:$0xff] %v10519_v48 }
  0x99   :  { %8806 = vmatmul.mubr.msk.f32.gmra.mxu1 %vm174_vm1, %v10497_v5  ;;  %8868 = vmatmul.mubr.msk.f32.gmra.mxu0 %vm174_vm1, %v1367_v47  ;;  %v10527_v5 = vld [vmem:[%s13852_s0 + $0x2e8] sm:$0xff] }
  0x9a   :  { %8808 = vmatprep.mubr.msk.f32.mxu1 %vm174_vm1, %v10505_v45  ;;  %8870 = vmatprep.mubr.msk.f32.mxu0 %vm174_vm1, %v1368_v32  ;;  %13906 = vst [vmem:[#allocation21_spill] sm:$0xff] %v10527_v5  ;;  %v1370_v47 = vld [vmem:[%s13852_s0 + $0x1ca] sm:$0xff]  ;;  %v1371_v45 = vld [vmem:[%s13852_s0 + $0x1d2] sm:$0xff] }
  0x9b   :  { %v10541_v32 = vld [vmem:[%s13852_s0 + $0x2f0] sm:$0xff] }
  0x9c   :  { %13907 = vst [vmem:[#allocation22_spill] sm:$0xff] %v10541_v32 }
  0x9d   :  { %8809 = vmatmul.mubr.msk.f32.gmra.mxu1 %vm174_vm1, %v10519_v48  ;;  %8871 = vmatmul.mubr.msk.f32.gmra.mxu0 %vm174_vm1, %v1369_v43  ;;  %v10549_v48 = vld [vmem:[%s13852_s0 + $0x300] sm:$0xff] }
  0x9e   :  { %8811 = vmatprep.mubr.msk.f32.mxu1 %vm174_vm1, %v10527_v5  ;;  %8873 = vmatprep.mubr.msk.f32.mxu0 %vm174_vm1, %v1370_v47  ;;  %13908 = vst [vmem:[#allocation23_spill] sm:$0xff] %v10549_v48  ;;  %v1372_v43 = vld [vmem:[%s13852_s0 + $0x1e2] sm:$0xff]  ;;  %v1373_v5 = vld [vmem:[%s13852_s0 + $0x1ea] sm:$0xff] }
  0x9f   :  { %v10563_v47 = vld [vmem:[%s13852_s0 + $0x308] sm:$0xff] }
  0xa0   :  { %13909 = vst [vmem:[#allocation24_spill] sm:$0xff] %v10563_v47 }
  0xa1   :  { %8812 = vmatmul.mubr.msk.f32.gmra.mxu1 %vm174_vm1, %v10541_v32  ;;  %8874 = vmatmul.mubr.msk.f32.gmra.mxu0 %vm174_vm1, %v1371_v45  ;;  %v10571_v32 = vld [vmem:[%s13852_s0 + $0x318] sm:$0xff] }
  0xa2   :  { %8814 = vmatprep.mubr.msk.f32.mxu1 %vm174_vm1, %v10549_v48  ;;  %8876 = vmatprep.mubr.msk.f32.mxu0 %vm174_vm1, %v1372_v43  ;;  %v1374_v45 = vld [vmem:[%s13852_s0 + $0x1fa] sm:$0xff]  ;;  %v1375_v48 = vld [vmem:[%s13852_s0 + $0x202] sm:$0xff] }
  0xa3   :  { %v10585_v43 = vld [vmem:[%s13852_s0 + $0x320] sm:$0xff] }
  0xa5   :  { %8815 = vmatmul.mubr.msk.f32.gmra.mxu1 %vm174_vm1, %v10563_v47  ;;  %8877 = vmatmul.mubr.msk.f32.gmra.mxu0 %vm174_vm1, %v1373_v5  ;;  %v1376_v47 = vld [vmem:[%s13852_s0 + $0x212] sm:$0xff]  ;;  %v1377_v5 = vld [vmem:[%s13852_s0 + $0x21a] sm:$0xff] }
  0xa6   :  { %8817 = vmatprep.mubr.msk.f32.mxu1 %vm174_vm1, %v10571_v32  ;;  %8879 = vmatprep.mubr.msk.f32.mxu0 %vm174_vm1, %v1374_v45  ;;  %v1378_v45 = vld [vmem:[%s13852_s0 + $0x22a] sm:$0xff] }
  0xa9   :  { %8818 = vmatmul.mubr.msk.f32.gmra.mxu1 %vm174_vm1, %v10585_v43  ;;  %8880 = vmatmul.mubr.msk.f32.gmra.mxu0 %vm174_vm1, %v1375_v48  ;;  %v1380_v48 = vld [vmem:[%s13852_s0 + $0x242] sm:$0xff] }
  0xaa   :  { %8882 = vmatprep.mubr.msk.f32.mxu0 %vm174_vm1, %v1376_v47  ;;  %8920 = vmatprep.mubr.msk.f32.mxu1 %vm174_vm1, %v9903_v50  ;;  %v1379_v50 = vld [vmem:[%s13852_s0 + $0x232] sm:$0xff] }
  0xad   :  { %8883 = vmatmul.mubr.msk.f32.gmra.mxu0 %vm174_vm1, %v1377_v5  ;;  %8921 = vmatmul.mubr.msk.f32.vlgmr.msra.gmra.mxu1 %vm174_vm1, %v9917_v52  ;;  %v1381_v52 = vld [vmem:[%s13852_s0 + $0x24a] sm:$0xff] }
  0xae   :  { %8885 = vmatprep.mubr.msk.f32.mxu0 %vm174_vm1, %v1378_v45  ;;  %8923 = vmatprep.mubr.msk.f32.mxu1 %vm174_vm1, %v9925_v54  ;;  %v1382_v54 = vld [vmem:[%s13852_s0 + $0x25a] sm:$0xff]  ;;  %v1392_v45 = vld [vmem:[%s13852_s0 + $0x2d2] sm:$0xff] }
  0xaf   :  { %9115 = vmatpush3.msk.msra.mxu1 %vm367_vm0, %v10170_v61 }
  0xb1   :  { %8886 = vmatmul.mubr.msk.f32.gmra.mxu0 %vm174_vm1, %v1379_v50  ;;  %8924 = vmatmul.mubr.msk.f32.gmra.mxu1 %vm174_vm1, %v9940_v56  ;;  %v1383_v56 = vld [vmem:[%s13852_s0 + $0x262] sm:$0xff] }
  0xb2   :  { %8888 = vmatprep.mubr.msk.f32.mxu0 %vm174_vm1, %v1380_v48  ;;  %8926 = vmatprep.mubr.msk.f32.mxu1 %vm174_vm1, %v9948_v58  ;;  %v1384_v58 = vld [vmem:[%s13852_s0 + $0x272] sm:$0xff] }
  0xb5   :  { %8889 = vmatmul.mubr.msk.f32.gmra.mxu0 %vm174_vm1, %v1381_v52  ;;  %8927 = vmatmul.mubr.msk.f32.gmra.mxu1 %vm174_vm1, %v9962_v60  ;;  %v1385_v60 = vld [vmem:[%s13852_s0 + $0x27a] sm:$0xff] }
  0xb6   :  { %8891 = vmatprep.mubr.msk.f32.mxu0 %vm174_vm1, %v1382_v54  ;;  %8929 = vmatprep.mubr.msk.f32.mxu1 %vm174_vm1, %v9970_v62  ;;  %v1386_v62 = vld [vmem:[%s13852_s0 + $0x28a] sm:$0xff] }
  0xb7   :  { %v1394_v54 = vld [vmem:[%s13852_s0 + $0x2ea] sm:$0xff] }
  0xb9   :  { %8892 = vmatmul.mubr.msk.f32.gmra.mxu0 %vm174_vm1, %v1383_v56  ;;  %8930 = vmatmul.mubr.msk.f32.gmra.mxu1 %vm174_vm1, %v9984_v0  ;;  %v1387_v0 = vld [vmem:[%s13852_s0 + $0x292] sm:$0xff] }
  0xba   :  { %8894 = vmatprep.mubr.msk.f32.mxu0 %vm174_vm1, %v1384_v58  ;;  %8932 = vmatprep.mubr.msk.f32.mxu1 %vm174_vm1, %v9992_v2  ;;  %v1388_v2 = vld [vmem:[%s13852_s0 + $0x2a2] sm:$0xff] }
  0xbd   :  { %8895 = vmatmul.mubr.msk.f32.gmra.mxu0 %vm174_vm1, %v1385_v60  ;;  %8933 = vmatmul.mubr.msk.f32.gmra.mxu1 %vm174_vm1, %v10006_v4  ;;  %v1389_v4 = vld [vmem:[%s13852_s0 + $0x2aa] sm:$0xff] }
  0xbe   :  { %8897 = vmatprep.mubr.msk.f32.mxu0 %vm174_vm1, %v1386_v62  ;;  %8935 = vmatprep.mubr.msk.f32.mxu1 %vm174_vm1, %v10014_v7  ;;  %v1390_v7 = vld [vmem:[%s13852_s0 + $0x2ba] sm:$0xff]  ;;  %v1396_v62 = vld [vmem:[%s13852_s0 + $0x302] sm:$0xff] }
  0xc1   :  { %8898 = vmatmul.mubr.msk.f32.gmra.mxu0 %vm174_vm1, %v1387_v0  ;;  %8936 = vmatmul.mubr.msk.f32.gmra.mxu1 %vm174_vm1, %v10028_v11  ;;  %v1391_v11 = vld [vmem:[%s13852_s0 + $0x2c2] sm:$0xff] }
  0xc2   :  { %8900 = vmatprep.mubr.msk.f32.mxu0 %vm174_vm1, %v1388_v2  ;;  %8938 = vmatprep.mubr.msk.f32.mxu1 %vm174_vm1, %v10036_v15 }
  0xc5   :  { %v10679_v61 = vpop.f32.mrf.mxu0  ;;  %v10681_v47 = vpop.f32.mrf.mxu1  ;;  %8901 = vmatmul.mubr.msk.f32.gmra.mxu0 %vm174_vm1, %v1389_v4  ;;  %8939 = vmatmul.mubr.msk.f32.gmra.mxu1 %vm174_vm1, %v10050_v19 }
  0xc6   :  { %8903 = vmatprep.mubr.msk.f32.mxu0 %vm174_vm1, %v1390_v7  ;;  %8941 = vmatprep.mubr.msk.f32.mxu1 %vm174_vm1, %v10058_v22  ;;  %v1393_v22 = vld [vmem:[%s13852_s0 + $0x2da] sm:$0xff] }
  0xc7   :  { %v10692_v15 = vpop.f32.mrf.mxu0  ;;  %v10694_v5 = vpop.f32.mrf.mxu1  ;;  %v1398_v7 = vld [vmem:[%s13852_s0 + $0x31a] sm:$0xff] }
  0xc9   :  { %v10699_v50 = vpop.f32.mrf.mxu0  ;;  %v10701_v19 = vpop.f32.mrf.mxu1  ;;  %8904 = vmatmul.mubr.msk.f32.gmra.mxu0 %vm174_vm1, %v1391_v11  ;;  %8942 = vmatmul.mubr.msk.f32.gmra.mxu1 %vm174_vm1, %v10072_v26 }
  0xca   :  { %8906 = vmatprep.mubr.msk.f32.mxu0 %vm174_vm1, %v1392_v45  ;;  %8944 = vmatprep.mubr.msk.f32.mxu1 %vm174_vm1, %v10080_v30  ;;  %v1395_v30 = vld [vmem:[%s13852_s0 + $0x2f2] sm:$0xff] }
  0xcb   :  { %v10712_v48 = vpop.f32.mrf.mxu0  ;;  %v10714_v52 = vpop.f32.mrf.mxu1 }
  0xcd   :  { %v10719_v56 = vpop.f32.mrf.mxu0  ;;  %v10721_v26 = vpop.f32.mrf.mxu1  ;;  %8907 = vmatmul.mubr.msk.f32.gmra.mxu0 %vm174_vm1, %v1393_v22  ;;  %8945 = vmatmul.mubr.msk.f32.gmra.mxu1 %vm174_vm1, %v10094_v34 }
  0xce   :  { %8909 = vmatprep.mubr.msk.f32.mxu0 %vm174_vm1, %v1394_v54  ;;  %8947 = vmatprep.mubr.msk.f32.mxu1 %vm174_vm1, %v10102_v37  ;;  %v1397_v37 = vld [vmem:[%s13852_s0 + $0x30a] sm:$0xff] }
  0xcf   :  { %v10732_v58 = vpop.f32.mrf.mxu0  ;;  %v10734_v60 = vpop.f32.mrf.mxu1 }
  0xd0   :  { %13910 = vst [vmem:[#allocation25_spill] sm:$0xff] %v10734_v60 }
  0xd1   :  { %v10739_v0 = vpop.f32.mrf.mxu0  ;;  %v10741_v34 = vpop.f32.mrf.mxu1  ;;  %8910 = vmatmul.mubr.msk.f32.gmra.mxu0 %vm174_vm1, %v1395_v30  ;;  %8948 = vmatmul.mubr.msk.f32.gmra.mxu1 %vm174_vm1, %v10116_v42 }
  0xd2   :  { %13911 = vst [vmem:[#allocation26_spill] sm:$0xff] %v10741_v34  ;;  %8912 = vmatprep.mubr.msk.f32.mxu0 %vm174_vm1, %v1396_v62  ;;  %8950 = vmatprep.mubr.msk.f32.mxu1 %vm174_vm1, %v10124_v46  ;;  %v1399_v46 = vld [vmem:[%s13852_s0 + $0x322] sm:$0xff]  ;;  %v10794_v62 = vld [vmem:[%s13851_s2 + $0x1c] sm:$0xf] }
  0xd3   :  { %v10752_v2 = vpop.f32.mrf.mxu0  ;;  %v10754_v4 = vpop.f32.mrf.mxu1  ;;  %9310 = vmatprep.subr.msk.mxu1 %vm367_vm0, %v10794_v62  ;;  %v13945_v34 = vld [vmem:[#allocation23_spill] sm:$0xff] }
  0xd4   :  { %13912 = vst [vmem:[#allocation27_spill] sm:$0xff] %v10754_v4  ;;  %v13944_v4 = vld [vmem:[#allocation22_spill] sm:$0xff] }
  0xd5   :  { %v10759_v11 = vpop.f32.mrf.mxu0  ;;  %v10761_v42 = vpop.f32.mrf.mxu1  ;;  %8913 = vmatmul.mubr.msk.f32.gmra.mxu0 %vm174_vm1, %v1397_v37  ;;  %8951 = vmatmul.mubr.msk.f32.gmra.mxu1 %vm174_vm1, %v10138_v49 }
  0xd6   :  { %13913 = vst [vmem:[#allocation28_spill] sm:$0xff] %v10761_v42  ;;  %8915 = vmatprep.mubr.msk.f32.mxu0 %vm174_vm1, %v1398_v7  ;;  %8953 = vmatprep.mubr.msk.f32.mxu1 %vm174_vm1, %v10143_v51 }
  0xd7   :  { %v10772_v45 = vpop.f32.mrf.mxu0  ;;  %v10774_v22 = vpop.f32.mrf.mxu1 }
  0xd8   :  { %13914 = vst [vmem:[#allocation29_spill] sm:$0xff] %v10774_v22  ;;  %v13943_v22 = vld [vmem:[#allocation21_spill] sm:$0xff] }
  0xd9   :  { %v10776_v54 = vpop.f32.mrf.mxu0  ;;  %v10778_v30 = vpop.f32.mrf.mxu1  ;;  %8916 = vmatmul.mubr.msk.f32.gmra.mxu0 %vm174_vm1, %v1399_v46  ;;  %8954 = vmatmul.mubr.msk.f32.gmra.mxu1 %vm174_vm1, %v10157_v55 }
  0xda   :  { %13915 = vst [vmem:[#allocation30_spill] sm:$0xff] %v10778_v30  ;;  %8956 = vmatprep.mubr.msk.f32.mxu1 %vm174_vm1, %v10165_v59  ;;  %9018 = vmatprep.mubr.msk.f32.mxu0 %vm174_vm1, %v9661_v6  ;;  %v10811_v6 = vld [vmem:[%s13851_s2 + $0x20] sm:$0xf] }
  0xdb   :  { %v10787_v49 = vpop.f32.mrf.mxu0  ;;  %v10789_v51 = vpop.f32.mrf.mxu1 }
  0xdc   :  { %13916 = vst [vmem:[#allocation31_spill] sm:$0xff] %v10789_v51  ;;  %v13941_v51 = vld [vmem:[#allocation19_spill] sm:$0xff] }
  0xdd   :  { %v10796_v37 = vpop.f32.mrf.mxu0  ;;  %v10798_v7 = vpop.f32.mrf.mxu1  ;;  %8957 = vmatmul.mubr.msk.f32.gmra.mxu1 %vm174_vm1, %v10192_v3  ;;  %9019 = vmatmul.mubr.msk.f32.vlgmr.msra.gmra.mxu0 %vm174_vm1, %v9676_v8 }
  0xde   :  { %13917 = vst [vmem:[#allocation32_spill] sm:$0xff] %v10798_v7  ;;  %9213 = vmatpush3.msk.msra.mxu0 %vm367_vm0, %v10183_v1  ;;  %8959 = vmatprep.mubr.msk.f32.mxu1 %vm174_vm1, %v10201_v9  ;;  %v7255_v9 = vld [vmem:[%s13852_s0 + $0x180] sm:$0xff] }
  0xdf   :  { %v10813_v55 = vpop.f32.mrf.mxu0  ;;  %v10815_v59 = vpop.f32.mrf.mxu1  ;;  %9021 = vmatprep.mubr.msk.f32.mxu0 %vm174_vm1, %v9686_v10  ;;  %9408 = vmatprep.subr.msk.mxu0 %vm367_vm0, %v10811_v6 }
  0xe0   :  { %13918 = vst [vmem:[#allocation33_spill] sm:$0xff] %v10815_v59  ;;  %v13939_v59 = vld [vmem:[#allocation17_spill] sm:$0xff] }
  0xe1   :  { %v10823_v8 = vpop.f32.mrf.mxu0  ;;  %v10825_v1 = vpop.f32.mrf.mxu1  ;;  %8960 = vmatmul.mubr.msk.f32.gmra.mxu1 %vm174_vm1, %v10217_v13  ;;  %9022 = vmatmul.mubr.msk.f32.gmra.mxu0 %vm174_vm1, %v9700_v12  ;;  %v7256_v12 = vld [vmem:[%s13852_s0 + $0x188] sm:$0xff] }
  0xe2   :  { %13919 = vst [vmem:[#allocation34_spill] sm:$0xff] %v10825_v1  ;;  %8962 = vmatprep.mubr.msk.f32.mxu1 %vm174_vm1, %v10225_v20  ;;  %9024 = vmatprep.mubr.msk.f32.mxu0 %vm174_vm1, %v9708_v14 }
  0xe3   :  { %v10835_v10 = vpop.f32.mrf.mxu0  ;;  %v10837_v3 = vpop.f32.mrf.mxu1 }
  0xe4   :  { %13920 = vst [vmem:[#allocation35_spill] sm:$0xff] %v10837_v3 }
  0xe5   :  { %v10842_v46 = vpop.f32.mrf.mxu0  ;;  %v10844_v13 = vpop.f32.mrf.mxu1  ;;  %8963 = vmatmul.mubr.msk.f32.gmra.mxu1 %vm174_vm1, %v10239_v28  ;;  %9025 = vmatmul.mubr.msk.f32.gmra.mxu0 %vm174_vm1, %v9722_v16 }
  0xe6   :  { %13921 = vst [vmem:[#allocation36_spill] sm:$0xff] %v10844_v13  ;;  %8965 = vmatprep.mubr.msk.f32.mxu1 %vm174_vm1, %v7255_v9  ;;  %9027 = vmatprep.mubr.msk.f32.mxu0 %vm174_vm1, %v9730_v18 }
  0xe7   :  { %v10856_v14 = vpop.f32.mrf.mxu0  ;;  %v10858_v20 = vpop.f32.mrf.mxu1 }
  0xe8   :  { %13922 = vst [vmem:[#allocation37_spill] sm:$0xff] %v10858_v20  ;;  %v13937_v20 = vld [vmem:[#allocation15_spill] sm:$0xff] }
  0xe9   :  { %v10860_v13 = vpop.f32.mrf.mxu0  ;;  %v10862_v3 = vpop.f32.mrf.mxu1  ;;  %8966 = vmatmul.mubr.msk.f32.gmra.mxu1 %vm174_vm1, %v7256_v12  ;;  %9028 = vmatmul.mubr.msk.f32.gmra.mxu0 %vm174_vm1, %v9748_v21 }
  0xea   :  { %13923 = vst [vmem:[#allocation38_spill] sm:$0xff] %v10862_v3  ;;  %8968 = vmatprep.mubr.msk.f32.mxu1 %vm174_vm1, %v10264_v53  ;;  %9030 = vmatprep.mubr.msk.f32.mxu0 %vm174_vm1, %v9756_v23 }
  0xeb   :  { %v10871_v16 = vpop.f32.mrf.mxu0  ;;  %v10873_v18 = vpop.f32.mrf.mxu1 }
  0xec   :  { %13924 = vst [vmem:[#allocation39_spill] sm:$0xff] %v10873_v18 }
  0xed   :  { %v10875_v28 = vpop.f32.mrf.mxu0  ;;  %v8726_v9 = vpop.f32.mrf.mxu1  ;;  %8969 = vmatmul.mubr.msk.f32.gmra.mxu1 %vm174_vm1, %v10277_v63  ;;  %9031 = vmatmul.mubr.msk.f32.gmra.mxu0 %vm174_vm1, %v9771_v25 }
  0xee   :  { %v10882_v21 = vadd.f32 %v8726_v9, %v10679_v61  ;;  %8971 = vmatprep.mubr.msk.f32.mxu1 %vm174_vm1, %v10285_v38  ;;  %9033 = vmatprep.mubr.msk.f32.mxu0 %vm174_vm1, %v9779_v27  ;;  %v13925_v9 = vld [vmem:[#allocation6_spill] sm:$0xff] }
  0xef   :  { %v10888_v23 = vpop.f32.mrf.mxu0  ;;  %v1017_v53 = vpop.f32.mrf.mxu1 }
  0xf0   :  { %v10891_v12 = vadd.f32 %v1017_v53, %v10692_v15 }
  0xf1   :  { %v10893_v18 = vpop.f32.mrf.mxu0  ;;  %v8729_v63 = vpop.f32.mrf.mxu1  ;;  %8972 = vmatmul.mubr.msk.f32.gmra.mxu1 %vm174_vm1, %v10299_v24  ;;  %9034 = vmatmul.mubr.msk.f32.gmra.mxu0 %vm174_vm1, %v9793_v29 }
  0xf2   :  { %v10900_v25 = vadd.f32 %v8729_v63, %v10699_v50  ;;  %8974 = vmatprep.mubr.msk.f32.mxu1 %vm174_vm1, %v10307_v36  ;;  %9036 = vmatprep.mubr.msk.f32.mxu0 %vm174_vm1, %v9801_v31  ;;  %v7375_v63 = vld [vmem:[%s13852_s0 + $0x109] sm:$0xff] }
  0xf3   :  { %v10906_v27 = vpop.f32.mrf.mxu0  ;;  %v1027_v38 = vpop.f32.mrf.mxu1 }
  0xf4   :  { %v10909_v61 = vadd.f32 %v1027_v38, %v10712_v48 }
  0xf5   :  { %v10911_v15 = vpop.f32.mrf.mxu0  ;;  %v8732_v24 = vpop.f32.mrf.mxu1  ;;  %8975 = vmatmul.mubr.msk.f32.gmra.mxu1 %vm174_vm1, %v10321_v44  ;;  %9037 = vmatmul.mubr.msk.f32.gmra.mxu0 %vm174_vm1, %v9815_v33 }
  0xf6   :  { %v10918_v29 = vadd.f32 %v8732_v24, %v10719_v56  ;;  %8977 = vmatprep.mubr.msk.f32.mxu1 %vm174_vm1, %v10329_v57  ;;  %9039 = vmatprep.mubr.msk.f32.mxu0 %vm174_vm1, %v9823_v35 }
  0xf7   :  { %v10924_v31 = vpop.f32.mrf.mxu0  ;;  %v1037_v36 = vpop.f32.mrf.mxu1 }
  0xf8   :  { %v10927_v50 = vadd.f32 %v1037_v36, %v10732_v58  ;;  %v13929_v36 = vld [vmem:[#allocation8_spill] sm:$0xff] }
  0xf9   :  { %v10929_v48 = vpop.f32.mrf.mxu0  ;;  %v8735_v44 = vpop.f32.mrf.mxu1  ;;  %8978 = vmatmul.mubr.msk.f32.gmra.mxu1 %vm174_vm1, %v10343_v17  ;;  %9040 = vmatmul.mubr.msk.f32.gmra.mxu0 %vm174_vm1, %v9846_v39  ;;  %v13926_v39 = vld [vmem:[#allocation3_spill] sm:$0xff] }
  0xfa   :  { %v10936_v33 = vadd.f32 %v8735_v44, %v10739_v0  ;;  %8980 = vmatprep.mubr.msk.f32.mxu1 %vm174_vm1, %v10351_v40  ;;  %9042 = vmatprep.mubr.msk.f32.mxu0 %vm174_vm1, %v9854_v41  ;;  %v13927_v0 = vld [vmem:[#allocation7_spill] sm:$0xff]  ;;  %v13928_v41 = vld [vmem:[#allocation4_spill] sm:$0xff]  ;;  %v13930_v44 = vld [vmem:[#allocation5_spill] sm:$0xff] }
  0xfb   :  { %v10942_v35 = vpop.f32.mrf.mxu0  ;;  %v1047_v57 = vpop.f32.mrf.mxu1 }
  0xfc   :  { %v10945_v56 = vadd.f32 %v1047_v57, %v10752_v2 }
  0xfd   :  { %v10947_v58 = vpop.f32.mrf.mxu0  ;;  %v8738_v17 = vpop.f32.mrf.mxu1  ;;  %8981 = vmatmul.mubr.msk.f32.gmra.mxu1 %vm174_vm1, %v13925_v9  ;;  %9043 = vmatmul.mubr.msk.f32.gmra.mxu0 %vm174_vm1, %v13926_v39 }
  0xfe   :  { %v10954_v40 = vadd.f32 %v8738_v17, %v10759_v11  ;;  %8983 = vmatprep.mubr.msk.f32.mxu1 %vm174_vm1, %v13927_v0  ;;  %9045 = vmatprep.mubr.msk.f32.mxu0 %vm174_vm1, %v13928_v41  ;;  %v13931_v17 = vld [vmem:[#allocation9_spill] sm:$0xff]  ;;  %v7377_v0 = vld [vmem:[%s13852_s0 + $0x121] sm:$0xff] }
  0xff   :  { %v10960_v2 = vpop.f32.mrf.mxu0  ;;  %v1057_v53 = vpop.f32.mrf.mxu1 }
 0x100   :  { %v10966_v38 = vadd.f32 %v1057_v53, %v10772_v45  ;;  %v7376_v45 = vld [vmem:[%s13852_s0 + $0x111] sm:$0xff] }
 0x101   :  { %v10968_v24 = vpop.f32.mrf.mxu0  ;;  %v8741_v11 = vpop.f32.mrf.mxu1  ;;  %8984 = vmatmul.mubr.msk.f32.gmra.mxu1 %vm174_vm1, %v13929_v36  ;;  %9046 = vmatmul.mubr.msk.f32.gmra.mxu0 %vm174_vm1, %v13930_v44  ;;  %v13933_v36 = vld [vmem:[#allocation11_spill] sm:$0xff] }
 0x102   :  { %v10975_v57 = vadd.f32 %v8741_v11, %v10776_v54  ;;  %8986 = vmatprep.mubr.msk.f32.mxu1 %vm174_vm1, %v13931_v17  ;;  %9048 = vmatprep.mubr.msk.f32.mxu0 %vm174_vm1, %v7375_v63  ;;  %v13932_v11 = vld [vmem:[#allocation10_spill] sm:$0xff] }
 0x103   :  { %v10983_v9 = vpop.f32.mrf.mxu0  ;;  %v1067_v39 = vpop.f32.mrf.mxu1 }
 0x104   :  { %v10989_v41 = vadd.f32 %v1067_v39, %v10787_v49  ;;  %v7378_v49 = vld [vmem:[%s13852_s0 + $0x129] sm:$0xff]  ;;  %v7379_v39 = vld [vmem:[%s13852_s0 + $0x139] sm:$0xff] }
 0x105   :  { %v10991_v54 = vpop.f32.mrf.mxu0  ;;  %v8744_v53 = vpop.f32.mrf.mxu1  ;;  %8987 = vmatmul.mubr.msk.f32.gmra.mxu1 %vm174_vm1, %v13932_v11  ;;  %9049 = vmatmul.mubr.msk.f32.gmra.mxu0 %vm174_vm1, %v7376_v45  ;;  %v13934_v11 = vld [vmem:[#allocation12_spill] sm:$0xff] }
 0x106   :  { %v10997_v63 = vadd.f32 %v8744_v53, %v10796_v37  ;;  %8989 = vmatprep.mubr.msk.f32.mxu1 %vm174_vm1, %v13933_v36  ;;  %9051 = vmatprep.mubr.msk.f32.mxu0 %vm174_vm1, %v7377_v0  ;;  %v13935_v36 = vld [vmem:[#allocation13_spill] sm:$0xff] }
 0x107   :  { %v11005_v44 = vpop.f32.mrf.mxu0  ;;  %v1077_v17 = vpop.f32.mrf.mxu1 }
 0x108   :  { %v11011_v45 = vadd.f32 %v1077_v17, %v10813_v55  ;;  %v7380_v55 = vld [vmem:[%s13852_s0 + $0x141] sm:$0xff] }
 0x109   :  { %v11013_v37 = vpop.f32.mrf.mxu0  ;;  %v8747_v53 = vpop.f32.mrf.mxu1  ;;  %8990 = vmatmul.mubr.msk.f32.gmra.mxu1 %vm174_vm1, %v13934_v11  ;;  %9052 = vmatmul.mubr.msk.f32.gmra.mxu0 %vm174_vm1, %v7378_v49  ;;  %v7381_v11 = vld [vmem:[%s13852_s0 + $0x151] sm:$0xff] }
 0x10a   :  { %v11019_v0 = vadd.f32 %v8747_v53, %v10823_v8  ;;  %8992 = vmatprep.mubr.msk.f32.mxu1 %vm174_vm1, %v13935_v36  ;;  %9054 = vmatprep.mubr.msk.f32.mxu0 %vm174_vm1, %v7379_v39  ;;  %v13936_v36 = vld [vmem:[#allocation14_spill] sm:$0xff] }
 0x10b   :  { %v11027_v17 = vpop.f32.mrf.mxu0  ;;  %v1087_v3 = vpop.f32.mrf.mxu1 }
 0x10c   :  { %v11033_v49 = vadd.f32 %v1087_v3, %v10835_v10  ;;  %v7382_v10 = vld [vmem:[%s13852_s0 + $0x159] sm:$0xff] }
 0x10d   :  { %v11035_v8 = vpop.f32.mrf.mxu0  ;;  %v8750_v53 = vpop.f32.mrf.mxu1  ;;  %8993 = vmatmul.mubr.msk.f32.gmra.mxu1 %vm174_vm1, %v13936_v36  ;;  %9055 = vmatmul.mubr.msk.f32.gmra.mxu0 %vm174_vm1, %v7380_v55  ;;  %v7383_v36 = vld [vmem:[%s13852_s0 + $0x169] sm:$0xff] }
 0x10e   :  { %v11041_v39 = vadd.f32 %v8750_v53, %v10842_v46  ;;  %8995 = vmatprep.mubr.msk.f32.mxu1 %vm174_vm1, %v13937_v20  ;;  %9057 = vmatprep.mubr.msk.f32.mxu0 %vm174_vm1, %v7381_v11  ;;  %v13938_v20 = vld [vmem:[#allocation16_spill] sm:$0xff] }
 0x10f   :  { %v11049_v3 = vpop.f32.mrf.mxu0  ;;  %v1097_v1 = vpop.f32.mrf.mxu1 }
 0x110   :  { %v11055_v55 = vadd.f32 %v1097_v1, %v10856_v14  ;;  %v7384_v1 = vld [vmem:[%s13852_s0 + $0x171] sm:$0xff] }
 0x111   :  { %v11057_v46 = vpop.f32.mrf.mxu0  ;;  %v8753_v53 = vpop.f32.mrf.mxu1  ;;  %8996 = vmatmul.mubr.msk.f32.gmra.mxu1 %vm174_vm1, %v13938_v20  ;;  %9058 = vmatmul.mubr.msk.f32.gmra.mxu0 %vm174_vm1, %v7382_v10  ;;  %v7385_v20 = vld [vmem:[%s13852_s0 + $0x181] sm:$0xff] }
 0x112   :  { %v11063_v11 = vadd.f32 %v8753_v53, %v10860_v13  ;;  %8998 = vmatprep.mubr.msk.f32.mxu1 %vm174_vm1, %v13939_v59  ;;  %9060 = vmatprep.mubr.msk.f32.mxu0 %vm174_vm1, %v7383_v36  ;;  %v13940_v59 = vld [vmem:[#allocation18_spill] sm:$0xff] }
 0x113   :  { %v11071_v14 = vpop.f32.mrf.mxu0  ;;  %v1107_v7 = vpop.f32.mrf.mxu1 }
 0x114   :  { %v11077_v10 = vadd.f32 %v1107_v7, %v10871_v16  ;;  %v7386_v7 = vld [vmem:[%s13852_s0 + $0x189] sm:$0xff] }
 0x115   :  { %v11079_v13 = vpop.f32.mrf.mxu0  ;;  %v8756_v53 = vpop.f32.mrf.mxu1  ;;  %8999 = vmatmul.mubr.msk.f32.gmra.mxu1 %vm174_vm1, %v13940_v59  ;;  %9061 = vmatmul.mubr.msk.f32.gmra.mxu0 %vm174_vm1, %v7384_v1  ;;  %v7387_v59 = vld [vmem:[%s13852_s0 + $0x1c9] sm:$0xff] }
 0x116   :  { %v11085_v36 = vadd.f32 %v8756_v53, %v10875_v28  ;;  %9001 = vmatprep.mubr.msk.f32.mxu1 %vm174_vm1, %v13941_v51  ;;  %9063 = vmatprep.mubr.msk.f32.mxu0 %vm174_vm1, %v7385_v20  ;;  %v13942_v51 = vld [vmem:[#allocation20_spill] sm:$0xff] }
 0x117   :  { %v11093_v16 = vpop.f32.mrf.mxu0  ;;  %v1117_v30 = vpop.f32.mrf.mxu1 }
 0x118   :  { %v11099_v1 = vadd.f32 %v1117_v30, %v10888_v23  ;;  %v7388_v30 = vld [vmem:[%s13852_s0 + $0x1d1] sm:$0xff] }
 0x119   :  { %v11101_v28 = vpop.f32.mrf.mxu0  ;;  %v8759_v53 = vpop.f32.mrf.mxu1  ;;  %9002 = vmatmul.mubr.msk.f32.gmra.mxu1 %vm174_vm1, %v13942_v51  ;;  %9064 = vmatmul.mubr.msk.f32.gmra.mxu0 %vm174_vm1, %v7386_v7  ;;  %v7389_v51 = vld [vmem:[%s13852_s0 + $0x1e1] sm:$0xff] }
 0x11a   :  { %v11107_v20 = vadd.f32 %v8759_v53, %v10893_v18  ;;  %9004 = vmatprep.mubr.msk.f32.mxu1 %vm174_vm1, %v13943_v22  ;;  %9066 = vmatprep.mubr.msk.f32.mxu0 %vm174_vm1, %v7387_v59 }
 0x11b   :  { %v11115_v23 = vpop.f32.mrf.mxu0  ;;  %v1127_v42 = vpop.f32.mrf.mxu1 }
 0x11c   :  { %v11121_v7 = vadd.f32 %v1127_v42, %v10906_v27  ;;  %v7390_v42 = vld [vmem:[%s13852_s0 + $0x1e9] sm:$0xff] }
 0x11d   :  { %v8762_v18 = vpop.f32.mrf.mxu1  ;;  %v8824_v53 = vpop.f32.mrf.mxu0  ;;  %9005 = vmatmul.mubr.msk.f32.gmra.mxu1 %vm174_vm1, %v13944_v4  ;;  %9067 = vmatmul.mubr.msk.f32.gmra.mxu0 %vm174_vm1, %v7388_v30  ;;  %v7391_v4 = vld [vmem:[%s13852_s0 + $0x1f9] sm:$0xff] }
 0x11e   :  { %v11127_v22 = vadd.f32 %v8762_v18, %v10911_v15  ;;  %v11130_v59 = vadd.f32 %v8824_v53, %v10882_v21  ;;  %9007 = vmatprep.mubr.msk.f32.mxu1 %vm174_vm1, %v13945_v34  ;;  %9069 = vmatprep.mubr.msk.f32.mxu0 %vm174_vm1, %v7389_v51  ;;  %v13946_v18 = vld [vmem:[#allocation24_spill] sm:$0xff] }
 0x11f   :  { %v1137_v27 = vpop.f32.mrf.mxu1  ;;  %v1663_v60 = vpop.f32.mrf.mxu0 }
 0x120   :  { %v11142_v15 = vadd.f32 %v1137_v27, %v10924_v31  ;;  %v11145_v21 = vadd.f32 %v1663_v60, %v10891_v12  ;;  %v7392_v60 = vld [vmem:[%s13852_s0 + $0x201] sm:$0xff] }
 0x121   :  { %v8765_v30 = vpop.f32.mrf.mxu1  ;;  %v8827_v34 = vpop.f32.mrf.mxu0  ;;  %9008 = vmatmul.mubr.msk.f32.gmra.mxu1 %vm174_vm1, %v13946_v18  ;;  %9070 = vmatmul.mubr.msk.f32.gmra.mxu0 %vm174_vm1, %v7390_v42  ;;  %v7287_v42 = vld [vmem:[%s13852_s0 + $0x330] sm:$0xff] }
 0x122   :  { %v11151_v51 = vadd.f32 %v8765_v30, %v10929_v48  ;;  %v11154_v53 = vadd.f32 %v8827_v34, %v10900_v25  ;;  %9010 = vmatprep.mubr.msk.f32.mxu1 %vm174_vm1, %v10571_v32  ;;  %9072 = vmatprep.mubr.msk.f32.mxu0 %vm174_vm1, %v7391_v4  ;;  %v7393_v25 = vld [vmem:[%s13852_s0 + $0x211] sm:$0xff] }
 0x123   :  { %v1147_v12 = vpop.f32.mrf.mxu1  ;;  %v1673_v31 = vpop.f32.mrf.mxu0 }
 0x124   :  { %v11169_v48 = vadd.f32 %v1147_v12, %v10942_v35  ;;  %v11172_v32 = vadd.f32 %v1673_v31, %v10909_v61  ;;  %v7288_v61 = vld [vmem:[%s13852_s0 + $0x338] sm:$0xff] }
 0x125   :  { %v8768_v27 = vpop.f32.mrf.mxu1  ;;  %v8830_v4 = vpop.f32.mrf.mxu0  ;;  %9011 = vmatmul.mubr.msk.f32.gmra.mxu1 %vm174_vm1, %v10585_v43  ;;  %9073 = vmatmul.mubr.msk.f32.gmra.mxu0 %vm174_vm1, %v7392_v60  ;;  %v7394_v43 = vld [vmem:[%s13852_s0 + $0x219] sm:$0xff] }
 0x126   :  { %v11178_v30 = vadd.f32 %v8768_v27, %v10947_v58  ;;  %v11181_v34 = vadd.f32 %v8830_v4, %v10918_v29  ;;  %9013 = vmatprep.mubr.msk.f32.mxu1 %vm174_vm1, %v7287_v42  ;;  %9075 = vmatprep.mubr.msk.f32.mxu0 %vm174_vm1, %v7393_v25  ;;  %v7395_v58 = vld [vmem:[%s13852_s0 + $0x229] sm:$0xff]  ;;  %v7485_v29 = vld [vmem:[%s13852_s0 + $0x1a] sm:$0xff] }
 0x127   :  { %v1157_v35 = vpop.f32.mrf.mxu1  ;;  %v1683_v18 = vpop.f32.mrf.mxu0 }
 0x128   :  { %v11198_v60 = vadd.f32 %v1157_v35, %v10960_v2  ;;  %v11201_v12 = vadd.f32 %v1683_v18, %v10927_v50  ;;  %v7396_v50 = vld [vmem:[%s13852_s0 + $0x231] sm:$0xff]  ;;  %v7486_v2 = vld [vmem:[%s13852_s0 + $0x22] sm:$0xff] }
 0x129   :  { %v8771_v31 = vpop.f32.mrf.mxu1  ;;  %v8833_v42 = vpop.f32.mrf.mxu0  ;;  %9014 = vmatmul.mubr.msk.f32.gmra.mxu1 %vm174_vm1, %v7288_v61  ;;  %9076 = vmatmul.mubr.msk.f32.gmra.mxu0 %vm174_vm1, %v7394_v43 }
 0x12a   :  { %v11206_v25 = vadd.f32 %v8771_v31, %v10968_v24  ;;  %v11209_v27 = vadd.f32 %v8833_v42, %v10936_v33  ;;  %9078 = vmatprep.mubr.msk.f32.mxu0 %vm174_vm1, %v7395_v58  ;;  %9116 = vmatprep.mubr.msk.f32.mxu1 %vm174_vm1, %v7485_v29  ;;  %v7397_v24 = vld [vmem:[%s13852_s0 + $0x241] sm:$0xff]  ;;  %v7487_v33 = vld [vmem:[%s13852_s0 + $0x32] sm:$0xff] }
 0x12b   :  { %v1167_v4 = vpop.f32.mrf.mxu1  ;;  %v1693_v61 = vpop.f32.mrf.mxu0 }
 0x12c   :  { %v11226_v43 = vadd.f32 %v1167_v4, %v10983_v9  ;;  %v11229_v35 = vadd.f32 %v1693_v61, %v10945_v56  ;;  %v7398_v56 = vld [vmem:[%s13852_s0 + $0x249] sm:$0xff]  ;;  %v7488_v9 = vld [vmem:[%s13852_s0 + $0x3a] sm:$0xff] }
 0x12d   :  { %v8774_v18 = vpop.f32.mrf.mxu1  ;;  %v8836_v58 = vpop.f32.mrf.mxu0  ;;  %9079 = vmatmul.mubr.msk.f32.gmra.mxu0 %vm174_vm1, %v7396_v50  ;;  %9117 = vmatmul.mubr.msk.f32.vlgmr.msra.gmra.mxu1 %vm174_vm1, %v7486_v2 }
 0x12e   :  { %v11234_v29 = vadd.f32 %v8774_v18, %v10991_v54  ;;  %v11237_v31 = vadd.f32 %v8836_v58, %v10954_v40  ;;  %9081 = vmatprep.mubr.msk.f32.mxu0 %vm174_vm1, %v7397_v24  ;;  %9119 = vmatprep.mubr.msk.f32.mxu1 %vm174_vm1, %v7487_v33  ;;  %v7399_v54 = vld [vmem:[%s13852_s0 + $0x259] sm:$0xff]  ;;  %v7489_v40 = vld [vmem:[%s13852_s0 + $0x4a] sm:$0xff] }
 0x12f   :  { %v1177_v42 = vpop.f32.mrf.mxu1  ;;  %v1703_v50 = vpop.f32.mrf.mxu0  ;;  %9311 = vmatpush3.msk.msra.mxu1 %vm367_vm0, %v10794_v62  ;;  %v7400_v62 = vld [vmem:[%s13852_s0 + $0x261] sm:$0xff] }
 0x130   :  { %v11256_v2 = vadd.f32 %v1177_v42, %v11005_v44  ;;  %v11259_v4 = vadd.f32 %v1703_v50, %v10966_v38  ;;  %v7490_v38 = vld [vmem:[%s13852_s0 + $0x52] sm:$0xff] }
 0x131   :  { %v8777_v61 = vpop.f32.mrf.mxu1  ;;  %v8839_v24 = vpop.f32.mrf.mxu0  ;;  %9082 = vmatmul.mubr.msk.f32.gmra.mxu0 %vm174_vm1, %v7398_v56  ;;  %9120 = vmatmul.mubr.msk.f32.gmra.mxu1 %vm174_vm1, %v7488_v9 }
 0x132   :  { %v11264_v33 = vadd.f32 %v8777_v61, %v11013_v37  ;;  %v11267_v18 = vadd.f32 %v8839_v24, %v10975_v57  ;;  %9084 = vmatprep.mubr.msk.f32.mxu0 %vm174_vm1, %v7399_v54  ;;  %9122 = vmatprep.mubr.msk.f32.mxu1 %vm174_vm1, %v7489_v40  ;;  %v7401_v37 = vld [vmem:[%s13852_s0 + $0x271] sm:$0xff]  ;;  %v7491_v57 = vld [vmem:[%s13852_s0 + $0x62] sm:$0xff] }
 0x133   :  { %v1187_v44 = vpop.f32.mrf.mxu1  ;;  %v1713_v58 = vpop.f32.mrf.mxu0 }
 0x134   :  { %v11284_v56 = vadd.f32 %v1187_v44, %v11027_v17  ;;  %v11287_v9 = vadd.f32 %v1713_v58, %v10989_v41  ;;  %v7402_v41 = vld [vmem:[%s13852_s0 + $0x279] sm:$0xff]  ;;  %v7492_v17 = vld [vmem:[%s13852_s0 + $0x6a] sm:$0xff] }
 0x135   :  { %v8780_v42 = vpop.f32.mrf.mxu1  ;;  %v8842_v50 = vpop.f32.mrf.mxu0  ;;  %9085 = vmatmul.mubr.msk.f32.gmra.mxu0 %vm174_vm1, %v7400_v62  ;;  %9123 = vmatmul.mubr.msk.f32.gmra.mxu1 %vm174_vm1, %v7490_v38 }
 0x136   :  { %v11292_v54 = vadd.f32 %v8780_v42, %v11035_v8  ;;  %v11295_v40 = vadd.f32 %v8842_v50, %v10997_v63  ;;  %9087 = vmatprep.mubr.msk.f32.mxu0 %vm174_vm1, %v7401_v37  ;;  %9125 = vmatprep.mubr.msk.f32.mxu1 %vm174_vm1, %v7491_v57  ;;  %v7403_v8 = vld [vmem:[%s13852_s0 + $0x289] sm:$0xff]  ;;  %v7493_v63 = vld [vmem:[%s13852_s0 + $0x7a] sm:$0xff] }
 0x137   :  { %v1197_v61 = vpop.f32.mrf.mxu1  ;;  %v1723_v24 = vpop.f32.mrf.mxu0 }
 0x138   :  { %v11312_v62 = vadd.f32 %v1197_v61, %v11049_v3  ;;  %v11315_v38 = vadd.f32 %v1723_v24, %v11011_v45  ;;  %v7404_v45 = vld [vmem:[%s13852_s0 + $0x291] sm:$0xff]  ;;  %v7494_v3 = vld [vmem:[%s13852_s0 + $0x82] sm:$0xff] }
 0x139   :  { %v8783_v44 = vpop.f32.mrf.mxu1  ;;  %v8845_v58 = vpop.f32.mrf.mxu0  ;;  %9088 = vmatmul.mubr.msk.f32.gmra.mxu0 %vm174_vm1, %v7402_v41  ;;  %9126 = vmatmul.mubr.msk.f32.gmra.mxu1 %vm174_vm1, %v7492_v17 }
 0x13a   :  { %v11320_v37 = vadd.f32 %v8783_v44, %v11057_v46  ;;  %v11323_v57 = vadd.f32 %v8845_v58, %v11019_v0  ;;  %9090 = vmatprep.mubr.msk.f32.mxu0 %vm174_vm1, %v7403_v8  ;;  %9128 = vmatprep.mubr.msk.f32.mxu1 %vm174_vm1, %v7493_v63  ;;  %v7405_v46 = vld [vmem:[%s13852_s0 + $0x2a1] sm:$0xff]  ;;  %v7495_v0 = vld [vmem:[%s13852_s0 + $0x92] sm:$0xff] }
 0x13b   :  { %v1207_v42 = vpop.f32.mrf.mxu1  ;;  %v1733_v50 = vpop.f32.mrf.mxu0 }
 0x13c   :  { %v11340_v41 = vadd.f32 %v1207_v42, %v11071_v14  ;;  %v11343_v17 = vadd.f32 %v1733_v50, %v11033_v49  ;;  %v7406_v49 = vld [vmem:[%s13852_s0 + $0x2a9] sm:$0xff]  ;;  %v7496_v14 = vld [vmem:[%s13852_s0 + $0x9a] sm:$0xff] }
 0x13d   :  { %v8786_v61 = vpop.f32.mrf.mxu1  ;;  %v8848_v24 = vpop.f32.mrf.mxu0  ;;  %9091 = vmatmul.mubr.msk.f32.gmra.mxu0 %vm174_vm1, %v7404_v45  ;;  %9129 = vmatmul.mubr.msk.f32.gmra.mxu1 %vm174_vm1, %v7494_v3 }
 0x13e   :  { %v11348_v8 = vadd.f32 %v8786_v61, %v11079_v13  ;;  %v11351_v63 = vadd.f32 %v8848_v24, %v11041_v39  ;;  %9093 = vmatprep.mubr.msk.f32.mxu0 %vm174_vm1, %v7405_v46  ;;  %9131 = vmatprep.mubr.msk.f32.mxu1 %vm174_vm1, %v7495_v0  ;;  %v7407_v13 = vld [vmem:[%s13852_s0 + $0x2b9] sm:$0xff]  ;;  %v7497_v39 = vld [vmem:[%s13852_s0 + $0xaa] sm:$0xff] }
 0x13f   :  { %v1217_v44 = vpop.f32.mrf.mxu1  ;;  %v1743_v58 = vpop.f32.mrf.mxu0 }
 0x140   :  { %v11368_v45 = vadd.f32 %v1217_v44, %v11093_v16  ;;  %v11371_v3 = vadd.f32 %v1743_v58, %v11055_v55  ;;  %v7408_v55 = vld [vmem:[%s13852_s0 + $0x2c1] sm:$0xff]  ;;  %v7498_v16 = vld [vmem:[%s13852_s0 + $0xb2] sm:$0xff] }
 0x141   :  { %v8789_v42 = vpop.f32.mrf.mxu1  ;;  %v8851_v50 = vpop.f32.mrf.mxu0  ;;  %9094 = vmatmul.mubr.msk.f32.gmra.mxu0 %vm174_vm1, %v7406_v49  ;;  %9132 = vmatmul.mubr.msk.f32.gmra.mxu1 %vm174_vm1, %v7496_v14 }
 0x142   :  { %v11376_v46 = vadd.f32 %v8789_v42, %v11101_v28  ;;  %v11379_v0 = vadd.f32 %v8851_v50, %v11063_v11  ;;  %9096 = vmatprep.mubr.msk.f32.mxu0 %vm174_vm1, %v7407_v13  ;;  %9134 = vmatprep.mubr.msk.f32.mxu1 %vm174_vm1, %v7497_v39  ;;  %v7409_v28 = vld [vmem:[%s13852_s0 + $0x2d1] sm:$0xff]  ;;  %v7499_v11 = vld [vmem:[%s13852_s0 + $0xc2] sm:$0xff]  ;;  %v7501_v50 = vld [vmem:[%s13852_s0 + $0xda] sm:$0xff] }
 0x143   :  { %v1227_v61 = vpop.f32.mrf.mxu1  ;;  %v1753_v24 = vpop.f32.mrf.mxu0 }
 0x144   :  { %v11396_v49 = vadd.f32 %v1227_v61, %v11115_v23  ;;  %v11399_v14 = vadd.f32 %v1753_v24, %v11077_v10  ;;  %v7410_v23 = vld [vmem:[%s13852_s0 + $0x2d9] sm:$0xff]  ;;  %v7500_v10 = vld [vmem:[%s13852_s0 + $0xca] sm:$0xff] }
 0x145   :  { %v11401_v44 = vpop.f32.mrf.mxu1  ;;  %v8854_v58 = vpop.f32.mrf.mxu0  ;;  %9097 = vmatmul.mubr.msk.f32.gmra.mxu0 %vm174_vm1, %v7408_v55  ;;  %9135 = vmatmul.mubr.msk.f32.gmra.mxu1 %vm174_vm1, %v7498_v16 }
 0x146   :  { %v11406_v13 = vadd.f32 %v8854_v58, %v11085_v36  ;;  %9099 = vmatprep.mubr.msk.f32.mxu0 %vm174_vm1, %v7409_v28  ;;  %9137 = vmatprep.mubr.msk.f32.mxu1 %vm174_vm1, %v7499_v11  ;;  %v7411_v36 = vld [vmem:[%s13852_s0 + $0x2e9] sm:$0xff]  ;;  %v7412_v28 = vld [vmem:[%s13852_s0 + $0x2f1] sm:$0xff] }
 0x147   :  { %v11416_v39 = vpop.f32.mrf.mxu1  ;;  %v1763_v42 = vpop.f32.mrf.mxu0 }
 0x148   :  { %v11425_v55 = vadd.f32 %v1763_v42, %v11099_v1  ;;  %v7502_v1 = vld [vmem:[%s13852_s0 + $0xe2] sm:$0xff] }
 0x149   :  { %v11427_v16 = vpop.f32.mrf.mxu1  ;;  %v8857_v61 = vpop.f32.mrf.mxu0  ;;  %9100 = vmatmul.mubr.msk.f32.gmra.mxu0 %vm174_vm1, %v7410_v23  ;;  %9138 = vmatmul.mubr.msk.f32.gmra.mxu1 %vm174_vm1, %v7500_v10  ;;  %v7503_v23 = vld [vmem:[%s13852_s0 + $0xf2] sm:$0xff] }
 0x14a   :  { %v11432_v24 = vadd.f32 %v8857_v61, %v11107_v20  ;;  %9102 = vmatprep.mubr.msk.f32.mxu0 %vm174_vm1, %v7411_v36  ;;  %9140 = vmatprep.mubr.msk.f32.mxu1 %vm174_vm1, %v7501_v50  ;;  %v7413_v20 = vld [vmem:[%s13852_s0 + $0x301] sm:$0xff]  ;;  %v7414_v61 = vld [vmem:[%s13852_s0 + $0x309] sm:$0xff] }
 0x14b   :  { %v11442_v11 = vpop.f32.mrf.mxu1  ;;  %v1773_v58 = vpop.f32.mrf.mxu0 }
 0x14c   :  { %v11451_v10 = vadd.f32 %v1773_v58, %v11121_v7  ;;  %v7504_v7 = vld [vmem:[%s13852_s0 + $0xfa] sm:$0xff] }
 0x14d   :  { %v11453_v42 = vpop.f32.mrf.mxu1  ;;  %v8860_v36 = vpop.f32.mrf.mxu0  ;;  %9103 = vmatmul.mubr.msk.f32.gmra.mxu0 %vm174_vm1, %v7412_v28  ;;  %9141 = vmatmul.mubr.msk.f32.gmra.mxu1 %vm174_vm1, %v7502_v1  ;;  %v7505_v1 = vld [vmem:[%s13852_s0 + $0x10a] sm:$0xff] }
 0x14e   :  { %13947 = vst [vmem:[#allocation6_spill] sm:$0xff] %v11451_v10  ;;  %v11458_v50 = vadd.f32 %v8860_v36, %v11127_v22  ;;  %9105 = vmatprep.mubr.msk.f32.mxu0 %vm174_vm1, %v7413_v20  ;;  %9143 = vmatprep.mubr.msk.f32.mxu1 %vm174_vm1, %v7503_v23  ;;  %v7415_v22 = vld [vmem:[%s13852_s0 + $0x319] sm:$0xff]  ;;  %v7416_v10 = vld [vmem:[%s13852_s0 + $0x321] sm:$0xff] }
 0x14f   :  { %v11468_v58 = vpop.f32.mrf.mxu1  ;;  %v1783_v28 = vpop.f32.mrf.mxu0 }
 0x150   :  { %13948 = vst [vmem:[#allocation3_spill] sm:$0xff] %v11458_v50  ;;  %v11477_v20 = vadd.f32 %v1783_v28, %v11142_v15  ;;  %v7506_v15 = vld [vmem:[%s13852_s0 + $0x112] sm:$0xff] }
 0x151   :  { %v11479_v23 = vpop.f32.mrf.mxu1  ;;  %v8863_v36 = vpop.f32.mrf.mxu0  ;;  %9106 = vmatmul.mubr.msk.f32.gmra.mxu0 %vm174_vm1, %v7414_v61  ;;  %9144 = vmatmul.mubr.msk.f32.gmra.mxu1 %vm174_vm1, %v7504_v7  ;;  %v7507_v7 = vld [vmem:[%s13852_s0 + $0x122] sm:$0xff] }
 0x152   :  { %13949 = vst [vmem:[#allocation7_spill] sm:$0xff] %v11477_v20  ;;  %v11484_v50 = vadd.f32 %v8863_v36, %v11151_v51  ;;  %9108 = vmatprep.mubr.msk.f32.mxu0 %vm174_vm1, %v7415_v22  ;;  %9146 = vmatprep.mubr.msk.f32.mxu1 %vm174_vm1, %v7505_v1  ;;  %v7417_v51 = vld [vmem:[%s13852_s0 + $0x331] sm:$0xff]  ;;  %v7418_v20 = vld [vmem:[%s13852_s0 + $0x339] sm:$0xff] }
 0x153   :  { %v11494_v28 = vpop.f32.mrf.mxu1  ;;  %v1793_v61 = vpop.f32.mrf.mxu0 }
 0x154   :  { %13950 = vst [vmem:[#allocation4_spill] sm:$0xff] %v11484_v50  ;;  %v11503_v22 = vadd.f32 %v1793_v61, %v11169_v48  ;;  %v7508_v48 = vld [vmem:[%s13852_s0 + $0x12a] sm:$0xff] }
 0x155   :  { %v11505_v1 = vpop.f32.mrf.mxu1  ;;  %v8866_v36 = vpop.f32.mrf.mxu0  ;;  %9109 = vmatmul.mubr.msk.f32.gmra.mxu0 %vm174_vm1, %v7416_v10  ;;  %9147 = vmatmul.mubr.msk.f32.gmra.mxu1 %vm174_vm1, %v7506_v15  ;;  %v7615_v15 = vld [vmem:[%s13852_s0 + $0x30] sm:$0xff] }
 0x156   :  { %13951 = vst [vmem:[#allocation8_spill] sm:$0xff] %v11503_v22  ;;  %v11510_v50 = vadd.f32 %v8866_v36, %v11178_v30  ;;  %9111 = vmatprep.mubr.msk.f32.mxu0 %vm174_vm1, %v7417_v51  ;;  %9149 = vmatprep.mubr.msk.f32.mxu1 %vm174_vm1, %v7507_v7  ;;  %v7509_v30 = vld [vmem:[%s13852_s0 + $0x13a] sm:$0xff]  ;;  %v7510_v22 = vld [vmem:[%s13852_s0 + $0x142] sm:$0xff] }
 0x157   :  { %v11520_v61 = vpop.f32.mrf.mxu1  ;;  %v1803_v10 = vpop.f32.mrf.mxu0 }
 0x158   :  { %13952 = vst [vmem:[#allocation5_spill] sm:$0xff] %v11510_v50  ;;  %v11529_v51 = vadd.f32 %v1803_v10, %v11198_v60  ;;  %v7616_v60 = vld [vmem:[%s13852_s0 + $0x38] sm:$0xff] }
 0x159   :  { %v11531_v7 = vpop.f32.mrf.mxu1  ;;  %v8869_v36 = vpop.f32.mrf.mxu0  ;;  %9112 = vmatmul.mubr.msk.f32.gmra.mxu0 %vm174_vm1, %v7418_v20  ;;  %9150 = vmatmul.mubr.msk.f32.gmra.mxu1 %vm174_vm1, %v7508_v48 }
 0x15a   :  { %v11536_v50 = vadd.f32 %v8869_v36, %v11206_v25  ;;  %9152 = vmatprep.mubr.msk.f32.mxu1 %vm174_vm1, %v7509_v30  ;;  %9214 = vmatprep.mubr.msk.f32.mxu0 %vm174_vm1, %v7615_v15  ;;  %v7511_v25 = vld [vmem:[%s13852_s0 + $0x152] sm:$0xff]  ;;  %v7617_v30 = vld [vmem:[%s13852_s0 + $0x48] sm:$0xff] }
 0x15b   :  { %v11546_v10 = vpop.f32.mrf.mxu1  ;;  %v1813_v20 = vpop.f32.mrf.mxu0 }
 0x15c   :  { %13953 = vst [vmem:[#allocation9_spill] sm:$0xff] %v11536_v50  ;;  %v11552_v48 = vadd.f32 %v1813_v20, %v11226_v43  ;;  %v7512_v43 = vld [vmem:[%s13852_s0 + $0x15a] sm:$0xff]  ;;  %v7618_v20 = vld [vmem:[%s13852_s0 + $0x50] sm:$0xff] }
 0x15d   :  { %v11557_v15 = vpop.f32.mrf.mxu1  ;;  %v8872_v36 = vpop.f32.mrf.mxu0  ;;  %9153 = vmatmul.mubr.msk.f32.gmra.mxu1 %vm174_vm1, %v7510_v22  ;;  %9215 = vmatmul.mubr.msk.f32.vlgmr.msra.gmra.mxu0 %vm174_vm1, %v7616_v60 }
 0x15e   :  { %13954 = vst [vmem:[#allocation10_spill] sm:$0xff] %v11552_v48  ;;  %v11562_v50 = vadd.f32 %v8872_v36, %v11234_v29  ;;  %9409 = vmatpush3.msk.msra.mxu0 %vm367_vm0, %v10811_v6  ;;  %9155 = vmatprep.mubr.msk.f32.mxu1 %vm174_vm1, %v7511_v25  ;;  %v7513_v29 = vld [vmem:[%s13852_s0 + $0x16a] sm:$0xff]  ;;  %v7619_v6 = vld [vmem:[%s13852_s0 + $0x60] sm:$0xff] }
 0x15f   :  { %v11573_v48 = vpop.f32.mrf.mxu1  ;;  %v1823_v22 = vpop.f32.mrf.mxu0  ;;  %9217 = vmatprep.mubr.msk.f32.mxu0 %vm174_vm1, %v7617_v30 }
 0x160   :  { %13955 = vst [vmem:[#allocation11_spill] sm:$0xff] %v11562_v50  ;;  %v11583_v60 = vadd.f32 %v1823_v22, %v11256_v2  ;;  %v7514_v50 = vld [vmem:[%s13852_s0 + $0x172] sm:$0xff]  ;;  %v7620_v2 = vld [vmem:[%s13852_s0 + $0x68] sm:$0xff] }
 0x161   :  { %v11585_v25 = vpop.f32.mrf.mxu1  ;;  %v8875_v36 = vpop.f32.mrf.mxu0  ;;  %9156 = vmatmul.mubr.msk.f32.gmra.mxu1 %vm174_vm1, %v7512_v43  ;;  %9218 = vmatmul.mubr.msk.f32.gmra.mxu0 %vm174_vm1, %v7618_v20  ;;  %v7621_v20 = vld [vmem:[%s13852_s0 + $0x78] sm:$0xff] }
 0x162   :  { %13956 = vst [vmem:[#allocation12_spill] sm:$0xff] %v11583_v60  ;;  %v11590_v30 = vadd.f32 %v8875_v36, %v11264_v33  ;;  %9158 = vmatprep.mubr.msk.f32.mxu1 %vm174_vm1, %v7513_v29  ;;  %9220 = vmatprep.mubr.msk.f32.mxu0 %vm174_vm1, %v7619_v6  ;;  %v7515_v33 = vld [vmem:[%s13852_s0 + $0x182] sm:$0xff]  ;;  %v7516_v60 = vld [vmem:[%s13852_s0 + $0x18a] sm:$0xff] }
 0x163   :  { %v11600_v22 = vpop.f32.mrf.mxu1  ;;  %v1833_v43 = vpop.f32.mrf.mxu0 }
 0x164   :  { %13957 = vst [vmem:[#allocation13_spill] sm:$0xff] %v11590_v30  ;;  %v11609_v29 = vadd.f32 %v1833_v43, %v11284_v56  ;;  %v7622_v56 = vld [vmem:[%s13852_s0 + $0x80] sm:$0xff] }
 0x165   :  { %v11611_v6 = vpop.f32.mrf.mxu1  ;;  %v8878_v36 = vpop.f32.mrf.mxu0  ;;  %9159 = vmatmul.mubr.msk.f32.gmra.mxu1 %vm174_vm1, %v7514_v50  ;;  %9221 = vmatmul.mubr.msk.f32.gmra.mxu0 %vm174_vm1, %v7620_v2  ;;  %v7623_v2 = vld [vmem:[%s13852_s0 + $0x90] sm:$0xff] }
 0x166   :  { %13958 = vst [vmem:[#allocation14_spill] sm:$0xff] %v11609_v29  ;;  %v11616_v30 = vadd.f32 %v8878_v36, %v11292_v54  ;;  %9161 = vmatprep.mubr.msk.f32.mxu1 %vm174_vm1, %v7515_v33  ;;  %9223 = vmatprep.mubr.msk.f32.mxu0 %vm174_vm1, %v7621_v20  ;;  %v7517_v54 = vld [vmem:[%s13852_s0 + $0x1ca] sm:$0xff]  ;;  %v7518_v29 = vld [vmem:[%s13852_s0 + $0x1d2] sm:$0xff] }
 0x167   :  { %v11626_v43 = vpop.f32.mrf.mxu1  ;;  %v1843_v50 = vpop.f32.mrf.mxu0 }
 0x168   :  { %13959 = vst [vmem:[#allocation15_spill] sm:$0xff] %v11616_v30  ;;  %v11635_v33 = vadd.f32 %v1843_v50, %v11312_v62  ;;  %v7624_v62 = vld [vmem:[%s13852_s0 + $0x98] sm:$0xff] }
 0x169   :  { %v11637_v20 = vpop.f32.mrf.mxu1  ;;  %v8881_v36 = vpop.f32.mrf.mxu0  ;;  %9162 = vmatmul.mubr.msk.f32.gmra.mxu1 %vm174_vm1, %v7516_v60  ;;  %9224 = vmatmul.mubr.msk.f32.gmra.mxu0 %vm174_vm1, %v7622_v56  ;;  %v7625_v56 = vld [vmem:[%s13852_s0 + $0xa8] sm:$0xff] }
 0x16a   :  { %13960 = vst [vmem:[#allocation16_spill] sm:$0xff] %v11635_v33  ;;  %v11642_v30 = vadd.f32 %v8881_v36, %v11320_v37  ;;  %9164 = vmatprep.mubr.msk.f32.mxu1 %vm174_vm1, %v7517_v54  ;;  %9226 = vmatprep.mubr.msk.f32.mxu0 %vm174_vm1, %v7623_v2  ;;  %v7519_v37 = vld [vmem:[%s13852_s0 + $0x1e2] sm:$0xff] }
 0x16b   :  { %v11652_v50 = vpop.f32.mrf.mxu1  ;;  %v1853_v60 = vpop.f32.mrf.mxu0 }
 0x16c   :  { %13961 = vst [vmem:[#allocation17_spill] sm:$0xff] %v11642_v30  ;;  %v11661_v54 = vadd.f32 %v1853_v60, %v11340_v41  ;;  %v7520_v41 = vld [vmem:[%s13852_s0 + $0x1ea] sm:$0xff] }
 0x16d   :  { %v8884_v2 = vpop.f32.mrf.mxu0  ;;  %v8922_v36 = vpop.f32.mrf.mxu1  ;;  %9165 = vmatmul.mubr.msk.f32.gmra.mxu1 %vm174_vm1, %v7518_v29  ;;  %9227 = vmatmul.mubr.msk.f32.gmra.mxu0 %vm174_vm1, %v7624_v62  ;;  %v7626_v29 = vld [vmem:[%s13852_s0 + $0xb0] sm:$0xff] }
 0x16e   :  { %13962 = vst [vmem:[#allocation18_spill] sm:$0xff] %v11661_v54  ;;  %v11666_v30 = vadd.f32 %v8884_v2, %v11348_v8  ;;  %v11669_v33 = vadd.f32 %v8922_v36, %v11130_v59  ;;  %9167 = vmatprep.mubr.msk.f32.mxu1 %vm174_vm1, %v7519_v37  ;;  %9229 = vmatprep.mubr.msk.f32.mxu0 %vm174_vm1, %v7625_v56  ;;  %v7521_v8 = vld [vmem:[%s13852_s0 + $0x1fa] sm:$0xff] }
 0x16f   :  { %v1863_v60 = vpop.f32.mrf.mxu0  ;;  %v2374_v62 = vpop.f32.mrf.mxu1  ;;  %v7627_v59 = vld [vmem:[%s13852_s0 + $0xc0] sm:$0xff] }
 0x170   :  { %13963 = vst [vmem:[#allocation19_spill] sm:$0xff] %v11666_v30  ;;  %v11686_v37 = vadd.f32 %v1863_v60, %v11368_v45  ;;  %v11689_v56 = vadd.f32 %v2374_v62, %v11145_v21  ;;  %v7522_v21 = vld [vmem:[%s13852_s0 + $0x202] sm:$0xff]  ;;  %v1243_v60 = vadd.f32 %v11401_v44, %v10681_v47  ;;  %v7524_v47 = vld [vmem:[%s13852_s0 + $0x21a] sm:$0xff] }
 0x171   :  { %v8887_v2 = vpop.f32.mrf.mxu0  ;;  %v8925_v36 = vpop.f32.mrf.mxu1  ;;  %9168 = vmatmul.mubr.msk.f32.gmra.mxu1 %vm174_vm1, %v7520_v41  ;;  %9230 = vmatmul.mubr.msk.f32.gmra.mxu0 %vm174_vm1, %v7626_v29  ;;  %v7628_v45 = vld [vmem:[%s13852_s0 + $0xc8] sm:$0xff] }
 0x172   :  { %13964 = vst [vmem:[#allocation20_spill] sm:$0xff] %v11686_v37  ;;  %v11694_v30 = vadd.f32 %v8887_v2, %v11376_v46  ;;  %v11697_v54 = vadd.f32 %v8925_v36, %v11154_v53  ;;  %9170 = vmatprep.mubr.msk.f32.mxu1 %vm174_vm1, %v7521_v8  ;;  %9232 = vmatprep.mubr.msk.f32.mxu0 %vm174_vm1, %v7627_v59  ;;  %v7523_v46 = vld [vmem:[%s13852_s0 + $0x212] sm:$0xff] }
 0x173   :  { %v1873_v41 = vpop.f32.mrf.mxu0  ;;  %v2384_v29 = vpop.f32.mrf.mxu1  ;;  %v7629_v53 = vld [vmem:[%s13852_s0 + $0xd8] sm:$0xff]  ;;  %v1238_v36 = vadd.f32 %v11416_v39, %v10694_v5  ;;  %v7525_v5 = vld [vmem:[%s13852_s0 + $0x22a] sm:$0xff]  ;;  %v1253_v39 = vadd.f32 %v11427_v16, %v10701_v19 }
 0x174   :  { %13965 = vst [vmem:[#allocation21_spill] sm:$0xff] %v11694_v30  ;;  %v11716_v62 = vadd.f32 %v1873_v41, %v11396_v49  ;;  %v11719_v8 = vadd.f32 %v2384_v29, %v11172_v32  ;;  %v7630_v32 = vld [vmem:[%s13852_s0 + $0xe0] sm:$0xff]  ;;  %v7526_v19 = vld [vmem:[%s13852_s0 + $0x232] sm:$0xff] }
 0x175   :  { %v8890_v59 = vpop.f32.mrf.mxu0  ;;  %v8928_v2 = vpop.f32.mrf.mxu1  ;;  %9171 = vmatmul.mubr.msk.f32.gmra.mxu1 %vm174_vm1, %v7522_v21  ;;  %9233 = vmatmul.mubr.msk.f32.gmra.mxu0 %vm174_vm1, %v7628_v45 }
 0x176   :  { %v11725_v30 = vadd.f32 %v8890_v59, %v1243_v60  ;;  %v11728_v37 = vadd.f32 %v8928_v2, %v11181_v34  ;;  %9173 = vmatprep.mubr.msk.f32.mxu1 %vm174_vm1, %v7523_v46  ;;  %9235 = vmatprep.mubr.msk.f32.mxu0 %vm174_vm1, %v7629_v53  ;;  %v7631_v34 = vld [vmem:[%s13852_s0 + $0xf0] sm:$0xff]  ;;  %v1248_v46 = vadd.f32 %v11442_v11, %v10714_v52  ;;  %v7527_v52 = vld [vmem:[%s13852_s0 + $0x242] sm:$0xff] }
 0x177   :  { %v1883_v49 = vpop.f32.mrf.mxu0  ;;  %v2394_v44 = vpop.f32.mrf.mxu1  ;;  %v1263_v11 = vadd.f32 %v11453_v42, %v10721_v26  ;;  %v7528_v26 = vld [vmem:[%s13852_s0 + $0x24a] sm:$0xff] }
 0x178   :  { %v11746_v21 = vadd.f32 %v1883_v49, %v1238_v36  ;;  %v11749_v45 = vadd.f32 %v2394_v44, %v11201_v12  ;;  %v7632_v12 = vld [vmem:[%s13852_s0 + $0xf8] sm:$0xff] }
 0x179   :  { %v8893_v41 = vpop.f32.mrf.mxu0  ;;  %v8931_v29 = vpop.f32.mrf.mxu1  ;;  %9174 = vmatmul.mubr.msk.f32.gmra.mxu1 %vm174_vm1, %v7524_v47  ;;  %9236 = vmatmul.mubr.msk.f32.gmra.mxu0 %vm174_vm1, %v7630_v32  ;;  %v13966_v49 = vld [vmem:[#allocation25_spill] sm:$0xff] }
 0x17a   :  { %v11755_v53 = vadd.f32 %v8893_v41, %v1253_v39  ;;  %v11758_v60 = vadd.f32 %v8931_v29, %v11209_v27  ;;  %9176 = vmatprep.mubr.msk.f32.mxu1 %vm174_vm1, %v7525_v5  ;;  %9238 = vmatprep.mubr.msk.f32.mxu0 %vm174_vm1, %v7631_v34  ;;  %v7633_v27 = vld [vmem:[%s13852_s0 + $0x108] sm:$0xff]  ;;  %v1258_v44 = vadd.f32 %v11468_v58, %v13966_v49  ;;  %v7529_v58 = vld [vmem:[%s13852_s0 + $0x25a] sm:$0xff] }
 0x17b   :  { %v1893_v16 = vpop.f32.mrf.mxu0  ;;  %v2404_v59 = vpop.f32.mrf.mxu1  ;;  %v13967_v41 = vld [vmem:[#allocation26_spill] sm:$0xff]  ;;  %v13969_v49 = vld [vmem:[#allocation28_spill] sm:$0xff] }
 0x17c   :  { %v11776_v2 = vadd.f32 %v1893_v16, %v1248_v46  ;;  %v11779_v36 = vadd.f32 %v2404_v59, %v11229_v35  ;;  %v7634_v35 = vld [vmem:[%s13852_s0 + $0x110] sm:$0xff]  ;;  %v1273_v29 = vadd.f32 %v11479_v23, %v13967_v41  ;;  %v13968_v59 = vld [vmem:[#allocation27_spill] sm:$0xff] }
 0x17d   :  { %v8896_v47 = vpop.f32.mrf.mxu0  ;;  %v8934_v32 = vpop.f32.mrf.mxu1  ;;  %9177 = vmatmul.mubr.msk.f32.gmra.mxu1 %vm174_vm1, %v7526_v19  ;;  %9239 = vmatmul.mubr.msk.f32.gmra.mxu0 %vm174_vm1, %v7632_v12  ;;  %v7636_v23 = vld [vmem:[%s13852_s0 + $0x128] sm:$0xff] }
 0x17e   :  { %v11785_v5 = vadd.f32 %v8896_v47, %v1263_v11  ;;  %v11788_v34 = vadd.f32 %v8934_v32, %v11237_v31  ;;  %9179 = vmatprep.mubr.msk.f32.mxu1 %vm174_vm1, %v7527_v52  ;;  %9241 = vmatprep.mubr.msk.f32.mxu0 %vm174_vm1, %v7633_v27  ;;  %v7635_v31 = vld [vmem:[%s13852_s0 + $0x120] sm:$0xff]  ;;  %v1268_v52 = vadd.f32 %v11494_v28, %v13968_v59  ;;  %v7531_v28 = vld [vmem:[%s13852_s0 + $0x272] sm:$0xff] }
 0x17f   :  { %v1903_v42 = vpop.f32.mrf.mxu0  ;;  %v2414_v39 = vpop.f32.mrf.mxu1  ;;  %v13971_v59 = vld [vmem:[#allocation30_spill] sm:$0xff] }
 0x180   :  { %v11806_v46 = vadd.f32 %v1903_v42, %v1258_v44  ;;  %v11809_v19 = vadd.f32 %v2414_v39, %v11259_v4  ;;  %v7530_v4 = vld [vmem:[%s13852_s0 + $0x262] sm:$0xff]  ;;  %v1283_v44 = vadd.f32 %v11505_v1, %v13969_v49 }
 0x181   :  { %v8899_v12 = vpop.f32.mrf.mxu0  ;;  %v8937_v16 = vpop.f32.mrf.mxu1  ;;  %9180 = vmatmul.mubr.msk.f32.gmra.mxu1 %vm174_vm1, %v7528_v26  ;;  %9242 = vmatmul.mubr.msk.f32.gmra.mxu0 %vm174_vm1, %v7634_v35  ;;  %v7638_v1 = vld [vmem:[%s13852_s0 + $0x140] sm:$0xff] }
 0x182   :  { %v11815_v27 = vadd.f32 %v8899_v12, %v1273_v29  ;;  %v11818_v11 = vadd.f32 %v8937_v16, %v11267_v18  ;;  %9182 = vmatprep.mubr.msk.f32.mxu1 %vm174_vm1, %v7529_v58  ;;  %9244 = vmatprep.mubr.msk.f32.mxu0 %vm174_vm1, %v7635_v31  ;;  %v7637_v18 = vld [vmem:[%s13852_s0 + $0x138] sm:$0xff] }
 0x183   :  { %v1913_v47 = vpop.f32.mrf.mxu0  ;;  %v2424_v32 = vpop.f32.mrf.mxu1  ;;  %v13970_v58 = vld [vmem:[#allocation29_spill] sm:$0xff] }
 0x184   :  { %v11836_v26 = vadd.f32 %v1913_v47, %v1268_v52  ;;  %v11839_v35 = vadd.f32 %v2424_v32, %v11287_v9  ;;  %v1278_v31 = vadd.f32 %v11520_v61, %v13970_v58  ;;  %v7532_v9 = vld [vmem:[%s13852_s0 + $0x27a] sm:$0xff]  ;;  %v7533_v61 = vld [vmem:[%s13852_s0 + $0x28a] sm:$0xff]  ;;  %v1293_v52 = vadd.f32 %v11531_v7, %v13971_v59 }
 0x185   :  { %v8902_v42 = vpop.f32.mrf.mxu0  ;;  %v8940_v39 = vpop.f32.mrf.mxu1  ;;  %9183 = vmatmul.mubr.msk.f32.gmra.mxu1 %vm174_vm1, %v7530_v4  ;;  %9245 = vmatmul.mubr.msk.f32.gmra.mxu0 %vm174_vm1, %v7636_v23  ;;  %v7640_v7 = vld [vmem:[%s13852_s0 + $0x158] sm:$0xff]  ;;  %v13973_v58 = vld [vmem:[#allocation32_spill] sm:$0xff] }
 0x186   :  { %v11845_v41 = vadd.f32 %v8902_v42, %v1283_v44  ;;  %v11848_v29 = vadd.f32 %v8940_v39, %v11295_v40  ;;  %9185 = vmatprep.mubr.msk.f32.mxu1 %vm174_vm1, %v7531_v28  ;;  %9247 = vmatprep.mubr.msk.f32.mxu0 %vm174_vm1, %v7637_v18  ;;  %v7639_v40 = vld [vmem:[%s13852_s0 + $0x150] sm:$0xff]  ;;  %v13972_v28 = vld [vmem:[#allocation31_spill] sm:$0xff] }
 0x187   :  { %v1923_v12 = vpop.f32.mrf.mxu0  ;;  %v2434_v16 = vpop.f32.mrf.mxu1  ;;  %v1288_v18 = vadd.f32 %v11546_v10, %v13972_v28  ;;  %v7535_v10 = vld [vmem:[%s13852_s0 + $0x2a2] sm:$0xff]  ;;  %v13975_v28 = vld [vmem:[#allocation34_spill] sm:$0xff] }
 0x188   :  { %v11866_v4 = vadd.f32 %v1923_v12, %v1278_v31  ;;  %v11869_v23 = vadd.f32 %v2434_v16, %v11315_v38  ;;  %v7534_v38 = vld [vmem:[%s13852_s0 + $0x292] sm:$0xff]  ;;  %v1303_v31 = vadd.f32 %v11557_v15, %v13973_v58 }
 0x189   :  { %v8905_v47 = vpop.f32.mrf.mxu0  ;;  %v8943_v32 = vpop.f32.mrf.mxu1  ;;  %9186 = vmatmul.mubr.msk.f32.gmra.mxu1 %vm174_vm1, %v7532_v9  ;;  %9248 = vmatmul.mubr.msk.f32.gmra.mxu0 %vm174_vm1, %v7638_v1  ;;  %v7642_v15 = vld [vmem:[%s13852_s0 + $0x170] sm:$0xff] }
 0x18a   :  { %v11875_v49 = vadd.f32 %v8905_v47, %v1293_v52  ;;  %v11878_v44 = vadd.f32 %v8943_v32, %v11323_v57  ;;  %9188 = vmatprep.mubr.msk.f32.mxu1 %vm174_vm1, %v7533_v61  ;;  %9250 = vmatprep.mubr.msk.f32.mxu0 %vm174_vm1, %v7639_v40  ;;  %v7641_v57 = vld [vmem:[%s13852_s0 + $0x168] sm:$0xff]  ;;  %v13974_v61 = vld [vmem:[#allocation33_spill] sm:$0xff] }
 0x18b   :  { %v1933_v42 = vpop.f32.mrf.mxu0  ;;  %v2444_v39 = vpop.f32.mrf.mxu1  ;;  %v1298_v40 = vadd.f32 %v11573_v48, %v13974_v61  ;;  %v7537_v48 = vld [vmem:[%s13852_s0 + $0x2ba] sm:$0xff]  ;;  %v13977_v61 = vld [vmem:[#allocation36_spill] sm:$0xff] }
 0x18c   :  { %v11896_v9 = vadd.f32 %v1933_v42, %v1288_v18  ;;  %v11899_v1 = vadd.f32 %v2444_v39, %v11343_v17  ;;  %v7536_v17 = vld [vmem:[%s13852_s0 + $0x2aa] sm:$0xff]  ;;  %v1313_v18 = vadd.f32 %v11585_v25, %v13975_v28 }
 0x18d   :  { %v8908_v12 = vpop.f32.mrf.mxu0  ;;  %v8946_v16 = vpop.f32.mrf.mxu1  ;;  %9189 = vmatmul.mubr.msk.f32.gmra.mxu1 %vm174_vm1, %v7534_v38  ;;  %9251 = vmatmul.mubr.msk.f32.gmra.mxu0 %vm174_vm1, %v7640_v7  ;;  %v7644_v25 = vld [vmem:[%s13852_s0 + $0x188] sm:$0xff] }
 0x18e   :  { %v11905_v59 = vadd.f32 %v8908_v12, %v1303_v31  ;;  %v11908_v52 = vadd.f32 %v8946_v16, %v11351_v63  ;;  %9191 = vmatprep.mubr.msk.f32.mxu1 %vm174_vm1, %v7535_v10  ;;  %9253 = vmatprep.mubr.msk.f32.mxu0 %vm174_vm1, %v7641_v57  ;;  %v7643_v63 = vld [vmem:[%s13852_s0 + $0x180] sm:$0xff] }
 0x18f   :  { %v1943_v47 = vpop.f32.mrf.mxu0  ;;  %v2454_v32 = vpop.f32.mrf.mxu1  ;;  %v13976_v10 = vld [vmem:[#allocation35_spill] sm:$0xff] }
 0x190   :  { %v11926_v38 = vadd.f32 %v1943_v47, %v1298_v40  ;;  %v11929_v7 = vadd.f32 %v2454_v32, %v11371_v3  ;;  %v1308_v57 = vadd.f32 %v11600_v22, %v13976_v10  ;;  %v7538_v3 = vld [vmem:[%s13852_s0 + $0x2c2] sm:$0xff]  ;;  %v7539_v22 = vld [vmem:[%s13852_s0 + $0x2d2] sm:$0xff]  ;;  %v1323_v40 = vadd.f32 %v11611_v6, %v13977_v61 }
 0x191   :  { %v8911_v42 = vpop.f32.mrf.mxu0  ;;  %v8949_v39 = vpop.f32.mrf.mxu1  ;;  %9192 = vmatmul.mubr.msk.f32.gmra.mxu1 %vm174_vm1, %v7536_v17  ;;  %9254 = vmatmul.mubr.msk.f32.gmra.mxu0 %vm174_vm1, %v7642_v15  ;;  %v7646_v6 = vld [vmem:[%s13852_s0 + $0x1a0] sm:$0xff] }
 0x192   :  { %v11935_v58 = vadd.f32 %v8911_v42, %v1313_v18  ;;  %v11938_v31 = vadd.f32 %v8949_v39, %v11379_v0  ;;  %9194 = vmatprep.mubr.msk.f32.mxu1 %vm174_vm1, %v7537_v48  ;;  %9256 = vmatprep.mubr.msk.f32.mxu0 %vm174_vm1, %v7643_v63  ;;  %v7645_v0 = vld [vmem:[%s13852_s0 + $0x198] sm:$0xff] }
 0x193   :  { %v1953_v12 = vpop.f32.mrf.mxu0  ;;  %v2464_v16 = vpop.f32.mrf.mxu1  ;;  %v13978_v48 = vld [vmem:[#allocation37_spill] sm:$0xff]  ;;  %v13979_v10 = vld [vmem:[#allocation38_spill] sm:$0xff] }
 0x194   :  { %v11956_v17 = vadd.f32 %v1953_v12, %v1308_v57  ;;  %v11959_v15 = vadd.f32 %v2464_v16, %v11399_v14  ;;  %v1318_v63 = vadd.f32 %v11626_v43, %v13978_v48  ;;  %v7540_v14 = vld [vmem:[%s13852_s0 + $0x2da] sm:$0xff]  ;;  %v7541_v43 = vld [vmem:[%s13852_s0 + $0x2ea] sm:$0xff]  ;;  %v1333_v57 = vadd.f32 %v11637_v20, %v13979_v10 }
 0x195   :  { %v8914_v47 = vpop.f32.mrf.mxu0  ;;  %v8952_v32 = vpop.f32.mrf.mxu1  ;;  %9195 = vmatmul.mubr.msk.f32.gmra.mxu1 %vm174_vm1, %v7538_v3  ;;  %9257 = vmatmul.mubr.msk.f32.gmra.mxu0 %vm174_vm1, %v7644_v25  ;;  %v7648_v20 = vld [vmem:[%s13852_s0 + $0x1e8] sm:$0xff] }
 0x196   :  { %v11965_v28 = vadd.f32 %v8914_v47, %v1323_v40  ;;  %v11968_v18 = vadd.f32 %v8952_v32, %v11406_v13  ;;  %9197 = vmatprep.mubr.msk.f32.mxu1 %vm174_vm1, %v7539_v22  ;;  %9259 = vmatprep.mubr.msk.f32.mxu0 %vm174_vm1, %v7645_v0  ;;  %v7647_v13 = vld [vmem:[%s13852_s0 + $0x1e0] sm:$0xff]  ;;  %v7544_v10 = vld [vmem:[%s13852_s0 + $0x30a] sm:$0xff] }
 0x197   :  { %v1963_v42 = vpop.f32.mrf.mxu0  ;;  %v2474_v39 = vpop.f32.mrf.mxu1  ;;  %v13980_v22 = vld [vmem:[#allocation39_spill] sm:$0xff] }
 0x198   :  { %v11986_v3 = vadd.f32 %v1963_v42, %v1318_v63  ;;  %v11989_v25 = vadd.f32 %v2474_v39, %v11425_v55  ;;  %v1328_v0 = vadd.f32 %v11652_v50, %v13980_v22  ;;  %v7542_v55 = vld [vmem:[%s13852_s0 + $0x2f2] sm:$0xff]  ;;  %v7543_v50 = vld [vmem:[%s13852_s0 + $0x302] sm:$0xff]  ;;  %v7545_v22 = vld [vmem:[%s13852_s0 + $0x31a] sm:$0xff] }
 0x199   :  { %v8917_v12 = vpop.f32.mrf.mxu0  ;;  %v8955_v16 = vpop.f32.mrf.mxu1  ;;  %9198 = vmatmul.mubr.msk.f32.gmra.mxu1 %vm174_vm1, %v7540_v14  ;;  %9260 = vmatmul.mubr.msk.f32.gmra.mxu0 %vm174_vm1, %v7646_v6  ;;  %v13981_v63 = vld [vmem:[#allocation6_spill] sm:$0xff]  ;;  %v13982_v39 = vld [vmem:[#allocation3_spill] sm:$0xff] }
 0x19a   :  { %v11995_v61 = vadd.f32 %v8917_v12, %v1333_v57  ;;  %v11998_v40 = vadd.f32 %v8955_v16, %v11432_v24  ;;  %9200 = vmatprep.mubr.msk.f32.mxu1 %vm174_vm1, %v7541_v43  ;;  %9262 = vmatprep.mubr.msk.f32.mxu0 %vm174_vm1, %v7647_v13  ;;  %v7649_v24 = vld [vmem:[%s13852_s0 + $0x1f8] sm:$0xff]  ;;  %v7650_v57 = vld [vmem:[%s13852_s0 + $0x200] sm:$0xff] }
 0x19b   :  { %v1973_v47 = vpop.f32.mrf.mxu0  ;;  %v2484_v32 = vpop.f32.mrf.mxu1 }
 0x19c   :  { %v12014_v48 = vadd.f32 %v1973_v47, %v1328_v0  ;;  %v12017_v14 = vadd.f32 %v2484_v32, %v13981_v63  ;;  %v13983_v0 = vld [vmem:[#allocation7_spill] sm:$0xff] }
 0x19d   :  { %v8958_v6 = vpop.f32.mrf.mxu1  ;;  %v9020_v42 = vpop.f32.mrf.mxu0  ;;  %9201 = vmatmul.mubr.msk.f32.gmra.mxu1 %vm174_vm1, %v7542_v55  ;;  %9263 = vmatmul.mubr.msk.f32.gmra.mxu0 %vm174_vm1, %v7648_v20 }
 0x19e   :  { %v12022_v43 = vadd.f32 %v8958_v6, %v13982_v39  ;;  %v12025_v13 = vadd.f32 %v9020_v42, %v11669_v33  ;;  %9203 = vmatprep.mubr.msk.f32.mxu1 %vm174_vm1, %v7543_v50  ;;  %9265 = vmatprep.mubr.msk.f32.mxu0 %vm174_vm1, %v7649_v24  ;;  %v7651_v33 = vld [vmem:[%s13852_s0 + $0x210] sm:$0xff]  ;;  %v7652_v6 = vld [vmem:[%s13852_s0 + $0x218] sm:$0xff] }
 0x19f   :  { %v2494_v12 = vpop.f32.mrf.mxu1  ;;  %v3084_v16 = vpop.f32.mrf.mxu0  ;;  %v13984_v50 = vld [vmem:[#allocation4_spill] sm:$0xff] }
 0x1a0   :  { %v12042_v55 = vadd.f32 %v2494_v12, %v13983_v0  ;;  %v12045_v20 = vadd.f32 %v3084_v16, %v11689_v56  ;;  %v7546_v56 = vld [vmem:[%s13852_s0 + $0x322] sm:$0xff]  ;;  %v13986_v0 = vld [vmem:[#allocation5_spill] sm:$0xff] }
 0x1a1   :  { %v8961_v47 = vpop.f32.mrf.mxu1  ;;  %v9023_v32 = vpop.f32.mrf.mxu0  ;;  %9204 = vmatmul.mubr.msk.f32.gmra.mxu1 %vm174_vm1, %v7544_v10  ;;  %9266 = vmatmul.mubr.msk.f32.gmra.mxu0 %vm174_vm1, %v7650_v57  ;;  %v7547_v10 = vld [vmem:[%s13852_s0 + $0x332] sm:$0xff]  ;;  %v13985_v57 = vld [vmem:[#allocation8_spill] sm:$0xff] }
 0x1a2   :  { %v12050_v24 = vadd.f32 %v8961_v47, %v13984_v50  ;;  %v12053_v63 = vadd.f32 %v9023_v32, %v11697_v54  ;;  %9206 = vmatprep.mubr.msk.f32.mxu1 %vm174_vm1, %v7545_v22  ;;  %9268 = vmatprep.mubr.msk.f32.mxu0 %vm174_vm1, %v7651_v33  ;;  %v7653_v54 = vld [vmem:[%s13852_s0 + $0x228] sm:$0xff]  ;;  %v7654_v50 = vld [vmem:[%s13852_s0 + $0x230] sm:$0xff] }
 0x1a3   :  { %v2504_v42 = vpop.f32.mrf.mxu1  ;;  %v3094_v39 = vpop.f32.mrf.mxu0 }
 0x1a4   :  { %v12070_v12 = vadd.f32 %v2504_v42, %v13985_v57  ;;  %v12073_v16 = vadd.f32 %v3094_v39, %v11719_v8  ;;  %v7548_v8 = vld [vmem:[%s13852_s0 + $0x33a] sm:$0xff] }
 0x1a5   :  { %v8964_v22 = vpop.f32.mrf.mxu1  ;;  %v9026_v33 = vpop.f32.mrf.mxu0  ;;  %9207 = vmatmul.mubr.msk.f32.gmra.mxu1 %vm174_vm1, %v7546_v56  ;;  %9269 = vmatmul.mubr.msk.f32.gmra.mxu0 %vm174_vm1, %v7652_v6  ;;  %v7655_v42 = vld [vmem:[%s13852_s0 + $0x240] sm:$0xff] }
 0x1a6   :  { %v12078_v47 = vadd.f32 %v8964_v22, %v13986_v0  ;;  %v12081_v32 = vadd.f32 %v9026_v33, %v11728_v37  ;;  %9209 = vmatprep.mubr.msk.f32.mxu1 %vm174_vm1, %v7547_v10  ;;  %9271 = vmatprep.mubr.msk.f32.mxu0 %vm174_vm1, %v7653_v54  ;;  %v7745_v37 = vld [vmem:[%s13852_s0 + $0x31] sm:$0xff] }
 0x1a7   :  { %v2514_v56 = vpop.f32.mrf.mxu1  ;;  %v3104_v6 = vpop.f32.mrf.mxu0  ;;  %v13988_v22 = vld [vmem:[#allocation9_spill] sm:$0xff] }
 0x1a8   :  { %v12098_v39 = vadd.f32 %v2514_v56, %v11529_v51  ;;  %v12101_v10 = vadd.f32 %v3104_v6, %v11749_v45  ;;  %v7656_v51 = vld [vmem:[%s13852_s0 + $0x248] sm:$0xff]  ;;  %v7746_v45 = vld [vmem:[%s13852_s0 + $0x39] sm:$0xff] }
 0x1a9   :  { %v8967_v54 = vpop.f32.mrf.mxu1  ;;  %v9029_v57 = vpop.f32.mrf.mxu0  ;;  %9210 = vmatmul.mubr.msk.f32.gmra.mxu1 %vm174_vm1, %v7548_v8  ;;  %9272 = vmatmul.mubr.msk.f32.gmra.mxu0 %vm174_vm1, %v7654_v50  ;;  %v7657_v56 = vld [vmem:[%s13852_s0 + $0x258] sm:$0xff] }
 0x1aa   :  { %13987 = vst [vmem:[#allocation22_spill] sm:$0xff] %v12101_v10  ;;  %v12106_v33 = vadd.f32 %v8967_v54, %v13988_v22  ;;  %v12109_v0 = vadd.f32 %v9029_v57, %v11758_v60  ;;  %9274 = vmatprep.mubr.msk.f32.mxu0 %vm174_vm1, %v7655_v42  ;;  %9312 = vmatprep.mubr.msk.f32.mxu1 %vm174_vm1, %v7745_v37  ;;  %v7747_v60 = vld [vmem:[%s13852_s0 + $0x49] sm:$0xff]  ;;  %v13990_v6 = vld [vmem:[#allocation10_spill] sm:$0xff]  ;;  %v13992_v22 = vld [vmem:[#allocation11_spill] sm:$0xff] }
 0x1ab   :  { %v2524_v8 = vpop.f32.mrf.mxu1  ;;  %v3114_v50 = vpop.f32.mrf.mxu0 }
 0x1ac   :  { %13989 = vst [vmem:[#allocation23_spill] sm:$0xff] %v12109_v0  ;;  %v12126_v42 = vadd.f32 %v2524_v8, %v13990_v6  ;;  %v12129_v37 = vadd.f32 %v3114_v50, %v11779_v36  ;;  %v7658_v36 = vld [vmem:[%s13852_s0 + $0x260] sm:$0xff]  ;;  %v7659_v50 = vld [vmem:[%s13852_s0 + $0x270] sm:$0xff] }
 0x1ad   :  { %v8970_v54 = vpop.f32.mrf.mxu1  ;;  %v9032_v57 = vpop.f32.mrf.mxu0  ;;  %9275 = vmatmul.mubr.msk.f32.gmra.mxu0 %vm174_vm1, %v7656_v51  ;;  %9313 = vmatmul.mubr.msk.f32.vlgmr.msra.gmra.mxu1 %vm174_vm1, %v7746_v45  ;;  %v7748_v51 = vld [vmem:[%s13852_s0 + $0x51] sm:$0xff] }
 0x1ae   :  { %13991 = vst [vmem:[#allocation24_spill] sm:$0xff] %v12129_v37  ;;  %v12134_v0 = vadd.f32 %v8970_v54, %v13992_v22  ;;  %v12137_v10 = vadd.f32 %v9032_v57, %v11788_v34  ;;  %9277 = vmatprep.mubr.msk.f32.mxu0 %vm174_vm1, %v7657_v56  ;;  %9315 = vmatprep.mubr.msk.f32.mxu1 %vm174_vm1, %v7747_v60  ;;  %v7749_v34 = vld [vmem:[%s13852_s0 + $0x61] sm:$0xff]  ;;  %v13994_v56 = vld [vmem:[#allocation12_spill] sm:$0xff]  ;;  %v13996_v22 = vld [vmem:[#allocation13_spill] sm:$0xff] }
 0x1af   :  { %v2534_v8 = vpop.f32.mrf.mxu1  ;;  %v3124_v45 = vpop.f32.mrf.mxu0 }
 0x1b0   :  { %13993 = vst [vmem:[#allocation25_spill] sm:$0xff] %v12137_v10  ;;  %v12154_v60 = vadd.f32 %v2534_v8, %v13994_v56  ;;  %v12157_v6 = vadd.f32 %v3124_v45, %v11809_v19  ;;  %v7660_v19 = vld [vmem:[%s13852_s0 + $0x278] sm:$0xff]  ;;  %v7661_v45 = vld [vmem:[%s13852_s0 + $0x288] sm:$0xff] }
 0x1b1   :  { %v8973_v54 = vpop.f32.mrf.mxu1  ;;  %v9035_v57 = vpop.f32.mrf.mxu0  ;;  %9278 = vmatmul.mubr.msk.f32.gmra.mxu0 %vm174_vm1, %v7658_v36  ;;  %9316 = vmatmul.mubr.msk.f32.gmra.mxu1 %vm174_vm1, %v7748_v51  ;;  %v7750_v36 = vld [vmem:[%s13852_s0 + $0x69] sm:$0xff] }
 0x1b2   :  { %13995 = vst [vmem:[#allocation26_spill] sm:$0xff] %v12157_v6  ;;  %v12162_v10 = vadd.f32 %v8973_v54, %v13996_v22  ;;  %v12165_v37 = vadd.f32 %v9035_v57, %v11818_v11  ;;  %9280 = vmatprep.mubr.msk.f32.mxu0 %vm174_vm1, %v7659_v50  ;;  %9318 = vmatprep.mubr.msk.f32.mxu1 %vm174_vm1, %v7749_v34  ;;  %v7751_v11 = vld [vmem:[%s13852_s0 + $0x79] sm:$0xff]  ;;  %v14000_v22 = vld [vmem:[#allocation15_spill] sm:$0xff] }
 0x1b3   :  { %v2544_v8 = vpop.f32.mrf.mxu1  ;;  %v3134_v51 = vpop.f32.mrf.mxu0  ;;  %v13998_v50 = vld [vmem:[#allocation14_spill] sm:$0xff] }
 0x1b4   :  { %13997 = vst [vmem:[#allocation27_spill] sm:$0xff] %v12165_v37  ;;  %v12182_v34 = vadd.f32 %v2544_v8, %v13998_v50  ;;  %v12185_v56 = vadd.f32 %v3134_v51, %v11839_v35  ;;  %v7662_v35 = vld [vmem:[%s13852_s0 + $0x290] sm:$0xff]  ;;  %v7663_v51 = vld [vmem:[%s13852_s0 + $0x2a0] sm:$0xff] }
 0x1b5   :  { %v8976_v54 = vpop.f32.mrf.mxu1  ;;  %v9038_v57 = vpop.f32.mrf.mxu0  ;;  %9281 = vmatmul.mubr.msk.f32.gmra.mxu0 %vm174_vm1, %v7660_v19  ;;  %9319 = vmatmul.mubr.msk.f32.gmra.mxu1 %vm174_vm1, %v7750_v36  ;;  %v7752_v19 = vld [vmem:[%s13852_s0 + $0x81] sm:$0xff] }
 0x1b6   :  { %13999 = vst [vmem:[#allocation28_spill] sm:$0xff] %v12185_v56  ;;  %v12190_v37 = vadd.f32 %v8976_v54, %v14000_v22  ;;  %v12193_v6 = vadd.f32 %v9038_v57, %v11848_v29  ;;  %9283 = vmatprep.mubr.msk.f32.mxu0 %vm174_vm1, %v7661_v45  ;;  %9321 = vmatprep.mubr.msk.f32.mxu1 %vm174_vm1, %v7751_v11  ;;  %v7753_v29 = vld [vmem:[%s13852_s0 + $0x91] sm:$0xff]  ;;  %v14002_v45 = vld [vmem:[#allocation16_spill] sm:$0xff] }
 0x1b7   :  { %v2554_v8 = vpop.f32.mrf.mxu1  ;;  %v3144_v36 = vpop.f32.mrf.mxu0  ;;  %v14004_v22 = vld [vmem:[#allocation17_spill] sm:$0xff] }
 0x1b8   :  { %14001 = vst [vmem:[#allocation29_spill] sm:$0xff] %v12193_v6  ;;  %v12210_v11 = vadd.f32 %v2554_v8, %v14002_v45  ;;  %v12213_v50 = vadd.f32 %v3144_v36, %v11869_v23  ;;  %v7664_v23 = vld [vmem:[%s13852_s0 + $0x2a8] sm:$0xff]  ;;  %v7665_v36 = vld [vmem:[%s13852_s0 + $0x2b8] sm:$0xff] }
 0x1b9   :  { %v8979_v54 = vpop.f32.mrf.mxu1  ;;  %v9041_v57 = vpop.f32.mrf.mxu0  ;;  %9284 = vmatmul.mubr.msk.f32.gmra.mxu0 %vm174_vm1, %v7662_v35  ;;  %9322 = vmatmul.mubr.msk.f32.gmra.mxu1 %vm174_vm1, %v7752_v19  ;;  %v7754_v35 = vld [vmem:[%s13852_s0 + $0x99] sm:$0xff] }
 0x1ba   :  { %14003 = vst [vmem:[#allocation30_spill] sm:$0xff] %v12213_v50  ;;  %v12218_v6 = vadd.f32 %v8979_v54, %v14004_v22  ;;  %v12221_v56 = vadd.f32 %v9041_v57, %v11878_v44  ;;  %9286 = vmatprep.mubr.msk.f32.mxu0 %vm174_vm1, %v7663_v51  ;;  %9324 = vmatprep.mubr.msk.f32.mxu1 %vm174_vm1, %v7753_v29  ;;  %v7755_v44 = vld [vmem:[%s13852_s0 + $0xa9] sm:$0xff]  ;;  %v14006_v51 = vld [vmem:[#allocation18_spill] sm:$0xff]  ;;  %v14008_v22 = vld [vmem:[#allocation19_spill] sm:$0xff] }
 0x1bb   :  { %v2564_v8 = vpop.f32.mrf.mxu1  ;;  %v3154_v19 = vpop.f32.mrf.mxu0 }
 0x1bc   :  { %14005 = vst [vmem:[#allocation31_spill] sm:$0xff] %v12221_v56  ;;  %v12238_v29 = vadd.f32 %v2564_v8, %v14006_v51  ;;  %v12241_v45 = vadd.f32 %v3154_v19, %v11899_v1  ;;  %v7666_v1 = vld [vmem:[%s13852_s0 + $0x2c0] sm:$0xff]  ;;  %v7667_v19 = vld [vmem:[%s13852_s0 + $0x2d0] sm:$0xff] }
 0x1bd   :  { %v8982_v54 = vpop.f32.mrf.mxu1  ;;  %v9044_v57 = vpop.f32.mrf.mxu0  ;;  %9287 = vmatmul.mubr.msk.f32.gmra.mxu0 %vm174_vm1, %v7664_v23  ;;  %9325 = vmatmul.mubr.msk.f32.gmra.mxu1 %vm174_vm1, %v7754_v35  ;;  %v7756_v23 = vld [vmem:[%s13852_s0 + $0xb1] sm:$0xff] }
 0x1be   :  { %14007 = vst [vmem:[#allocation32_spill] sm:$0xff] %v12241_v45  ;;  %v12246_v56 = vadd.f32 %v8982_v54, %v14008_v22  ;;  %v12249_v50 = vadd.f32 %v9044_v57, %v11908_v52  ;;  %9289 = vmatprep.mubr.msk.f32.mxu0 %vm174_vm1, %v7665_v36  ;;  %9327 = vmatprep.mubr.msk.f32.mxu1 %vm174_vm1, %v7755_v44  ;;  %v7757_v52 = vld [vmem:[%s13852_s0 + $0xc1] sm:$0xff]  ;;  %v14010_v36 = vld [vmem:[#allocation20_spill] sm:$0xff]  ;;  %v14011_v22 = vld [vmem:[#allocation21_spill] sm:$0xff] }
 0x1bf   :  { %v2574_v8 = vpop.f32.mrf.mxu1  ;;  %v3164_v35 = vpop.f32.mrf.mxu0 }
 0x1c0   :  { %14009 = vst [vmem:[#allocation33_spill] sm:$0xff] %v12249_v50  ;;  %v12266_v44 = vadd.f32 %v2574_v8, %v14010_v36  ;;  %v12269_v51 = vadd.f32 %v3164_v35, %v11929_v7  ;;  %v7668_v7 = vld [vmem:[%s13852_s0 + $0x2d8] sm:$0xff]  ;;  %v7669_v35 = vld [vmem:[%s13852_s0 + $0x2e8] sm:$0xff] }
 0x1c1   :  { %v8985_v54 = vpop.f32.mrf.mxu1  ;;  %v9047_v57 = vpop.f32.mrf.mxu0  ;;  %9290 = vmatmul.mubr.msk.f32.gmra.mxu0 %vm174_vm1, %v7666_v1  ;;  %9328 = vmatmul.mubr.msk.f32.gmra.mxu1 %vm174_vm1, %v7756_v23  ;;  %v7758_v1 = vld [vmem:[%s13852_s0 + $0xc9] sm:$0xff] }
 0x1c2   :  { %v12274_v50 = vadd.f32 %v8985_v54, %v14011_v22  ;;  %v12277_v45 = vadd.f32 %v9047_v57, %v11938_v31  ;;  %9292 = vmatprep.mubr.msk.f32.mxu0 %vm174_vm1, %v7667_v19  ;;  %9330 = vmatprep.mubr.msk.f32.mxu1 %vm174_vm1, %v7757_v52  ;;  %v7759_v31 = vld [vmem:[%s13852_s0 + $0xd9] sm:$0xff] }
 0x1c3   :  { %v2584_v8 = vpop.f32.mrf.mxu1  ;;  %v3174_v23 = vpop.f32.mrf.mxu0 }
 0x1c4   :  { %v12294_v19 = vadd.f32 %v2584_v8, %v11716_v62  ;;  %v12297_v52 = vadd.f32 %v3174_v23, %v11959_v15  ;;  %v7670_v62 = vld [vmem:[%s13852_s0 + $0x2f0] sm:$0xff]  ;;  %v7760_v15 = vld [vmem:[%s13852_s0 + $0xe1] sm:$0xff] }
 0x1c5   :  { %v8988_v36 = vpop.f32.mrf.mxu1  ;;  %v9050_v54 = vpop.f32.mrf.mxu0  ;;  %9293 = vmatmul.mubr.msk.f32.gmra.mxu0 %vm174_vm1, %v7668_v7  ;;  %9331 = vmatmul.mubr.msk.f32.gmra.mxu1 %vm174_vm1, %v7758_v1 }
 0x1c6   :  { %v12302_v57 = vadd.f32 %v8988_v36, %v11725_v30  ;;  %v12305_v22 = vadd.f32 %v9050_v54, %v11968_v18  ;;  %9295 = vmatprep.mubr.msk.f32.mxu0 %vm174_vm1, %v7669_v35  ;;  %9333 = vmatprep.mubr.msk.f32.mxu1 %vm174_vm1, %v7759_v31  ;;  %v7671_v30 = vld [vmem:[%s13852_s0 + $0x300] sm:$0xff]  ;;  %v7761_v18 = vld [vmem:[%s13852_s0 + $0xf1] sm:$0xff] }
 0x1c7   :  { %v2594_v7 = vpop.f32.mrf.mxu1  ;;  %v3184_v1 = vpop.f32.mrf.mxu0 }
 0x1c8   :  { %v12322_v8 = vadd.f32 %v2594_v7, %v11746_v21  ;;  %v12325_v23 = vadd.f32 %v3184_v1, %v11989_v25  ;;  %v7672_v21 = vld [vmem:[%s13852_s0 + $0x308] sm:$0xff]  ;;  %v7762_v25 = vld [vmem:[%s13852_s0 + $0xf9] sm:$0xff] }
 0x1c9   :  { %v8991_v35 = vpop.f32.mrf.mxu1  ;;  %v9053_v31 = vpop.f32.mrf.mxu0  ;;  %9296 = vmatmul.mubr.msk.f32.gmra.mxu0 %vm174_vm1, %v7670_v62  ;;  %9334 = vmatmul.mubr.msk.f32.gmra.mxu1 %vm174_vm1, %v7760_v15 }
 0x1ca   :  { %v12330_v36 = vadd.f32 %v8991_v35, %v11755_v53  ;;  %v12333_v54 = vadd.f32 %v9053_v31, %v11998_v40  ;;  %9298 = vmatprep.mubr.msk.f32.mxu0 %vm174_vm1, %v7671_v30  ;;  %9336 = vmatprep.mubr.msk.f32.mxu1 %vm174_vm1, %v7761_v18  ;;  %v7673_v53 = vld [vmem:[%s13852_s0 + $0x318] sm:$0xff]  ;;  %v7763_v40 = vld [vmem:[%s13852_s0 + $0x109] sm:$0xff] }
 0x1cb   :  { %v2604_v62 = vpop.f32.mrf.mxu1  ;;  %v3194_v15 = vpop.f32.mrf.mxu0 }
 0x1cc   :  { %v12350_v7 = vadd.f32 %v2604_v62, %v11776_v2  ;;  %v12353_v1 = vadd.f32 %v3194_v15, %v12017_v14  ;;  %v7674_v2 = vld [vmem:[%s13852_s0 + $0x320] sm:$0xff]  ;;  %v7764_v14 = vld [vmem:[%s13852_s0 + $0x111] sm:$0xff] }
 0x1cd   :  { %v8994_v30 = vpop.f32.mrf.mxu1  ;;  %v9056_v18 = vpop.f32.mrf.mxu0  ;;  %9299 = vmatmul.mubr.msk.f32.gmra.mxu0 %vm174_vm1, %v7672_v21  ;;  %9337 = vmatmul.mubr.msk.f32.gmra.mxu1 %vm174_vm1, %v7762_v25 }
 0x1ce   :  { %14012 = vst [vmem:[#allocation34_spill] sm:$0xff] %v12353_v1  ;;  %v12358_v35 = vadd.f32 %v8994_v30, %v11785_v5  ;;  %v12361_v31 = vadd.f32 %v9056_v18, %v12022_v43  ;;  %9301 = vmatprep.mubr.msk.f32.mxu0 %vm174_vm1, %v7673_v53  ;;  %9339 = vmatprep.mubr.msk.f32.mxu1 %vm174_vm1, %v7763_v40  ;;  %v7675_v5 = vld [vmem:[%s13852_s0 + $0x330] sm:$0xff]  ;;  %v7765_v43 = vld [vmem:[%s13852_s0 + $0x121] sm:$0xff] }
 0x1cf   :  { %v2614_v21 = vpop.f32.mrf.mxu1  ;;  %v3204_v25 = vpop.f32.mrf.mxu0 }
 0x1d0   :  { %v12378_v62 = vadd.f32 %v2614_v21, %v11806_v46  ;;  %v12381_v15 = vadd.f32 %v3204_v25, %v12042_v55  ;;  %v7676_v46 = vld [vmem:[%s13852_s0 + $0x338] sm:$0xff]  ;;  %v7766_v55 = vld [vmem:[%s13852_s0 + $0x129] sm:$0xff] }
 0x1d1   :  { %v8997_v53 = vpop.f32.mrf.mxu1  ;;  %v9059_v40 = vpop.f32.mrf.mxu0  ;;  %9302 = vmatmul.mubr.msk.f32.gmra.mxu0 %vm174_vm1, %v7674_v2  ;;  %9340 = vmatmul.mubr.msk.f32.gmra.mxu1 %vm174_vm1, %v7764_v14 }
 0x1d2   :  { %14013 = vst [vmem:[#allocation35_spill] sm:$0xff] %v12381_v15  ;;  %v12386_v30 = vadd.f32 %v8997_v53, %v11815_v27  ;;  %v12389_v18 = vadd.f32 %v9059_v40, %v12050_v24  ;;  %9304 = vmatprep.mubr.msk.f32.mxu0 %vm174_vm1, %v7675_v5  ;;  %9342 = vmatprep.mubr.msk.f32.mxu1 %vm174_vm1, %v7765_v43  ;;  %v7677_v27 = vld [vmem:[%s13852_s0 + $0x348] sm:$0xff]  ;;  %v7767_v24 = vld [vmem:[%s13852_s0 + $0x139] sm:$0xff] }
 0x1d3   :  { %v2624_v2 = vpop.f32.mrf.mxu1  ;;  %v3214_v14 = vpop.f32.mrf.mxu0  ;;  %v14017_v15 = vld [vmem:[#allocation23_spill] sm:$0xff] }
 0x1d4   :  { %v12406_v21 = vadd.f32 %v2624_v2, %v11836_v26  ;;  %v12409_v25 = vadd.f32 %v3214_v14, %v12070_v12  ;;  %v7678_v26 = vld [vmem:[%s13852_s0 + $0x350] sm:$0xff]  ;;  %v7768_v12 = vld [vmem:[%s13852_s0 + $0x141] sm:$0xff] }
 0x1d5   :  { %v9000_v5 = vpop.f32.mrf.mxu1  ;;  %v9062_v43 = vpop.f32.mrf.mxu0  ;;  %9305 = vmatmul.mubr.msk.f32.gmra.mxu0 %vm174_vm1, %v7676_v46  ;;  %9343 = vmatmul.mubr.msk.f32.gmra.mxu1 %vm174_vm1, %v7766_v55 }
 0x1d6   :  { %v12414_v53 = vadd.f32 %v9000_v5, %v11845_v41  ;;  %v12417_v40 = vadd.f32 %v9062_v43, %v12078_v47  ;;  %9307 = vmatprep.mubr.msk.f32.mxu0 %vm174_vm1, %v7677_v27  ;;  %9345 = vmatprep.mubr.msk.f32.mxu1 %vm174_vm1, %v7767_v24  ;;  %v7769_v41 = vld [vmem:[%s13852_s0 + $0x151] sm:$0xff] }
 0x1d7   :  { %v2634_v46 = vpop.f32.mrf.mxu1  ;;  %v3224_v55 = vpop.f32.mrf.mxu0  ;;  %v7875_v47 = vld [vmem:[%s13852_s0 + $0x32] sm:$0xff] }
 0x1d8   :  { %v12434_v2 = vadd.f32 %v2634_v46, %v11866_v4  ;;  %v12437_v14 = vadd.f32 %v3224_v55, %v12098_v39  ;;  %v7770_v4 = vld [vmem:[%s13852_s0 + $0x159] sm:$0xff] }
 0x1d9   :  { %v9003_v27 = vpop.f32.mrf.mxu1  ;;  %v9065_v24 = vpop.f32.mrf.mxu0  ;;  %9308 = vmatmul.mubr.msk.f32.gmra.mxu0 %vm174_vm1, %v7678_v26  ;;  %9346 = vmatmul.mubr.msk.f32.gmra.mxu1 %vm174_vm1, %v7768_v12  ;;  %v7876_v39 = vld [vmem:[%s13852_s0 + $0x3a] sm:$0xff] }
 0x1da   :  { %v12442_v5 = vadd.f32 %v9003_v27, %v11875_v49  ;;  %v12445_v43 = vadd.f32 %v9065_v24, %v12106_v33  ;;  %9348 = vmatprep.mubr.msk.f32.mxu1 %vm174_vm1, %v7769_v41  ;;  %9410 = vmatprep.mubr.msk.f32.mxu0 %vm174_vm1, %v7875_v47  ;;  %v7771_v49 = vld [vmem:[%s13852_s0 + $0x169] sm:$0xff] }
 0x1db   :  { %v2644_v26 = vpop.f32.mrf.mxu1  ;;  %v3234_v12 = vpop.f32.mrf.mxu0  ;;  %v7877_v33 = vld [vmem:[%s13852_s0 + $0x4a] sm:$0xff] }
 0x1dc   :  { %v12462_v46 = vadd.f32 %v2644_v26, %v11896_v9  ;;  %v12465_v55 = vadd.f32 %v3234_v12, %v12126_v42  ;;  %v7772_v9 = vld [vmem:[%s13852_s0 + $0x171] sm:$0xff] }
 0x1dd   :  { %v9006_v41 = vpop.f32.mrf.mxu1  ;;  %v9068_v47 = vpop.f32.mrf.mxu0  ;;  %9349 = vmatmul.mubr.msk.f32.gmra.mxu1 %vm174_vm1, %v7770_v4  ;;  %9411 = vmatmul.mubr.msk.f32.vlgmr.msra.gmra.mxu0 %vm174_vm1, %v7876_v39  ;;  %v7878_v42 = vld [vmem:[%s13852_s0 + $0x52] sm:$0xff] }
 0x1de   :  { %v12470_v27 = vadd.f32 %v9006_v41, %v11905_v59  ;;  %v12473_v24 = vadd.f32 %v9068_v47, %v12134_v0  ;;  %9351 = vmatprep.mubr.msk.f32.mxu1 %vm174_vm1, %v7771_v49  ;;  %9413 = vmatprep.mubr.msk.f32.mxu0 %vm174_vm1, %v7877_v33  ;;  %v7773_v59 = vld [vmem:[%s13852_s0 + $0x181] sm:$0xff] }
 0x1df   :  { %v2654_v4 = vpop.f32.mrf.mxu1  ;;  %v3244_v39 = vpop.f32.mrf.mxu0  ;;  %v7879_v0 = vld [vmem:[%s13852_s0 + $0x62] sm:$0xff] }
 0x1e0   :  { %v12490_v26 = vadd.f32 %v2654_v4, %v11926_v38  ;;  %v12493_v12 = vadd.f32 %v3244_v39, %v12154_v60  ;;  %v7774_v38 = vld [vmem:[%s13852_s0 + $0x189] sm:$0xff] }
 0x1e1   :  { %v9009_v49 = vpop.f32.mrf.mxu1  ;;  %v9071_v33 = vpop.f32.mrf.mxu0  ;;  %9352 = vmatmul.mubr.msk.f32.gmra.mxu1 %vm174_vm1, %v7772_v9  ;;  %9414 = vmatmul.mubr.msk.f32.gmra.mxu0 %vm174_vm1, %v7878_v42  ;;  %v7880_v60 = vld [vmem:[%s13852_s0 + $0x6a] sm:$0xff] }
 0x1e2   :  { %v12498_v41 = vadd.f32 %v9009_v49, %v11935_v58  ;;  %v12501_v47 = vadd.f32 %v9071_v33, %v12162_v10  ;;  %9354 = vmatprep.mubr.msk.f32.mxu1 %vm174_vm1, %v7773_v59  ;;  %9416 = vmatprep.mubr.msk.f32.mxu0 %vm174_vm1, %v7879_v0  ;;  %v7775_v58 = vld [vmem:[%s13852_s0 + $0x199] sm:$0xff] }
 0x1e3   :  { %v2664_v9 = vpop.f32.mrf.mxu1  ;;  %v3254_v42 = vpop.f32.mrf.mxu0  ;;  %v7881_v10 = vld [vmem:[%s13852_s0 + $0x7a] sm:$0xff] }
 0x1e4   :  { %v12518_v4 = vadd.f32 %v2664_v9, %v11956_v17  ;;  %v12521_v39 = vadd.f32 %v3254_v42, %v12182_v34  ;;  %v7776_v17 = vld [vmem:[%s13852_s0 + $0x1a1] sm:$0xff] }
 0x1e5   :  { %v9012_v59 = vpop.f32.mrf.mxu1  ;;  %v9074_v0 = vpop.f32.mrf.mxu0  ;;  %9355 = vmatmul.mubr.msk.f32.gmra.mxu1 %vm174_vm1, %v7774_v38  ;;  %9417 = vmatmul.mubr.msk.f32.gmra.mxu0 %vm174_vm1, %v7880_v60  ;;  %v7882_v34 = vld [vmem:[%s13852_s0 + $0x82] sm:$0xff] }
 0x1e6   :  { %v12526_v49 = vadd.f32 %v9012_v59, %v11965_v28  ;;  %v12529_v33 = vadd.f32 %v9074_v0, %v12190_v37  ;;  %9357 = vmatprep.mubr.msk.f32.mxu1 %vm174_vm1, %v7775_v58  ;;  %9419 = vmatprep.mubr.msk.f32.mxu0 %vm174_vm1, %v7881_v10  ;;  %v7777_v28 = vld [vmem:[%s13852_s0 + $0x1e1] sm:$0xff]  ;;  %v7883_v37 = vld [vmem:[%s13852_s0 + $0x92] sm:$0xff] }
 0x1e7   :  { %v2674_v38 = vpop.f32.mrf.mxu1  ;;  %v3264_v60 = vpop.f32.mrf.mxu0 }
 0x1e8   :  { %v12546_v9 = vadd.f32 %v2674_v38, %v11986_v3  ;;  %v12549_v42 = vadd.f32 %v3264_v60, %v12210_v11  ;;  %v7778_v3 = vld [vmem:[%s13852_s0 + $0x1e9] sm:$0xff]  ;;  %v7884_v11 = vld [vmem:[%s13852_s0 + $0x9a] sm:$0xff] }
 0x1e9   :  { %v9015_v58 = vpop.f32.mrf.mxu1  ;;  %v9077_v10 = vpop.f32.mrf.mxu0  ;;  %9358 = vmatmul.mubr.msk.f32.gmra.mxu1 %vm174_vm1, %v7776_v17  ;;  %9420 = vmatmul.mubr.msk.f32.gmra.mxu0 %vm174_vm1, %v7882_v34 }
 0x1ea   :  { %v12554_v59 = vadd.f32 %v9015_v58, %v11995_v61  ;;  %v12557_v0 = vadd.f32 %v9077_v10, %v12218_v6  ;;  %9360 = vmatprep.mubr.msk.f32.mxu1 %vm174_vm1, %v7777_v28  ;;  %9422 = vmatprep.mubr.msk.f32.mxu0 %vm174_vm1, %v7883_v37  ;;  %v7779_v61 = vld [vmem:[%s13852_s0 + $0x1f9] sm:$0xff]  ;;  %v7885_v6 = vld [vmem:[%s13852_s0 + $0xaa] sm:$0xff] }
 0x1eb   :  { %v2684_v17 = vpop.f32.mrf.mxu1  ;;  %v3274_v34 = vpop.f32.mrf.mxu0 }
 0x1ec   :  { %v12574_v38 = vadd.f32 %v2684_v17, %v12014_v48  ;;  %v12577_v60 = vadd.f32 %v3274_v34, %v12238_v29  ;;  %v7780_v48 = vld [vmem:[%s13852_s0 + $0x201] sm:$0xff]  ;;  %v7886_v29 = vld [vmem:[%s13852_s0 + $0xb2] sm:$0xff] }
 0x1ed   :  { %v9080_v28 = vpop.f32.mrf.mxu0  ;;  %v9118_v37 = vpop.f32.mrf.mxu1  ;;  %9361 = vmatmul.mubr.msk.f32.gmra.mxu1 %vm174_vm1, %v7778_v3  ;;  %9423 = vmatmul.mubr.msk.f32.gmra.mxu0 %vm174_vm1, %v7884_v11 }
 0x1ee   :  { %v12582_v58 = vadd.f32 %v9080_v28, %v12246_v56  ;;  %v12585_v10 = vadd.f32 %v9118_v37, %v12025_v13  ;;  %9363 = vmatprep.mubr.msk.f32.mxu1 %vm174_vm1, %v7779_v61  ;;  %9425 = vmatprep.mubr.msk.f32.mxu0 %vm174_vm1, %v7885_v6  ;;  %v7781_v56 = vld [vmem:[%s13852_s0 + $0x211] sm:$0xff]  ;;  %v7887_v13 = vld [vmem:[%s13852_s0 + $0xc2] sm:$0xff] }
 0x1ef   :  { %v3284_v3 = vpop.f32.mrf.mxu0  ;;  %v3794_v11 = vpop.f32.mrf.mxu1 }
 0x1f0   :  { %v12602_v17 = vadd.f32 %v3284_v3, %v12266_v44  ;;  %v12605_v34 = vadd.f32 %v3794_v11, %v12045_v20  ;;  %v7782_v20 = vld [vmem:[%s13852_s0 + $0x219] sm:$0xff]  ;;  %v7888_v44 = vld [vmem:[%s13852_s0 + $0xca] sm:$0xff] }
 0x1f1   :  { %v9083_v61 = vpop.f32.mrf.mxu0  ;;  %v9121_v6 = vpop.f32.mrf.mxu1  ;;  %9364 = vmatmul.mubr.msk.f32.gmra.mxu1 %vm174_vm1, %v7780_v48  ;;  %9426 = vmatmul.mubr.msk.f32.gmra.mxu0 %vm174_vm1, %v7886_v29 }
 0x1f2   :  { %v12610_v28 = vadd.f32 %v9083_v61, %v12274_v50  ;;  %v12613_v37 = vadd.f32 %v9121_v6, %v12053_v63  ;;  %9366 = vmatprep.mubr.msk.f32.mxu1 %vm174_vm1, %v7781_v56  ;;  %9428 = vmatprep.mubr.msk.f32.mxu0 %vm174_vm1, %v7887_v13  ;;  %v7783_v50 = vld [vmem:[%s13852_s0 + $0x229] sm:$0xff]  ;;  %v7889_v63 = vld [vmem:[%s13852_s0 + $0xda] sm:$0xff] }
 0x1f3   :  { %v3294_v48 = vpop.f32.mrf.mxu0  ;;  %v3804_v29 = vpop.f32.mrf.mxu1 }
 0x1f4   :  { %v12630_v3 = vadd.f32 %v3294_v48, %v12294_v19  ;;  %v12633_v11 = vadd.f32 %v3804_v29, %v12073_v16  ;;  %v7784_v16 = vld [vmem:[%s13852_s0 + $0x231] sm:$0xff]  ;;  %v7890_v19 = vld [vmem:[%s13852_s0 + $0xe2] sm:$0xff]  ;;  %v14015_v29 = vld [vmem:[#allocation22_spill] sm:$0xff] }
 0x1f5   :  { %v9086_v56 = vpop.f32.mrf.mxu0  ;;  %v9124_v13 = vpop.f32.mrf.mxu1  ;;  %9367 = vmatmul.mubr.msk.f32.gmra.mxu1 %vm174_vm1, %v7782_v20  ;;  %9429 = vmatmul.mubr.msk.f32.gmra.mxu0 %vm174_vm1, %v7888_v44 }
 0x1f6   :  { %v12638_v61 = vadd.f32 %v9086_v56, %v12302_v57  ;;  %v12641_v6 = vadd.f32 %v9124_v13, %v12081_v32  ;;  %9369 = vmatprep.mubr.msk.f32.mxu1 %vm174_vm1, %v7783_v50  ;;  %9431 = vmatprep.mubr.msk.f32.mxu0 %vm174_vm1, %v7889_v63  ;;  %v7785_v57 = vld [vmem:[%s13852_s0 + $0x241] sm:$0xff]  ;;  %v7891_v32 = vld [vmem:[%s13852_s0 + $0xf2] sm:$0xff] }
 0x1f7   :  { %v3304_v20 = vpop.f32.mrf.mxu0  ;;  %v3814_v44 = vpop.f32.mrf.mxu1 }
 0x1f8   :  { %v12658_v48 = vadd.f32 %v3304_v20, %v12322_v8  ;;  %v12661_v50 = vadd.f32 %v3814_v44, %v14015_v29  ;;  %v7786_v8 = vld [vmem:[%s13852_s0 + $0x249] sm:$0xff] }
 0x1f9   :  { %v9089_v63 = vpop.f32.mrf.mxu0  ;;  %v9127_v56 = vpop.f32.mrf.mxu1  ;;  %9370 = vmatmul.mubr.msk.f32.gmra.mxu1 %vm174_vm1, %v7784_v16  ;;  %9432 = vmatmul.mubr.msk.f32.gmra.mxu0 %vm174_vm1, %v7890_v19  ;;  %v7892_v16 = vld [vmem:[%s13852_s0 + $0xfa] sm:$0xff] }
 0x1fa   :  { %14014 = vst [vmem:[#allocation36_spill] sm:$0xff] %v12658_v48  ;;  %v12666_v13 = vadd.f32 %v9089_v63, %v12330_v36  ;;  %v12669_v1 = vadd.f32 %v9127_v56, %v14017_v15  ;;  %9372 = vmatprep.mubr.msk.f32.mxu1 %vm174_vm1, %v7785_v57  ;;  %9434 = vmatprep.mubr.msk.f32.mxu0 %vm174_vm1, %v7891_v32  ;;  %v7787_v36 = vld [vmem:[%s13852_s0 + $0x259] sm:$0xff]  ;;  %v7893_v15 = vld [vmem:[%s13852_s0 + $0x10a] sm:$0xff] }
 0x1fb   :  { %v3314_v20 = vpop.f32.mrf.mxu0  ;;  %v3824_v19 = vpop.f32.mrf.mxu1  ;;  %v14019_v57 = vld [vmem:[#allocation24_spill] sm:$0xff] }
 0x1fc   :  { %14016 = vst [vmem:[#allocation37_spill] sm:$0xff] %v12666_v13  ;;  %v12686_v44 = vadd.f32 %v3314_v20, %v12350_v7  ;;  %v12689_v32 = vadd.f32 %v3824_v19, %v14019_v57  ;;  %v14021_v13 = vld [vmem:[#allocation25_spill] sm:$0xff]  ;;  %v7788_v7 = vld [vmem:[%s13852_s0 + $0x261] sm:$0xff] }
 0x1fd   :  { %v9092_v29 = vpop.f32.mrf.mxu0  ;;  %v9130_v63 = vpop.f32.mrf.mxu1  ;;  %9373 = vmatmul.mubr.msk.f32.gmra.mxu1 %vm174_vm1, %v7786_v8  ;;  %9435 = vmatmul.mubr.msk.f32.gmra.mxu0 %vm174_vm1, %v7892_v16  ;;  %v7894_v8 = vld [vmem:[%s13852_s0 + $0x112] sm:$0xff] }
 0x1fe   :  { %14018 = vst [vmem:[#allocation38_spill] sm:$0xff] %v12686_v44  ;;  %v12694_v56 = vadd.f32 %v9092_v29, %v12358_v35  ;;  %v12697_v48 = vadd.f32 %v9130_v63, %v14021_v13  ;;  %9375 = vmatprep.mubr.msk.f32.mxu1 %vm174_vm1, %v7787_v36  ;;  %9437 = vmatprep.mubr.msk.f32.mxu0 %vm174_vm1, %v7893_v15  ;;  %v7789_v35 = vld [vmem:[%s13852_s0 + $0x271] sm:$0xff]  ;;  %v7895_v13 = vld [vmem:[%s13852_s0 + $0x122] sm:$0xff]  ;;  %v14023_v36 = vld [vmem:[#allocation26_spill] sm:$0xff] }
 0x1ff   :  { %v3324_v20 = vpop.f32.mrf.mxu0  ;;  %v3834_v16 = vpop.f32.mrf.mxu1 }
 0x200   :  { %14020 = vst [vmem:[#allocation39_spill] sm:$0xff] %v12694_v56  ;;  %v12714_v19 = vadd.f32 %v3324_v20, %v12378_v62  ;;  %v12717_v15 = vadd.f32 %v3834_v16, %v14023_v36  ;;  %v14025_v56 = vld [vmem:[#allocation27_spill] sm:$0xff]  ;;  %v7790_v62 = vld [vmem:[%s13852_s0 + $0x279] sm:$0xff] }
 0x201   :  { %v9095_v57 = vpop.f32.mrf.mxu0  ;;  %v9133_v29 = vpop.f32.mrf.mxu1  ;;  %9376 = vmatmul.mubr.msk.f32.gmra.mxu1 %vm174_vm1, %v7788_v7  ;;  %9438 = vmatmul.mubr.msk.f32.gmra.mxu0 %vm174_vm1, %v7894_v8  ;;  %v7896_v7 = vld [vmem:[%s13852_s0 + $0x12a] sm:$0xff] }
 0x202   :  { %14022 = vst [vmem:[#allocation6_spill] sm:$0xff] %v12714_v19  ;;  %v12722_v63 = vadd.f32 %v9095_v57, %v12386_v30  ;;  %v12725_v44 = vadd.f32 %v9133_v29, %v14025_v56  ;;  %9378 = vmatprep.mubr.msk.f32.mxu1 %vm174_vm1, %v7789_v35  ;;  %9440 = vmatprep.mubr.msk.f32.mxu0 %vm174_vm1, %v7895_v13  ;;  %v7791_v30 = vld [vmem:[%s13852_s0 + $0x289] sm:$0xff]  ;;  %v7897_v56 = vld [vmem:[%s13852_s0 + $0x13a] sm:$0xff] }
 0x203   :  { %v3334_v20 = vpop.f32.mrf.mxu0  ;;  %v3844_v8 = vpop.f32.mrf.mxu1  ;;  %v14027_v35 = vld [vmem:[#allocation28_spill] sm:$0xff] }
 0x204   :  { %14024 = vst [vmem:[#allocation3_spill] sm:$0xff] %v12722_v63  ;;  %v12742_v16 = vadd.f32 %v3334_v20, %v12406_v21  ;;  %v12745_v13 = vadd.f32 %v3844_v8, %v14027_v35  ;;  %v14029_v63 = vld [vmem:[#allocation29_spill] sm:$0xff] }
 0x205   :  { %v9098_v36 = vpop.f32.mrf.mxu0  ;;  %v9136_v57 = vpop.f32.mrf.mxu1  ;;  %9379 = vmatmul.mubr.msk.f32.gmra.mxu1 %vm174_vm1, %v7790_v62  ;;  %9441 = vmatmul.mubr.msk.f32.gmra.mxu0 %vm174_vm1, %v7896_v7  ;;  %v7792_v21 = vld [vmem:[%s13852_s0 + $0x291] sm:$0xff]  ;;  %v7898_v62 = vld [vmem:[%s13852_s0 + $0x142] sm:$0xff] }
 0x206   :  { %14026 = vst [vmem:[#allocation7_spill] sm:$0xff] %v12742_v16  ;;  %v12750_v29 = vadd.f32 %v9098_v36, %v12414_v53  ;;  %v12753_v19 = vadd.f32 %v9136_v57, %v14029_v63  ;;  %9381 = vmatprep.mubr.msk.f32.mxu1 %vm174_vm1, %v7791_v30  ;;  %9443 = vmatprep.mubr.msk.f32.mxu0 %vm174_vm1, %v7897_v56  ;;  %v7793_v53 = vld [vmem:[%s13852_s0 + $0x2a1] sm:$0xff]  ;;  %v7899_v63 = vld [vmem:[%s13852_s0 + $0x152] sm:$0xff] }
 0x207   :  { %v3344_v20 = vpop.f32.mrf.mxu0  ;;  %v3854_v7 = vpop.f32.mrf.mxu1  ;;  %v14031_v30 = vld [vmem:[#allocation30_spill] sm:$0xff] }
 0x208   :  { %14028 = vst [vmem:[#allocation4_spill] sm:$0xff] %v12750_v29  ;;  %v12770_v8 = vadd.f32 %v3344_v20, %v12434_v2  ;;  %v12773_v56 = vadd.f32 %v3854_v7, %v14031_v30  ;;  %v14033_v29 = vld [vmem:[#allocation31_spill] sm:$0xff]  ;;  %v7794_v2 = vld [vmem:[%s13852_s0 + $0x2a9] sm:$0xff] }
 0x209   :  { %v9101_v35 = vpop.f32.mrf.mxu0  ;;  %v9139_v36 = vpop.f32.mrf.mxu1  ;;  %9382 = vmatmul.mubr.msk.f32.gmra.mxu1 %vm174_vm1, %v7792_v21  ;;  %9444 = vmatmul.mubr.msk.f32.gmra.mxu0 %vm174_vm1, %v7898_v62  ;;  %v7900_v21 = vld [vmem:[%s13852_s0 + $0x15a] sm:$0xff] }
 0x20a   :  { %14030 = vst [vmem:[#allocation8_spill] sm:$0xff] %v12770_v8  ;;  %v12778_v57 = vadd.f32 %v9101_v35, %v12442_v5  ;;  %v12781_v16 = vadd.f32 %v9139_v36, %v14033_v29  ;;  %9384 = vmatprep.mubr.msk.f32.mxu1 %vm174_vm1, %v7793_v53  ;;  %9446 = vmatprep.mubr.msk.f32.mxu0 %vm174_vm1, %v7899_v63  ;;  %v7795_v5 = vld [vmem:[%s13852_s0 + $0x2b9] sm:$0xff]  ;;  %v7901_v29 = vld [vmem:[%s13852_s0 + $0x16a] sm:$0xff] }
 0x20b   :  { %v3354_v20 = vpop.f32.mrf.mxu0  ;;  %v3864_v62 = vpop.f32.mrf.mxu1  ;;  %v14034_v53 = vld [vmem:[#allocation32_spill] sm:$0xff] }
 0x20c   :  { %14032 = vst [vmem:[#allocation5_spill] sm:$0xff] %v12778_v57  ;;  %v12798_v7 = vadd.f32 %v3354_v20, %v12462_v46  ;;  %v12801_v63 = vadd.f32 %v3864_v62, %v14034_v53  ;;  %v14035_v57 = vld [vmem:[#allocation33_spill] sm:$0xff]  ;;  %v7796_v46 = vld [vmem:[%s13852_s0 + $0x2c1] sm:$0xff] }
 0x20d   :  { %v9104_v30 = vpop.f32.mrf.mxu0  ;;  %v9142_v35 = vpop.f32.mrf.mxu1  ;;  %9385 = vmatmul.mubr.msk.f32.gmra.mxu1 %vm174_vm1, %v7794_v2  ;;  %9447 = vmatmul.mubr.msk.f32.gmra.mxu0 %vm174_vm1, %v7900_v21  ;;  %v7902_v2 = vld [vmem:[%s13852_s0 + $0x172] sm:$0xff] }
 0x20e   :  { %v12806_v36 = vadd.f32 %v9104_v30, %v12470_v27  ;;  %v12809_v8 = vadd.f32 %v9142_v35, %v14035_v57  ;;  %9387 = vmatprep.mubr.msk.f32.mxu1 %vm174_vm1, %v7795_v5  ;;  %9449 = vmatprep.mubr.msk.f32.mxu0 %vm174_vm1, %v7901_v29  ;;  %v7797_v27 = vld [vmem:[%s13852_s0 + $0x2d1] sm:$0xff]  ;;  %v7903_v57 = vld [vmem:[%s13852_s0 + $0x182] sm:$0xff] }
 0x20f   :  { %v3364_v20 = vpop.f32.mrf.mxu0  ;;  %v12819_v21 = vpop.f32.mrf.mxu1  ;;  %v7904_v35 = vld [vmem:[%s13852_s0 + $0x18a] sm:$0xff] }
 0x210   :  { %v12828_v62 = vadd.f32 %v3364_v20, %v12490_v26  ;;  %v7798_v26 = vld [vmem:[%s13852_s0 + $0x2d9] sm:$0xff] }
 0x211   :  { %v9107_v5 = vpop.f32.mrf.mxu0  ;;  %v9145_v29 = vpop.f32.mrf.mxu1  ;;  %9388 = vmatmul.mubr.msk.f32.gmra.mxu1 %vm174_vm1, %v7796_v46  ;;  %9450 = vmatmul.mubr.msk.f32.gmra.mxu0 %vm174_vm1, %v7902_v2 }
 0x212   :  { %v12833_v53 = vadd.f32 %v9107_v5, %v12498_v41  ;;  %v12836_v30 = vadd.f32 %v9145_v29, %v12277_v45  ;;  %9390 = vmatprep.mubr.msk.f32.mxu1 %vm174_vm1, %v7797_v27  ;;  %9452 = vmatprep.mubr.msk.f32.mxu0 %vm174_vm1, %v7903_v57  ;;  %v7799_v45 = vld [vmem:[%s13852_s0 + $0x2e9] sm:$0xff]  ;;  %v7905_v41 = vld [vmem:[%s13852_s0 + $0x19a] sm:$0xff] }
 0x213   :  { %v3374_v46 = vpop.f32.mrf.mxu0  ;;  %v12846_v2 = vpop.f32.mrf.mxu1 }
 0x214   :  { %v12855_v20 = vadd.f32 %v3374_v46, %v12518_v4  ;;  %v7800_v4 = vld [vmem:[%s13852_s0 + $0x2f1] sm:$0xff] }
 0x215   :  { %v9110_v27 = vpop.f32.mrf.mxu0  ;;  %v9148_v57 = vpop.f32.mrf.mxu1  ;;  %9391 = vmatmul.mubr.msk.f32.gmra.mxu1 %vm174_vm1, %v7798_v26  ;;  %9453 = vmatmul.mubr.msk.f32.gmra.mxu0 %vm174_vm1, %v7904_v35  ;;  %v7906_v26 = vld [vmem:[%s13852_s0 + $0x1a2] sm:$0xff] }
 0x216   :  { %v12860_v5 = vadd.f32 %v9110_v27, %v12526_v49  ;;  %v12863_v29 = vadd.f32 %v9148_v57, %v12305_v22  ;;  %9393 = vmatprep.mubr.msk.f32.mxu1 %vm174_vm1, %v7799_v45  ;;  %9455 = vmatprep.mubr.msk.f32.mxu0 %vm174_vm1, %v7905_v41  ;;  %v7801_v22 = vld [vmem:[%s13852_s0 + $0x301] sm:$0xff] }
 0x217   :  { %v3384_v46 = vpop.f32.mrf.mxu0  ;;  %v12873_v35 = vpop.f32.mrf.mxu1  ;;  %v7907_v49 = vld [vmem:[%s13852_s0 + $0x1e2] sm:$0xff] }
 0x218   :  { %14036 = vst [vmem:[#allocation9_spill] sm:$0xff] %v12860_v5  ;;  %v12882_v45 = vadd.f32 %v3384_v46, %v12546_v9  ;;  %v7802_v9 = vld [vmem:[%s13852_s0 + $0x309] sm:$0xff] }
 0x219   :  { %v9113_v41 = vpop.f32.mrf.mxu0  ;;  %v9151_v27 = vpop.f32.mrf.mxu1  ;;  %9394 = vmatmul.mubr.msk.f32.gmra.mxu1 %vm174_vm1, %v7800_v4  ;;  %9456 = vmatmul.mubr.msk.f32.gmra.mxu0 %vm174_vm1, %v7906_v26  ;;  %v7908_v4 = vld [vmem:[%s13852_s0 + $0x1ea] sm:$0xff] }
 0x21a   :  { %v12887_v57 = vadd.f32 %v9113_v41, %v12554_v59  ;;  %v12890_v5 = vadd.f32 %v9151_v27, %v12333_v54  ;;  %9396 = vmatprep.mubr.msk.f32.mxu1 %vm174_vm1, %v7801_v22  ;;  %9458 = vmatprep.mubr.msk.f32.mxu0 %vm174_vm1, %v7907_v49  ;;  %v7803_v54 = vld [vmem:[%s13852_s0 + $0x319] sm:$0xff] }
 0x21b   :  { %v3394_v46 = vpop.f32.mrf.mxu0  ;;  %v12900_v26 = vpop.f32.mrf.mxu1  ;;  %v7909_v59 = vld [vmem:[%s13852_s0 + $0x1fa] sm:$0xff] }
 0x21c   :  { %14037 = vst [vmem:[#allocation10_spill] sm:$0xff] %v12887_v57  ;;  %v12909_v22 = vadd.f32 %v3394_v46, %v12574_v38  ;;  %v7804_v38 = vld [vmem:[%s13852_s0 + $0x321] sm:$0xff] }
 0x21d   :  { %v9154_v49 = vpop.f32.mrf.mxu1  ;;  %v9216_v41 = vpop.f32.mrf.mxu0  ;;  %9397 = vmatmul.mubr.msk.f32.gmra.mxu1 %vm174_vm1, %v7802_v9  ;;  %9459 = vmatmul.mubr.msk.f32.gmra.mxu0 %vm174_vm1, %v7908_v4  ;;  %v7910_v9 = vld [vmem:[%s13852_s0 + $0x202] sm:$0xff] }
 0x21e   :  { %v12914_v27 = vadd.f32 %v9154_v49, %v12361_v31  ;;  %v12917_v57 = vadd.f32 %v9216_v41, %v12585_v10  ;;  %9399 = vmatprep.mubr.msk.f32.mxu1 %vm174_vm1, %v7803_v54  ;;  %9461 = vmatprep.mubr.msk.f32.mxu0 %vm174_vm1, %v7909_v59  ;;  %v7805_v31 = vld [vmem:[%s13852_s0 + $0x331] sm:$0xff] }
 0x21f   :  { %v12927_v46 = vpop.f32.mrf.mxu1  ;;  %v4505_v4 = vpop.f32.mrf.mxu0  ;;  %v7911_v10 = vld [vmem:[%s13852_s0 + $0x212] sm:$0xff] }
 0x220   :  { %14038 = vst [vmem:[#allocation11_spill] sm:$0xff] %v12917_v57  ;;  %v12936_v54 = vadd.f32 %v4505_v4, %v12605_v34  ;;  %v7806_v34 = vld [vmem:[%s13852_s0 + $0x339] sm:$0xff] }
 0x221   :  { %v9157_v59 = vpop.f32.mrf.mxu1  ;;  %v9219_v49 = vpop.f32.mrf.mxu0  ;;  %9400 = vmatmul.mubr.msk.f32.gmra.mxu1 %vm174_vm1, %v7804_v38  ;;  %9462 = vmatmul.mubr.msk.f32.gmra.mxu0 %vm174_vm1, %v7910_v9  ;;  %v7912_v38 = vld [vmem:[%s13852_s0 + $0x21a] sm:$0xff] }
 0x222   :  { %14039 = vst [vmem:[#allocation12_spill] sm:$0xff] %v12936_v54  ;;  %v12941_v41 = vadd.f32 %v9157_v59, %v12389_v18  ;;  %v12944_v57 = vadd.f32 %v9219_v49, %v12613_v37  ;;  %9402 = vmatprep.mubr.msk.f32.mxu1 %vm174_vm1, %v7805_v31  ;;  %9464 = vmatprep.mubr.msk.f32.mxu0 %vm174_vm1, %v7911_v10  ;;  %v7807_v18 = vld [vmem:[%s13852_s0 + $0x349] sm:$0xff] }
 0x223   :  { %v3924_v4 = vpop.f32.mrf.mxu1  ;;  %v4515_v9 = vpop.f32.mrf.mxu0  ;;  %v7913_v37 = vld [vmem:[%s13852_s0 + $0x22a] sm:$0xff] }
 0x224   :  { %14040 = vst [vmem:[#allocation13_spill] sm:$0xff] %v12944_v57  ;;  %v12961_v31 = vadd.f32 %v3924_v4, %v12409_v25  ;;  %v12964_v10 = vadd.f32 %v4515_v9, %v12633_v11  ;;  %v7808_v25 = vld [vmem:[%s13852_s0 + $0x351] sm:$0xff] }
 0x225   :  { %v9160_v59 = vpop.f32.mrf.mxu1  ;;  %v9222_v49 = vpop.f32.mrf.mxu0  ;;  %9403 = vmatmul.mubr.msk.f32.gmra.mxu1 %vm174_vm1, %v7806_v34  ;;  %9465 = vmatmul.mubr.msk.f32.gmra.mxu0 %vm174_vm1, %v7912_v38  ;;  %v7914_v11 = vld [vmem:[%s13852_s0 + $0x232] sm:$0xff] }
 0x226   :  { %v12969_v57 = vadd.f32 %v9160_v59, %v12417_v40  ;;  %v12972_v54 = vadd.f32 %v9222_v49, %v12641_v6  ;;  %9405 = vmatprep.mubr.msk.f32.mxu1 %vm174_vm1, %v7807_v18  ;;  %9467 = vmatprep.mubr.msk.f32.mxu0 %vm174_vm1, %v7913_v37  ;;  %v7915_v40 = vld [vmem:[%s13852_s0 + $0x242] sm:$0xff] }
 0x227   :  { %v3934_v34 = vpop.f32.mrf.mxu1  ;;  %v4525_v38 = vpop.f32.mrf.mxu0 }
 0x228   :  { %v12986_v6 = vadd.f32 %v3934_v34, %v12437_v14  ;;  %v12989_v4 = vadd.f32 %v4525_v38, %v12661_v50  ;;  %v7916_v14 = vld [vmem:[%s13852_s0 + $0x24a] sm:$0xff] }
 0x229   :  { %v9163_v9 = vpop.f32.mrf.mxu1  ;;  %v9225_v18 = vpop.f32.mrf.mxu0  ;;  %9406 = vmatmul.mubr.msk.f32.gmra.mxu1 %vm174_vm1, %v7808_v25  ;;  %9468 = vmatmul.mubr.msk.f32.gmra.mxu0 %vm174_vm1, %v7914_v11  ;;  %v7917_v25 = vld [vmem:[%s13852_s0 + $0x25a] sm:$0xff] }
 0x22a   :  { %v12994_v37 = vadd.f32 %v9163_v9, %v12445_v43  ;;  %v12997_v59 = vadd.f32 %v9225_v18, %v12669_v1  ;;  %9470 = vmatprep.mubr.msk.f32.mxu0 %vm174_vm1, %v7915_v40 }
 0x22b   :  { %v3944_v50 = vpop.f32.mrf.mxu1  ;;  %v4535_v49 = vpop.f32.mrf.mxu0 }
 0x22c   :  { %v13007_v11 = vadd.f32 %v3944_v50, %v12465_v55  ;;  %v13010_v43 = vadd.f32 %v4535_v49, %v12689_v32  ;;  %v7918_v55 = vld [vmem:[%s13852_s0 + $0x262] sm:$0xff]  ;;  %v7919_v32 = vld [vmem:[%s13852_s0 + $0x272] sm:$0xff] }
 0x22d   :  { %v9166_v1 = vpop.f32.mrf.mxu1  ;;  %v9228_v34 = vpop.f32.mrf.mxu0  ;;  %9471 = vmatmul.mubr.msk.f32.gmra.mxu0 %vm174_vm1, %v7916_v14 }
 0x22e   :  { %v13014_v38 = vadd.f32 %v9166_v1, %v12473_v24  ;;  %v13017_v40 = vadd.f32 %v9228_v34, %v12697_v48  ;;  %9473 = vmatprep.mubr.msk.f32.mxu0 %vm174_vm1, %v7917_v25 }
 0x22f   :  { %v3954_v9 = vpop.f32.mrf.mxu1  ;;  %v4545_v18 = vpop.f32.mrf.mxu0 }
 0x230   :  { %v13027_v14 = vadd.f32 %v3954_v9, %v12493_v12  ;;  %v13030_v24 = vadd.f32 %v4545_v18, %v12717_v15  ;;  %v7920_v12 = vld [vmem:[%s13852_s0 + $0x27a] sm:$0xff]  ;;  %v7921_v15 = vld [vmem:[%s13852_s0 + $0x28a] sm:$0xff] }
 0x231   :  { %v9169_v48 = vpop.f32.mrf.mxu1  ;;  %v9231_v50 = vpop.f32.mrf.mxu0  ;;  %9474 = vmatmul.mubr.msk.f32.gmra.mxu0 %vm174_vm1, %v7918_v55 }
 0x232   :  { %v13034_v49 = vadd.f32 %v9169_v48, %v12501_v47  ;;  %v13037_v25 = vadd.f32 %v9231_v50, %v12725_v44  ;;  %9476 = vmatprep.mubr.msk.f32.mxu0 %vm174_vm1, %v7919_v32 }
 0x233   :  { %v3964_v1 = vpop.f32.mrf.mxu1  ;;  %v4555_v34 = vpop.f32.mrf.mxu0 }
 0x234   :  { %v13047_v55 = vadd.f32 %v3964_v1, %v12521_v39  ;;  %v13050_v47 = vadd.f32 %v4555_v34, %v12745_v13  ;;  %v7922_v39 = vld [vmem:[%s13852_s0 + $0x292] sm:$0xff]  ;;  %v7923_v13 = vld [vmem:[%s13852_s0 + $0x2a2] sm:$0xff]  ;;  %v13886_v34 = vmov 0.0  }
 0x235   :  { %v9172_v44 = vpop.f32.mrf.mxu1  ;;  %v9234_v9 = vpop.f32.mrf.mxu0  ;;  %9477 = vmatmul.mubr.msk.f32.gmra.mxu0 %vm174_vm1, %v7920_v12  ;;  %9506 = vmatprep.subr.mxu1 %v13886_v34 }
 0x236   :  { %v13054_v18 = vadd.f32 %v9172_v44, %v12529_v33  ;;  %v13057_v32 = vadd.f32 %v9234_v9, %v12753_v19  ;;  %9479 = vmatprep.mubr.msk.f32.mxu0 %vm174_vm1, %v7921_v15 }
 0x237   :  { %v3974_v48 = vpop.f32.mrf.mxu1  ;;  %v4565_v50 = vpop.f32.mrf.mxu0 }
 0x238   :  { %v13067_v12 = vadd.f32 %v3974_v48, %v12549_v42  ;;  %v13070_v33 = vadd.f32 %v4565_v50, %v12773_v56  ;;  %v7924_v42 = vld [vmem:[%s13852_s0 + $0x2aa] sm:$0xff] }
 0x239   :  { %v9175_v19 = vpop.f32.mrf.mxu1  ;;  %v9237_v1 = vpop.f32.mrf.mxu0  ;;  %9480 = vmatmul.mubr.msk.f32.gmra.mxu0 %vm174_vm1, %v7922_v39  ;;  %v7925_v39 = vld [vmem:[%s13852_s0 + $0x2ba] sm:$0xff] }
 0x23a   :  { %v13075_v15 = vadd.f32 %v9175_v19, %v12557_v0  ;;  %v13078_v44 = vadd.f32 %v9237_v1, %v12781_v16  ;;  %9482 = vmatprep.mubr.msk.f32.mxu0 %vm174_vm1, %v7923_v13  ;;  %v6586_v13 = vld [vmem:[%s13853_s4 + $0x8] sm:$0xff]  ;;  %v4129_v19 = vadd.f32 %v12819_v21, %v12269_v51 }
 0x23b   :  { %v3984_v56 = vpop.f32.mrf.mxu1  ;;  %v4575_v9 = vpop.f32.mrf.mxu0  ;;  %9507 = vmatpush3.msra.mxu1 %v6586_v13 }
 0x23c   :  { %v13088_v48 = vadd.f32 %v3984_v56, %v12577_v60  ;;  %v13091_v0 = vadd.f32 %v4575_v9, %v12801_v63  ;;  %v7926_v63 = vld [vmem:[%s13852_s0 + $0x2c2] sm:$0xff]  ;;  %v7927_v9 = vld [vmem:[%s13852_s0 + $0x2d2] sm:$0xff]  ;;  %9511 = vmatprep.subr.mxu1 %v13886_v34 }
 0x23d   :  { %v9178_v16 = vpop.f32.mrf.mxu1  ;;  %v9240_v50 = vpop.f32.mrf.mxu0  ;;  %9483 = vmatmul.mubr.msk.f32.gmra.mxu0 %vm174_vm1, %v7924_v42 }
 0x23e   :  { %v13100_v1 = vadd.f32 %v9178_v16, %v12582_v58  ;;  %v13103_v60 = vadd.f32 %v9240_v50, %v12809_v8  ;;  %9485 = vmatprep.mubr.msk.f32.mxu0 %vm174_vm1, %v7925_v39  ;;  %v4131_v39 = vadd.f32 %v12846_v2, %v12297_v52 }
 0x23f   :  { %v3994_v42 = vpop.f32.mrf.mxu1  ;;  %v4585_v56 = vpop.f32.mrf.mxu0 }
 0x240   :  { %v13114_v51 = vadd.f32 %v3994_v42, %v12602_v17  ;;  %v13116_v58 = vadd.f32 %v4585_v56, %v4129_v19  ;;  %v7928_v17 = vld [vmem:[%s13852_s0 + $0x2da] sm:$0xff]  ;;  %v4133_v42 = vadd.f32 %v12873_v35, %v12325_v23 }
 0x241   :  { %v9181_v8 = vpop.f32.mrf.mxu1  ;;  %v9243_v21 = vpop.f32.mrf.mxu0  ;;  %9486 = vmatmul.mubr.msk.f32.gmra.mxu0 %vm174_vm1, %v7926_v63  ;;  %v7929_v63 = vld [vmem:[%s13852_s0 + $0x2ea] sm:$0xff] }
 0x242   :  { %v13122_v16 = vadd.f32 %v9181_v8, %v12610_v28  ;;  %v13125_v50 = vadd.f32 %v9243_v21, %v12836_v30  ;;  %9488 = vmatprep.mubr.msk.f32.mxu0 %vm174_vm1, %v7927_v9 }
 0x243   :  { %v4004_v13 = vpop.f32.mrf.mxu1  ;;  %v4595_v19 = vpop.f32.mrf.mxu0 }
 0x244   :  { %v13135_v52 = vadd.f32 %v4004_v13, %v12630_v3  ;;  %v13137_v28 = vadd.f32 %v4595_v19, %v4131_v39  ;;  %v7930_v3 = vld [vmem:[%s13852_s0 + $0x2f2] sm:$0xff]  ;;  %v7931_v39 = vld [vmem:[%s13852_s0 + $0x302] sm:$0xff] }
 0x245   :  { %v9184_v2 = vpop.f32.mrf.mxu1  ;;  %v9246_v30 = vpop.f32.mrf.mxu0  ;;  %9489 = vmatmul.mubr.msk.f32.gmra.mxu0 %vm174_vm1, %v7928_v17  ;;  %v14041_v17 = vld [vmem:[#allocation36_spill] sm:$0xff]  ;;  %v14042_v13 = vld [vmem:[#allocation34_spill] sm:$0xff] }
 0x246   :  { %v13143_v56 = vadd.f32 %v9184_v2, %v12638_v61  ;;  %v13146_v9 = vadd.f32 %v9246_v30, %v12863_v29  ;;  %9491 = vmatprep.mubr.msk.f32.mxu0 %vm174_vm1, %v7929_v63  ;;  %v4135_v19 = vadd.f32 %v12900_v26, %v14042_v13  ;;  %v14043_v63 = vld [vmem:[#allocation37_spill] sm:$0xff] }
 0x247   :  { %v4014_v8 = vpop.f32.mrf.mxu1  ;;  %v4605_v21 = vpop.f32.mrf.mxu0 }
 0x248   :  { %v13156_v23 = vadd.f32 %v4014_v8, %v14041_v17  ;;  %v13158_v61 = vadd.f32 %v4605_v21, %v4133_v42  ;;  %v7932_v42 = vld [vmem:[%s13852_s0 + $0x30a] sm:$0xff]  ;;  %v14045_v17 = vld [vmem:[#allocation38_spill] sm:$0xff] }
 0x249   :  { %v9187_v35 = vpop.f32.mrf.mxu1  ;;  %v9249_v29 = vpop.f32.mrf.mxu0  ;;  %9492 = vmatmul.mubr.msk.f32.gmra.mxu0 %vm174_vm1, %v7930_v3  ;;  %v7933_v3 = vld [vmem:[%s13852_s0 + $0x31a] sm:$0xff] }
 0x24a   :  { %v13164_v2 = vadd.f32 %v9187_v35, %v14043_v63  ;;  %v13167_v30 = vadd.f32 %v9249_v29, %v12890_v5  ;;  %9494 = vmatprep.mubr.msk.f32.mxu0 %vm174_vm1, %v7931_v39  ;;  %v14047_v39 = vld [vmem:[#allocation35_spill] sm:$0xff] }
 0x24b   :  { %v4024_v8 = vpop.f32.mrf.mxu1  ;;  %v4615_v21 = vpop.f32.mrf.mxu0  ;;  %v4137_v29 = vadd.f32 %v12927_v46, %v14047_v39  ;;  %v14048_v63 = vld [vmem:[#allocation39_spill] sm:$0xff] }
 0x24c   :  { %14044 = vst [vmem:[#allocation14_spill] sm:$0xff] %v13167_v30  ;;  %v13177_v26 = vadd.f32 %v4024_v8, %v14045_v17  ;;  %v13179_v35 = vadd.f32 %v4615_v21, %v4135_v19  ;;  %v7934_v19 = vld [vmem:[%s13852_s0 + $0x322] sm:$0xff]  ;;  %v14050_v17 = vld [vmem:[#allocation6_spill] sm:$0xff] }
 0x24d   :  { %v9190_v13 = vpop.f32.mrf.mxu1  ;;  %v9252_v5 = vpop.f32.mrf.mxu0  ;;  %9495 = vmatmul.mubr.msk.f32.gmra.mxu0 %vm174_vm1, %v7932_v42  ;;  %v7935_v42 = vld [vmem:[%s13852_s0 + $0x332] sm:$0xff] }
 0x24e   :  { %14046 = vst [vmem:[#allocation15_spill] sm:$0xff] %v13179_v35  ;;  %v13185_v34 = vadd.f32 %v9190_v13, %v14048_v63  ;;  %v13188_v30 = vadd.f32 %v9252_v5, %v12914_v27  ;;  %9497 = vmatprep.mubr.msk.f32.mxu0 %vm174_vm1, %v7933_v3  ;;  %v14052_v3 = vld [vmem:[#allocation3_spill] sm:$0xff] }
 0x24f   :  { %v4034_v8 = vpop.f32.mrf.mxu1  ;;  %v4625_v21 = vpop.f32.mrf.mxu0 }
 0x250   :  { %14049 = vst [vmem:[#allocation16_spill] sm:$0xff] %v13188_v30  ;;  %v13198_v46 = vadd.f32 %v4034_v8, %v14050_v17  ;;  %v13200_v13 = vadd.f32 %v4625_v21, %v4137_v29  ;;  %v7936_v30 = vld [vmem:[%s13852_s0 + $0x33a] sm:$0xff]  ;;  %v7937_v29 = vld [vmem:[%s13852_s0 + $0x34a] sm:$0xff] }
 0x251   :  { %v9193_v39 = vpop.f32.mrf.mxu1  ;;  %v9255_v27 = vpop.f32.mrf.mxu0  ;;  %9498 = vmatmul.mubr.msk.f32.gmra.mxu0 %vm174_vm1, %v7934_v19  ;;  %v14054_v21 = vld [vmem:[#allocation7_spill] sm:$0xff] }
 0x252   :  { %14051 = vst [vmem:[#allocation17_spill] sm:$0xff] %v13200_v13  ;;  %v13204_v5 = vadd.f32 %v9193_v39, %v14052_v3  ;;  %v13207_v63 = vadd.f32 %v9255_v27, %v12941_v41  ;;  %9500 = vmatprep.mubr.msk.f32.mxu0 %vm174_vm1, %v7935_v42  ;;  %v14056_v42 = vld [vmem:[#allocation4_spill] sm:$0xff] }
 0x253   :  { %v4044_v8 = vpop.f32.mrf.mxu1  ;;  %v4635_v17 = vpop.f32.mrf.mxu0 }
 0x254   :  { %14053 = vst [vmem:[#allocation18_spill] sm:$0xff] %v13207_v63  ;;  %v13217_v19 = vadd.f32 %v4044_v8, %v14054_v21  ;;  %v13220_v39 = vadd.f32 %v4635_v17, %v12961_v31  ;;  %v7938_v8 = vld [vmem:[%s13852_s0 + $0x352] sm:$0xff]  ;;  %v14058_v31 = vld [vmem:[#allocation8_spill] sm:$0xff] }
 0x255   :  { %v9196_v41 = vpop.f32.mrf.mxu1  ;;  %v9258_v27 = vpop.f32.mrf.mxu0  ;;  %9501 = vmatmul.mubr.msk.f32.gmra.mxu0 %vm174_vm1, %v7936_v30 }
 0x256   :  { %14055 = vst [vmem:[#allocation19_spill] sm:$0xff] %v13220_v39  ;;  %v13224_v3 = vadd.f32 %v9196_v41, %v14056_v42  ;;  %v13227_v63 = vadd.f32 %v9258_v27, %v12969_v57  ;;  %9503 = vmatprep.mubr.msk.f32.mxu0 %vm174_vm1, %v7937_v29  ;;  %v14059_v57 = vld [vmem:[#allocation5_spill] sm:$0xff] }
 0x257   :  { %v4054_v21 = vpop.f32.mrf.mxu1  ;;  %v4645_v13 = vpop.f32.mrf.mxu0 }
 0x258   :  { %14057 = vst [vmem:[#allocation20_spill] sm:$0xff] %v13227_v63  ;;  %v13234_v17 = vadd.f32 %v4054_v21, %v14058_v31  ;;  %v13237_v39 = vadd.f32 %v4645_v13, %v12986_v6 }
 0x259   :  { %v9199_v30 = vpop.f32.mrf.mxu1  ;;  %v9261_v41 = vpop.f32.mrf.mxu0  ;;  %9504 = vmatmul.mubr.msk.f32.gmra.mxu0 %vm174_vm1, %v7938_v8 }
 0x25a   :  { %v13241_v27 = vadd.f32 %v9199_v30, %v14059_v57  ;;  %v13244_v29 = vadd.f32 %v9261_v41, %v12994_v37 }
 0x25b   :  { %v4064_v42 = vpop.f32.mrf.mxu1  ;;  %v4655_v63 = vpop.f32.mrf.mxu0 }
 0x25c   :  { %v13247_v35 = vadd.f32 %v4064_v42, %v12798_v7  ;;  %v13250_v21 = vadd.f32 %v4655_v63, %v13007_v11 }
 0x25d   :  { %v9202_v6 = vpop.f32.mrf.mxu1  ;;  %v9264_v13 = vpop.f32.mrf.mxu0 }
 0x25e   :  { %v13253_v31 = vadd.f32 %v9202_v6, %v12806_v36  ;;  %v13256_v8 = vadd.f32 %v9264_v13, %v13014_v38 }
 0x25f   :  { %v4074_v30 = vpop.f32.mrf.mxu1  ;;  %v4665_v57 = vpop.f32.mrf.mxu0 }
 0x260   :  { %v13259_v37 = vadd.f32 %v4074_v30, %v12828_v62  ;;  %v13262_v41 = vadd.f32 %v4665_v57, %v13027_v14  ;;  %v14062_v14 = vld [vmem:[#allocation9_spill] sm:$0xff] }
 0x261   :  { %v9205_v7 = vpop.f32.mrf.mxu1  ;;  %v9267_v42 = vpop.f32.mrf.mxu0 }
 0x262   :  { %14060 = vst [vmem:[#allocation21_spill] sm:$0xff] %v13262_v41  ;;  %v13265_v11 = vadd.f32 %v9205_v7, %v12833_v53  ;;  %v13268_v63 = vadd.f32 %v9267_v42, %v13034_v49 }
 0x263   :  { %v4084_v36 = vpop.f32.mrf.mxu1  ;;  %v4675_v6 = vpop.f32.mrf.mxu0 }
 0x264   :  { %v13271_v38 = vadd.f32 %v4084_v36, %v12855_v20  ;;  %v13274_v13 = vadd.f32 %v4675_v6, %v13047_v55  ;;  %v14064_v55 = vld [vmem:[#allocation10_spill] sm:$0xff] }
 0x265   :  { %v9208_v62 = vpop.f32.mrf.mxu1  ;;  %v9270_v30 = vpop.f32.mrf.mxu0 }
 0x266   :  { %14061 = vst [vmem:[#allocation22_spill] sm:$0xff] %v13274_v13  ;;  %v13277_v57 = vadd.f32 %v9208_v62, %v14062_v14  ;;  %v13280_v41 = vadd.f32 %v9270_v30, %v13054_v18 }
 0x267   :  { %v4094_v53 = vpop.f32.mrf.mxu1  ;;  %v4685_v7 = vpop.f32.mrf.mxu0 }
 0x268   :  { %v13283_v49 = vadd.f32 %v4094_v53, %v12882_v45  ;;  %v13286_v42 = vadd.f32 %v4685_v7, %v13067_v12  ;;  %v14067_v7 = vld [vmem:[#allocation11_spill] sm:$0xff] }
 0x269   :  { %v9211_v20 = vpop.f32.mrf.mxu1  ;;  %v9273_v36 = vpop.f32.mrf.mxu0 }
 0x26a   :  { %14063 = vst [vmem:[#allocation23_spill] sm:$0xff] %v13286_v42  ;;  %v13289_v6 = vadd.f32 %v9211_v20, %v14064_v55  ;;  %v13292_v13 = vadd.f32 %v9273_v36, %v13075_v15  ;;  %v14068_v36 = vld [vmem:[#allocation12_spill] sm:$0xff] }
 0x26b   :  { %v4104_v62 = vpop.f32.mrf.mxu1  ;;  %v4695_v14 = vpop.f32.mrf.mxu0 }
 0x26c   :  { %14065 = vst [vmem:[#allocation24_spill] sm:$0xff] %v13292_v13  ;;  %v13295_v18 = vadd.f32 %v4104_v62, %v12909_v22  ;;  %v13298_v30 = vadd.f32 %v4695_v14, %v13088_v48  ;;  %v14069_v14 = vld [vmem:[#allocation13_spill] sm:$0xff] }
 0x26d   :  { %v9276_v45 = vpop.f32.mrf.mxu0  ;;  %v9314_v53 = vpop.f32.mrf.mxu1 }
 0x26e   :  { %14066 = vst [vmem:[#allocation25_spill] sm:$0xff] %v13298_v30  ;;  %v13301_v12 = vadd.f32 %v9276_v45, %v13100_v1  ;;  %v13304_v42 = vadd.f32 %v9314_v53, %v14067_v7 }
 0x26f   :  { %v4705_v20 = vpop.f32.mrf.mxu0  ;;  %v5215_v55 = vpop.f32.mrf.mxu1 }
 0x270   :  { %v13307_v15 = vadd.f32 %v4705_v20, %v13114_v51  ;;  %v13310_v13 = vadd.f32 %v5215_v55, %v14068_v36 }
 0x271   :  { %v9279_v22 = vpop.f32.mrf.mxu0  ;;  %v9317_v62 = vpop.f32.mrf.mxu1 }
 0x272   :  { %v13313_v48 = vadd.f32 %v9279_v22, %v13122_v16  ;;  %v13316_v30 = vadd.f32 %v9317_v62, %v14069_v14 }
 0x273   :  { %v4715_v1 = vpop.f32.mrf.mxu0  ;;  %v5225_v45 = vpop.f32.mrf.mxu1 }
 0x274   :  { %v13319_v53 = vadd.f32 %v4715_v1, %v13135_v52  ;;  %v13322_v7 = vadd.f32 %v5225_v45, %v12964_v10 }
 0x275   :  { %v9282_v51 = vpop.f32.mrf.mxu0  ;;  %v9320_v20 = vpop.f32.mrf.mxu1 }
 0x276   :  { %v13325_v55 = vadd.f32 %v9282_v51, %v13143_v56  ;;  %v13328_v36 = vadd.f32 %v9320_v20, %v12972_v54 }
 0x277   :  { %v4725_v16 = vpop.f32.mrf.mxu0  ;;  %v5235_v22 = vpop.f32.mrf.mxu1 }
 0x278   :  { %v13331_v62 = vadd.f32 %v4725_v16, %v13156_v23  ;;  %v13334_v14 = vadd.f32 %v5235_v22, %v12989_v4 }
 0x279   :  { %v9285_v52 = vpop.f32.mrf.mxu0  ;;  %v9323_v1 = vpop.f32.mrf.mxu1 }
 0x27a   :  { %v13337_v10 = vadd.f32 %v9285_v52, %v13164_v2  ;;  %v13340_v45 = vadd.f32 %v9323_v1, %v12997_v59 }
 0x27b   :  { %v4735_v56 = vpop.f32.mrf.mxu0  ;;  %v5245_v51 = vpop.f32.mrf.mxu1 }
 0x27c   :  { %v13343_v54 = vadd.f32 %v4735_v56, %v13177_v26  ;;  %v13346_v20 = vadd.f32 %v5245_v51, %v13010_v43 }
 0x27d   :  { %v9288_v23 = vpop.f32.mrf.mxu0  ;;  %v9326_v16 = vpop.f32.mrf.mxu1 }
 0x27e   :  { %v13349_v4 = vadd.f32 %v9288_v23, %v13185_v34  ;;  %v13352_v22 = vadd.f32 %v9326_v16, %v13017_v40 }
 0x27f   :  { %v4745_v2 = vpop.f32.mrf.mxu0  ;;  %v5255_v52 = vpop.f32.mrf.mxu1 }
 0x280   :  { %v13355_v59 = vadd.f32 %v4745_v2, %v13198_v46  ;;  %v13358_v1 = vadd.f32 %v5255_v52, %v13030_v24 }
 0x281   :  { %v9291_v26 = vpop.f32.mrf.mxu0  ;;  %v9329_v56 = vpop.f32.mrf.mxu1 }
 0x282   :  { %v13361_v43 = vadd.f32 %v9291_v26, %v13204_v5  ;;  %v13364_v51 = vadd.f32 %v9329_v56, %v13037_v25 }
 0x283   :  { %v4755_v34 = vpop.f32.mrf.mxu0  ;;  %v5265_v23 = vpop.f32.mrf.mxu1 }
 0x284   :  { %v13367_v40 = vadd.f32 %v4755_v34, %v13217_v19  ;;  %v13370_v16 = vadd.f32 %v5265_v23, %v13050_v47 }
 0x285   :  { %v9294_v46 = vpop.f32.mrf.mxu0  ;;  %v9332_v2 = vpop.f32.mrf.mxu1 }
 0x286   :  { %v13373_v24 = vadd.f32 %v9294_v46, %v13224_v3  ;;  %v13376_v52 = vadd.f32 %v9332_v2, %v13057_v32 }
 0x287   :  { %v4765_v5 = vpop.f32.mrf.mxu0  ;;  %v5275_v26 = vpop.f32.mrf.mxu1 }
 0x288   :  { %v13379_v25 = vadd.f32 %v4765_v5, %v13234_v17  ;;  %v13382_v56 = vadd.f32 %v5275_v26, %v13070_v33 }
 0x289   :  { %v9297_v19 = vpop.f32.mrf.mxu0  ;;  %v9335_v34 = vpop.f32.mrf.mxu1 }
 0x28a   :  { %14070 = vst [vmem:[#allocation26_spill] sm:$0xff] %v13379_v25  ;;  %v13385_v47 = vadd.f32 %v9297_v19, %v13241_v27  ;;  %v13388_v23 = vadd.f32 %v9335_v34, %v13078_v44 }
 0x28b   :  { %v4775_v3 = vpop.f32.mrf.mxu0  ;;  %v5285_v46 = vpop.f32.mrf.mxu1 }
 0x28c   :  { %14071 = vst [vmem:[#allocation27_spill] sm:$0xff] %v13385_v47  ;;  %v13391_v32 = vadd.f32 %v4775_v3, %v13247_v35  ;;  %v13394_v2 = vadd.f32 %v5285_v46, %v13091_v0 }
 0x28d   :  { %v9300_v17 = vpop.f32.mrf.mxu0  ;;  %v9338_v5 = vpop.f32.mrf.mxu1 }
 0x28e   :  { %14072 = vst [vmem:[#allocation28_spill] sm:$0xff] %v13391_v32  ;;  %v13397_v33 = vadd.f32 %v9300_v17, %v13253_v31  ;;  %v13400_v26 = vadd.f32 %v9338_v5, %v13103_v60 }
 0x28f   :  { %v4785_v27 = vpop.f32.mrf.mxu0  ;;  %v5295_v19 = vpop.f32.mrf.mxu1 }
 0x290   :  { %14073 = vst [vmem:[#allocation29_spill] sm:$0xff] %v13397_v33  ;;  %v13403_v44 = vadd.f32 %v4785_v27, %v13259_v37  ;;  %v13406_v34 = vadd.f32 %v5295_v19, %v13116_v58 }
 0x291   :  { %v9303_v35 = vpop.f32.mrf.mxu0  ;;  %v9341_v3 = vpop.f32.mrf.mxu1 }
 0x292   :  { %14074 = vst [vmem:[#allocation30_spill] sm:$0xff] %v13403_v44  ;;  %v13409_v0 = vadd.f32 %v9303_v35, %v13265_v11  ;;  %v13412_v46 = vadd.f32 %v9341_v3, %v13125_v50  ;;  %v14085_v44 = vld [vmem:[#allocation18_spill] sm:$0xff] }
 0x293   :  { %v4795_v31 = vpop.f32.mrf.mxu0  ;;  %v5305_v17 = vpop.f32.mrf.mxu1 }
 0x294   :  { %14075 = vst [vmem:[#allocation31_spill] sm:$0xff] %v13409_v0  ;;  %v13415_v60 = vadd.f32 %v4795_v31, %v13271_v38  ;;  %v13418_v5 = vadd.f32 %v5305_v17, %v13137_v28  ;;  %v14080_v17 = vld [vmem:[#allocation14_spill] sm:$0xff] }
 0x295   :  { %v9306_v37 = vpop.f32.mrf.mxu0  ;;  %v9344_v27 = vpop.f32.mrf.mxu1 }
 0x296   :  { %14076 = vst [vmem:[#allocation32_spill] sm:$0xff] %v13415_v60  ;;  %v13421_v58 = vadd.f32 %v9306_v37, %v13277_v57  ;;  %v13424_v19 = vadd.f32 %v9344_v27, %v13146_v9  ;;  %v14082_v27 = vld [vmem:[#allocation15_spill] sm:$0xff] }
 0x297   :  { %v4805_v11 = vpop.f32.mrf.mxu0  ;;  %v5315_v35 = vpop.f32.mrf.mxu1 }
 0x298   :  { %14077 = vst [vmem:[#allocation33_spill] sm:$0xff] %v13421_v58  ;;  %v13427_v50 = vadd.f32 %v4805_v11, %v13283_v49  ;;  %v13430_v3 = vadd.f32 %v5315_v35, %v13158_v61  ;;  %v13447_v61 = vld [vmem:[%s13854_s3] ss:$0 sm:$0xff] }
 0x299   :  { %v9309_v38 = vpop.f32.mrf.mxu0  ;;  %v9347_v31 = vpop.f32.mrf.mxu1 }
 0x29a   :  { %14078 = vst [vmem:[#allocation36_spill] sm:$0xff] %v13427_v50  ;;  %v13433_v28 = vadd.f32 %v9309_v38, %v13289_v6  ;;  %v13436_v60 = vadd.f32 %v9347_v31, %v14080_v17  ;;  %v14083_v6 = vld [vmem:[#allocation16_spill] sm:$0xff] }
 0x29b   :  { %v4815_v57 = vpop.f32.mrf.mxu0  ;;  %v5325_v37 = vpop.f32.mrf.mxu1 }
 0x29c   :  { %14079 = vst [vmem:[#allocation34_spill] sm:$0xff] %v13433_v28  ;;  %v13439_v9 = vadd.f32 %v4815_v57, %v13295_v18  ;;  %v13442_v58 = vadd.f32 %v5325_v37, %v14082_v27  ;;  %v14084_v57 = vld [vmem:[#allocation17_spill] sm:$0xff] }
 0x29d   :  { %v9350_v49 = vpop.f32.mrf.mxu1  ;;  %v9412_v11 = vpop.f32.mrf.mxu0 }
 0x29e   :  { %14081 = vst [vmem:[#allocation37_spill] sm:$0xff] %v13439_v9  ;;  %v13450_v35 = vadd.f32 %v9350_v49, %v14083_v6  ;;  %v6245_v38 = vadd.f32 %v9412_v11, %v13304_v42 }
 0x29f   :  { %v5335_v31 = vpop.f32.mrf.mxu1  ;;  %v5925_v17 = vpop.f32.mrf.mxu0 }
 0x2a0   :  { %v6316_v18 = vadd.f32 %v13447_v61, %v6245_v38  ;;  %v13455_v9 = vadd.f32 %v5335_v31, %v14084_v57  ;;  %v6244_v37 = vadd.f32 %v5925_v17, %v13310_v13  ;;  %v14086_v31 = vld [vmem:[#allocation19_spill] sm:$0xff] }
 0x2a1   :  { %v9353_v27 = vpop.f32.mrf.mxu1  ;;  %v9415_v28 = vpop.f32.mrf.mxu0 }
 0x2a2   :  { %v6380_v50 = vmax.f32 %v6316_v18, 0.0  ;;  %v6315_v0 = vadd.f32 %v13447_v61, %v6244_v37  ;;  %v13460_v33 = vadd.f32 %v9353_v27, %v14085_v44  ;;  %v6247_v49 = vadd.f32 %v9415_v28, %v13316_v30  ;;  %v14087_v27 = vld [vmem:[#allocation20_spill] sm:$0xff] }
 0x2a3   :  { %v5345_v42 = vpop.f32.mrf.mxu1  ;;  %v5935_v11 = vpop.f32.mrf.mxu0 }
 0x2a4   :  { %v6379_v6 = vmax.f32 %v6315_v0, 0.0  ;;  %v6318_v38 = vadd.f32 %v13447_v61, %v6247_v49  ;;  %v13465_v57 = vadd.f32 %v5345_v42, %v14086_v31  ;;  %v6246_v13 = vadd.f32 %v5935_v11, %v13322_v7 }
 0x2a5   :  { %v9356_v17 = vpop.f32.mrf.mxu1  ;;  %v9418_v18 = vpop.f32.mrf.mxu0  ;;  %v6445_v37 = vsel %vm6443_vm2, %v6380_v50, 0.0 }
 0x2a6   :  { %v6444_v44 = vsel %vm6443_vm2, %v6379_v6, 0.0  ;;  %v13471_v32 = vadd.f32 %v9356_v17, %v14087_v27  ;;  %v6249_v30 = vadd.f32 %v9418_v18, %v13328_v36  ;;  %v6317_v0 = vadd.f32 %v13447_v61, %v6246_v13 }
 0x2a7   :  { %v6446_v28 = vadd.f32 %v6445_v37, %v6444_v44  ;;  %v5355_v49 = vpop.f32.mrf.mxu1  ;;  %v5945_v47 = vpop.f32.mrf.mxu0  ;;  %v6382_v42 = vmax.f32 %v6318_v38, 0.0 }
 0x2a8   :  { %v13476_v31 = vadd.f32 %v5355_v49, %v13237_v39  ;;  %v6248_v7 = vadd.f32 %v5945_v47, %v13334_v14  ;;  %v6381_v11 = vmax.f32 %v6317_v0, 0.0  ;;  %v6320_v50 = vadd.f32 %v13447_v61, %v6249_v30 }
 0x2a9   :  { %v9359_v6 = vpop.f32.mrf.mxu1  ;;  %v9421_v25 = vpop.f32.mrf.mxu0  ;;  %v6449_v39 = vsel %vm6443_vm2, %v6382_v42, 0.0 }
 0x2aa   :  { %v6319_v17 = vadd.f32 %v13447_v61, %v6248_v7  ;;  %v13482_v36 = vadd.f32 %v9359_v6, %v13244_v29  ;;  %v6251_v13 = vadd.f32 %v9421_v25, %v13340_v45  ;;  %v6447_v18 = vsel %vm6443_vm2, %v6381_v11, 0.0 }
 0x2ab   :  { %v5365_v38 = vpop.f32.mrf.mxu1  ;;  %v5955_v37 = vpop.f32.mrf.mxu0  ;;  %v6448_v44 = vadd.f32 %v6447_v18, %v6446_v28  ;;  %v6384_v47 = vmax.f32 %v6320_v50, 0.0 }
 0x2ac   :  { %v6383_v14 = vmax.f32 %v6319_v17, 0.0  ;;  %v6322_v27 = vadd.f32 %v13447_v61, %v6251_v13  ;;  %v13489_v30 = vadd.f32 %v5365_v38, %v13250_v21  ;;  %v6250_v0 = vadd.f32 %v5955_v37, %v13346_v20  ;;  %v6585_v20 = vld [vmem:[%s13855_s1] sm:$0x3] }
 0x2ad   :  { %v13492_v29 = vpop.f32.mrf.mxu1  ;;  %v9424_v49 = vpop.f32.mrf.mxu0  ;;  %v6450_v45 = vadd.f32 %v6449_v39, %v6448_v44  ;;  %v14088_v21 = vmov 0.0   ;;  %v6584_v17 = vld [vmem:[%s13853_s4] sm:$0xff] }
 0x2ae   :  { %v6451_v25 = vsel %vm6443_vm2, %v6383_v14, 0.0  ;;  %v6321_v7 = vadd.f32 %v13447_v61, %v6250_v0  ;;  %v6253_v42 = vadd.f32 %v9424_v49, %v13352_v22  ;;  %9508 = vmatprep.mubr.msk.f32.mxu1 %vm9569_vm3, %v14088_v21  ;;  %v6453_v22 = vsel %vm6443_vm2, %v6384_v47, 0.0 }
 0x2af   :  { %v13497_v28 = vpop.f32.mrf.mxu1  ;;  %v5965_v11 = vpop.f32.mrf.mxu0  ;;  %v6452_v50 = vadd.f32 %v6451_v25, %v6450_v45  ;;  %v6386_v13 = vmax.f32 %v6322_v27, 0.0  ;;  %9509 = vmatmul.mubr.msk.f32.vlgmr.msra.gmra.mxu1 %vm6443_vm2, %v6585_v20 }
 0x2b0   :  { %v6252_v6 = vadd.f32 %v5965_v11, %v13358_v1  ;;  %v6385_v18 = vmax.f32 %v6321_v7, 0.0  ;;  %v6324_v38 = vadd.f32 %v13447_v61, %v6253_v42  ;;  %9512 = vmatpush3.msra.mxu1 %v6584_v17  ;;  %9513 = vmatprep.mubr.msk.f32.mxu1 %vm9569_vm3, %v14088_v21 }
 0x2b1   :  { %v13510_v37 = vpop.f32.mrf.mxu1  ;;  %v9427_v1 = vpop.f32.mrf.mxu0  ;;  %v6454_v39 = vadd.f32 %v6453_v22, %v6452_v50  ;;  %9516 = vmatprep.subr.mxu1 %v14088_v21  ;;  %v6457_v25 = vsel %vm6443_vm2, %v6386_v13, 0.0 }
 0x2b2   :  { %v6323_v44 = vadd.f32 %v13447_v61, %v6252_v6  ;;  %v6255_v14 = vadd.f32 %v9427_v1, %v13364_v51  ;;  %v6455_v0 = vsel %vm6443_vm2, %v6385_v18, 0.0  ;;  %v6388_v7 = vmax.f32 %v6324_v38, 0.0 }
 0x2b3   :  { %v13516_v49 = vpop.f32.mrf.mxu1  ;;  %v5975_v47 = vpop.f32.mrf.mxu0  ;;  %v6456_v27 = vadd.f32 %v6455_v0, %v6454_v39 }
 0x2b4   :  { %v6387_v45 = vmax.f32 %v6323_v44, 0.0  ;;  %v6326_v42 = vadd.f32 %v13447_v61, %v6255_v14  ;;  %v6254_v51 = vadd.f32 %v5975_v47, %v13370_v16  ;;  %v6461_v38 = vsel %vm6443_vm2, %v6388_v7, 0.0 }
 0x2b5   :  { %v13524_v11 = vpop.f32.mrf.mxu1  ;;  %v9430_v50 = vpop.f32.mrf.mxu0  ;;  %v6458_v6 = vadd.f32 %v6457_v25, %v6456_v27 }
 0x2b6   :  { %v6459_v20 = vsel %vm6443_vm2, %v6387_v45, 0.0  ;;  %v6325_v17 = vadd.f32 %v13447_v61, %v6254_v51  ;;  %v6257_v22 = vadd.f32 %v9430_v50, %v13376_v52  ;;  %v6390_v44 = vmax.f32 %v6326_v42, 0.0 }
 0x2b7   :  { %v13529_v18 = vpop.f32.mrf.mxu1  ;;  %v5985_v1 = vpop.f32.mrf.mxu0  ;;  %v6460_v39 = vadd.f32 %v6459_v20, %v6458_v6 }
 0x2b8   :  { %v6256_v13 = vadd.f32 %v5985_v1, %v13382_v56  ;;  %v6389_v16 = vmax.f32 %v6325_v17, 0.0  ;;  %v6328_v14 = vadd.f32 %v13447_v61, %v6257_v22  ;;  %v6465_v7 = vsel %vm6443_vm2, %v6390_v44, 0.0 }
 0x2b9   :  { %v13534_v0 = vpop.f32.mrf.mxu1  ;;  %v9433_v47 = vpop.f32.mrf.mxu0  ;;  %v6462_v27 = vadd.f32 %v6461_v38, %v6460_v39 }
 0x2ba   :  { %v6327_v45 = vadd.f32 %v13447_v61, %v6256_v13  ;;  %v6259_v52 = vadd.f32 %v9433_v47, %v13388_v23  ;;  %v6463_v25 = vsel %vm6443_vm2, %v6389_v16, 0.0  ;;  %v6392_v42 = vmax.f32 %v6328_v14, 0.0 }
 0x2bb   :  { %v13539_v51 = vpop.f32.mrf.mxu1  ;;  %v5995_v50 = vpop.f32.mrf.mxu0  ;;  %v6464_v56 = vadd.f32 %v6463_v25, %v6462_v27 }
 0x2bc   :  { %v6391_v6 = vmax.f32 %v6327_v45, 0.0  ;;  %v6330_v20 = vadd.f32 %v13447_v61, %v6259_v52  ;;  %v6258_v17 = vadd.f32 %v5995_v50, %v13394_v2  ;;  %v6469_v14 = vsel %vm6443_vm2, %v6392_v42, 0.0 }
 0x2bd   :  { %v13544_v22 = vpop.f32.mrf.mxu1  ;;  %v9436_v1 = vpop.f32.mrf.mxu0  ;;  %v6466_v39 = vadd.f32 %v6465_v7, %v6464_v56 }
 0x2be   :  { %v6467_v23 = vsel %vm6443_vm2, %v6391_v6, 0.0  ;;  %v6329_v13 = vadd.f32 %v13447_v61, %v6258_v17  ;;  %v6261_v38 = vadd.f32 %v9436_v1, %v13400_v26  ;;  %v6394_v45 = vmax.f32 %v6330_v20, 0.0 }
 0x2bf   :  { %v13549_v16 = vpop.f32.mrf.mxu1  ;;  %v6005_v47 = vpop.f32.mrf.mxu0  ;;  %v6468_v27 = vadd.f32 %v6467_v23, %v6466_v39 }
 0x2c0   :  { %v6260_v44 = vadd.f32 %v6005_v47, %v13406_v34  ;;  %v6393_v2 = vmax.f32 %v6329_v13, 0.0  ;;  %v6332_v52 = vadd.f32 %v13447_v61, %v6261_v38  ;;  %v6473_v34 = vsel %vm6443_vm2, %v6394_v45, 0.0 }
 0x2c1   :  { %v9439_v25 = vpop.f32.mrf.mxu0  ;;  %v6470_v50 = vadd.f32 %v6469_v14, %v6468_v27  ;;  %v13555_v6 = vpop.f32.mrf.mxu1 }
 0x2c2   :  { %v6331_v56 = vadd.f32 %v13447_v61, %v6260_v44  ;;  %v6263_v26 = vadd.f32 %v9439_v25, %v13412_v46  ;;  %v6471_v7 = vsel %vm6443_vm2, %v6393_v2, 0.0  ;;  %v6396_v42 = vmax.f32 %v6332_v52, 0.0 }
 0x2c3   :  { %v6015_v17 = vpop.f32.mrf.mxu0  ;;  %v6472_v1 = vadd.f32 %v6471_v7, %v6470_v50  ;;  %v13563_v27 = vpop.f32.mrf.mxu1 }
 0x2c4   :  { %v6395_v39 = vmax.f32 %v6331_v56, 0.0  ;;  %v6334_v20 = vadd.f32 %v13447_v61, %v6263_v26  ;;  %v6262_v23 = vadd.f32 %v6015_v17, %v13418_v5  ;;  %v6477_v45 = vsel %vm6443_vm2, %v6396_v42, 0.0 }
 0x2c5   :  { %v9442_v13 = vpop.f32.mrf.mxu0  ;;  %v6474_v38 = vadd.f32 %v6473_v34, %v6472_v1  ;;  %v13570_v7 = vpop.f32.mrf.mxu1 }
 0x2c6   :  { %v6475_v47 = vsel %vm6443_vm2, %v6395_v39, 0.0  ;;  %v6333_v46 = vadd.f32 %v13447_v61, %v6262_v23  ;;  %v6265_v44 = vadd.f32 %v9442_v13, %v13424_v19  ;;  %v6398_v52 = vmax.f32 %v6334_v20, 0.0 }
 0x2c7   :  { %v6025_v14 = vpop.f32.mrf.mxu0  ;;  %v6476_v2 = vadd.f32 %v6475_v47, %v6474_v38  ;;  %v13578_v47 = vpop.f32.mrf.mxu1 }
 0x2c8   :  { %v6264_v25 = vadd.f32 %v6025_v14, %v13430_v3  ;;  %v6397_v50 = vmax.f32 %v6333_v46, 0.0  ;;  %v6336_v5 = vadd.f32 %v13447_v61, %v6265_v44  ;;  %v6481_v3 = vsel %vm6443_vm2, %v6398_v52, 0.0 }
 0x2c9   :  { %v9445_v56 = vpop.f32.mrf.mxu0  ;;  %v6478_v26 = vadd.f32 %v6477_v45, %v6476_v2 }
 0x2ca   :  { %v6335_v17 = vadd.f32 %v13447_v61, %v6264_v25  ;;  %v6267_v1 = vadd.f32 %v9445_v56, %v13436_v60  ;;  %v6479_v19 = vsel %vm6443_vm2, %v6397_v50, 0.0  ;;  %v6400_v42 = vmax.f32 %v6336_v5, 0.0 }
 0x2cb   :  { %v6035_v39 = vpop.f32.mrf.mxu0  ;;  %v6480_v34 = vadd.f32 %v6479_v19, %v6478_v26  ;;  %v13586_v26 = vpop.f32.mrf.mxu1 }
 0x2cc   :  { %v6399_v23 = vmax.f32 %v6335_v17, 0.0  ;;  %v6338_v20 = vadd.f32 %v13447_v61, %v6267_v1  ;;  %v6266_v13 = vadd.f32 %v6035_v39, %v13442_v58  ;;  %v6485_v52 = vsel %vm6443_vm2, %v6400_v42, 0.0 }
 0x2cd   :  { %v9448_v38 = vpop.f32.mrf.mxu0  ;;  %v6482_v46 = vadd.f32 %v6481_v3, %v6480_v34 }
 0x2ce   :  { %v6483_v44 = vsel %vm6443_vm2, %v6399_v23, 0.0  ;;  %v6337_v60 = vadd.f32 %v13447_v61, %v6266_v13  ;;  %v6269_v14 = vadd.f32 %v9448_v38, %v13450_v35  ;;  %v6402_v50 = vmax.f32 %v6338_v20, 0.0  ;;  %v13594_v38 = vpop.f32.mrf.mxu1 }
 0x2cf   :  { %v6045_v2 = vpop.f32.mrf.mxu0  ;;  %v6484_v25 = vadd.f32 %v6483_v44, %v6482_v46 }
 0x2d0   :  { %v6268_v45 = vadd.f32 %v6045_v2, %v13455_v9  ;;  %v6401_v5 = vmax.f32 %v6337_v60, 0.0  ;;  %v6340_v58 = vadd.f32 %v13447_v61, %v6269_v14  ;;  %v6489_v9 = vsel %vm6443_vm2, %v6402_v50, 0.0 }
 0x2d1   :  { %v9451_v56 = vpop.f32.mrf.mxu0  ;;  %v6486_v17 = vadd.f32 %v6485_v52, %v6484_v25 }
 0x2d2   :  { %v6339_v1 = vadd.f32 %v13447_v61, %v6268_v45  ;;  %v6271_v19 = vadd.f32 %v9451_v56, %v13460_v33  ;;  %v6487_v35 = vsel %vm6443_vm2, %v6401_v5, 0.0  ;;  %v6404_v3 = vmax.f32 %v6340_v58, 0.0  ;;  %v13602_v58 = vpop.f32.mrf.mxu1 }
 0x2d3   :  { %v6055_v39 = vpop.f32.mrf.mxu0  ;;  %v6488_v34 = vadd.f32 %v6487_v35, %v6486_v17 }
 0x2d4   :  { %v6403_v23 = vmax.f32 %v6339_v1, 0.0  ;;  %v6342_v42 = vadd.f32 %v13447_v61, %v6271_v19  ;;  %v6270_v20 = vadd.f32 %v6055_v39, %v13465_v57  ;;  %v6493_v45 = vsel %vm6443_vm2, %v6404_v3, 0.0 }
 0x2d5   :  { %v9454_v13 = vpop.f32.mrf.mxu0  ;;  %v6490_v46 = vadd.f32 %v6489_v9, %v6488_v34 }
 0x2d6   :  { %v6491_v44 = vsel %vm6443_vm2, %v6403_v23, 0.0  ;;  %v6341_v33 = vadd.f32 %v13447_v61, %v6270_v20  ;;  %v6273_v60 = vadd.f32 %v9454_v13, %v13471_v32  ;;  %v6406_v52 = vmax.f32 %v6342_v42, 0.0  ;;  %v14089_v20 = vld [vmem:[#allocation21_spill] sm:$0xff] }
 0x2d7   :  { %v6065_v14 = vpop.f32.mrf.mxu0  ;;  %v6492_v2 = vadd.f32 %v6491_v44, %v6490_v46  ;;  %v5566_v13 = vadd.f32 %v13497_v28, %v14089_v20 }
 0x2d8   :  { %v6272_v25 = vadd.f32 %v6065_v14, %v13476_v31  ;;  %v6405_v50 = vmax.f32 %v6341_v33, 0.0  ;;  %v6344_v57 = vadd.f32 %v13447_v61, %v6273_v60  ;;  %v5567_v31 = vadd.f32 %v13492_v29, %v13256_v8 }
 0x2d9   :  { %v9457_v5 = vpop.f32.mrf.mxu0  ;;  %v6494_v56 = vadd.f32 %v6493_v45, %v6492_v2  ;;  %v6497_v34 = vsel %vm6443_vm2, %v6406_v52, 0.0  ;;  %v5569_v60 = vadd.f32 %v13510_v37, %v13268_v63 }
 0x2da   :  { %v6343_v17 = vadd.f32 %v13447_v61, %v6272_v25  ;;  %v6275_v1 = vadd.f32 %v9457_v5, %v13482_v36  ;;  %v6495_v32 = vsel %vm6443_vm2, %v6405_v50, 0.0  ;;  %v6408_v23 = vmax.f32 %v6344_v57, 0.0  ;;  %v13614_v36 = vpop.f32.mrf.mxu1 }
 0x2db   :  { %v6075_v19 = vpop.f32.mrf.mxu0  ;;  %v6496_v35 = vadd.f32 %v6495_v32, %v6494_v56 }
 0x2dc   :  { %v6407_v39 = vmax.f32 %v6343_v17, 0.0  ;;  %v6346_v9 = vadd.f32 %v13447_v61, %v6275_v1  ;;  %v6274_v3 = vadd.f32 %v6075_v19, %v13489_v30  ;;  %v6501_v30 = vsel %vm6443_vm2, %v6408_v23, 0.0  ;;  %v13622_v50 = vpop.f32.mrf.mxu1  ;;  %v14090_v17 = vld [vmem:[#allocation22_spill] sm:$0xff] }
 0x2dd   :  { %v9460_v42 = vpop.f32.mrf.mxu0  ;;  %v6498_v46 = vadd.f32 %v6497_v34, %v6496_v35  ;;  %v5568_v1 = vadd.f32 %v13516_v49, %v14090_v17  ;;  %v5571_v35 = vadd.f32 %v13524_v11, %v13280_v41 }
 0x2de   :  { %v6499_v44 = vsel %vm6443_vm2, %v6407_v39, 0.0  ;;  %v6345_v8 = vadd.f32 %v13447_v61, %v6274_v3  ;;  %v6277_v29 = vadd.f32 %v9460_v42, %v5567_v31  ;;  %v6410_v25 = vmax.f32 %v6346_v9, 0.0  ;;  %v14091_v3 = vld [vmem:[#allocation23_spill] sm:$0xff]  ;;  %v13634_v20 = vpop.f32.mrf.mxu1 }
 0x2df   :  { %v6085_v33 = vpop.f32.mrf.mxu0  ;;  %v6500_v14 = vadd.f32 %v6499_v44, %v6498_v46  ;;  %v5570_v42 = vadd.f32 %v13529_v18, %v14091_v3 }
 0x2e0   :  { %v6276_v2 = vadd.f32 %v6085_v33, %v5566_v13  ;;  %v6409_v45 = vmax.f32 %v6345_v8, 0.0  ;;  %v6348_v28 = vadd.f32 %v13447_v61, %v6277_v29  ;;  %v6505_v39 = vsel %vm6443_vm2, %v6410_v25, 0.0  ;;  %v14092_v29 = vld [vmem:[#allocation24_spill] sm:$0xff]  ;;  %v13644_v25 = vpop.f32.mrf.mxu1 }
 0x2e1   :  { %v9463_v52 = vpop.f32.mrf.mxu0  ;;  %v6502_v57 = vadd.f32 %v6501_v30, %v6500_v14  ;;  %v5573_v33 = vadd.f32 %v13534_v0, %v14092_v29  ;;  %v5575_v0 = vadd.f32 %v13544_v22, %v13301_v12 }
 0x2e2   :  { %v6347_v5 = vadd.f32 %v13447_v61, %v6276_v2  ;;  %v6279_v56 = vadd.f32 %v9463_v52, %v5569_v60  ;;  %v6503_v63 = vsel %vm6443_vm2, %v6409_v45, 0.0  ;;  %v6412_v37 = vmax.f32 %v6348_v28, 0.0  ;;  %v14093_v52 = vld [vmem:[#allocation25_spill] sm:$0xff] }
 0x2e3   :  { %v6095_v32 = vpop.f32.mrf.mxu0  ;;  %v6504_v19 = vadd.f32 %v6503_v63, %v6502_v57  ;;  %v5572_v57 = vadd.f32 %v13539_v51, %v14093_v52 }
 0x2e4   :  { %v6411_v31 = vmax.f32 %v6347_v5, 0.0  ;;  %v6350_v34 = vadd.f32 %v13447_v61, %v6279_v56  ;;  %v6278_v23 = vadd.f32 %v6095_v32, %v5568_v1  ;;  %v6514_v13 = vsel %vm6443_vm2, %v6412_v37, 0.0 }
 0x2e5   :  { %v9466_v9 = vpop.f32.mrf.mxu0  ;;  %v13636_v49 = vadd.f32 %v6505_v39, %v6504_v19  ;;  %v13656_v39 = vpop.f32.mrf.mxu1 }
 0x2e6   :  { %v6513_v46 = vsel %vm6443_vm2, %v6411_v31, 0.0  ;;  %v6349_v41 = vadd.f32 %v13447_v61, %v6278_v23  ;;  %v6281_v11 = vadd.f32 %v9466_v9, %v5571_v35  ;;  %v6414_v14 = vmax.f32 %v6350_v34, 0.0 }
 0x2e7   :  { %v6515_v44 = vadd.f32 %v6514_v13, %v6513_v46  ;;  %v6105_v8 = vpop.f32.mrf.mxu0  ;;  %v5574_v35 = vadd.f32 %v13549_v16, %v13307_v15  ;;  %v5577_v9 = vadd.f32 %v13555_v6, %v13313_v48 }
 0x2e8   :  { %v6280_v60 = vadd.f32 %v6105_v8, %v5570_v42  ;;  %v6413_v2 = vmax.f32 %v6349_v41, 0.0  ;;  %v6352_v18 = vadd.f32 %v13447_v61, %v6281_v11  ;;  %v6518_v63 = vsel %vm6443_vm2, %v6414_v14, 0.0  ;;  %v13666_v11 = vpop.f32.mrf.mxu1 }
 0x2e9   :  { %v9469_v30 = vpop.f32.mrf.mxu0  ;;  %v5576_v41 = vadd.f32 %v13563_v27, %v13319_v53 }
 0x2ea   :  { %v6351_v45 = vadd.f32 %v13447_v61, %v6280_v60  ;;  %v6283_v28 = vadd.f32 %v9469_v30, %v5573_v33  ;;  %v6516_v5 = vsel %vm6443_vm2, %v6413_v2, 0.0  ;;  %v6416_v37 = vmax.f32 %v6352_v18, 0.0  ;;  %v13676_v52 = vpop.f32.mrf.mxu1 }
 0x2eb   :  { %v6115_v56 = vpop.f32.mrf.mxu0  ;;  %v6517_v17 = vadd.f32 %v6516_v5, %v6515_v44  ;;  %v5579_v18 = vadd.f32 %v13570_v7, %v13325_v55  ;;  %v5581_v55 = vadd.f32 %v13586_v26, %v13337_v10 }
 0x2ec   :  { %v6415_v1 = vmax.f32 %v6351_v45, 0.0  ;;  %v6354_v32 = vadd.f32 %v13447_v61, %v6283_v28  ;;  %v6282_v19 = vadd.f32 %v6115_v56, %v5572_v57  ;;  %v6522_v13 = vsel %vm6443_vm2, %v6416_v37, 0.0 }
 0x2ed   :  { %v9472_v31 = vpop.f32.mrf.mxu0  ;;  %v6519_v51 = vadd.f32 %v6518_v63, %v6517_v17  ;;  %v5578_v28 = vadd.f32 %v13578_v47, %v13331_v62  ;;  %v5580_v37 = vadd.f32 %v13594_v38, %v13343_v54  ;;  %v5583_v54 = vadd.f32 %v13602_v58, %v13349_v4 }
 0x2ee   :  { %v6520_v34 = vsel %vm6443_vm2, %v6415_v1, 0.0  ;;  %v6353_v23 = vadd.f32 %v13447_v61, %v6282_v19  ;;  %v6285_v12 = vadd.f32 %v9472_v31, %v5575_v0  ;;  %v6418_v46 = vmax.f32 %v6354_v32, 0.0  ;;  %v13686_v31 = vpop.f32.mrf.mxu1 }
 0x2ef   :  { %v6125_v22 = vpop.f32.mrf.mxu0  ;;  %v6521_v3 = vadd.f32 %v6520_v34, %v6519_v51  ;;  %v5585_v4 = vadd.f32 %v13622_v50, %v13361_v43 }
 0x2f0   :  { %v6284_v42 = vadd.f32 %v6125_v22, %v5574_v35  ;;  %v6417_v44 = vmax.f32 %v6353_v23, 0.0  ;;  %v6356_v15 = vadd.f32 %v13447_v61, %v6285_v12  ;;  %v6526_v30 = vsel %vm6443_vm2, %v6418_v46, 0.0  ;;  %v5495_v46 = vpop.f32.mrf.mxu1 }
 0x2f1   :  { %v9475_v16 = vpop.f32.mrf.mxu0  ;;  %v6523_v8 = vadd.f32 %v6522_v13, %v6521_v3  ;;  %v5582_v13 = vadd.f32 %v13614_v36, %v13355_v59 }
 0x2f2   :  { %v6355_v29 = vadd.f32 %v13447_v61, %v6284_v42  ;;  %v6287_v33 = vadd.f32 %v9475_v16, %v5577_v9  ;;  %v6524_v48 = vsel %vm6443_vm2, %v6417_v44, 0.0  ;;  %v6420_v45 = vmax.f32 %v6356_v15, 0.0 }
 0x2f3   :  { %v6135_v6 = vpop.f32.mrf.mxu0  ;;  %v6525_v60 = vadd.f32 %v6524_v48, %v6523_v8  ;;  %v5584_v48 = vadd.f32 %v13634_v20, %v13367_v40  ;;  %v5587_v40 = vadd.f32 %v13644_v25, %v13373_v24 }
 0x2f4   :  { %v6419_v14 = vmax.f32 %v6355_v29, 0.0  ;;  %v6286_v2 = vadd.f32 %v6135_v6, %v5576_v41  ;;  %v6358_v53 = vadd.f32 %v13447_v61, %v6287_v33  ;;  %v6530_v62 = vsel %vm6443_vm2, %v6420_v45, 0.0 }
 0x2f5   :  { %v9478_v27 = vpop.f32.mrf.mxu0  ;;  %v6527_v57 = vadd.f32 %v6526_v30, %v6525_v60 }
 0x2f6   :  { %v6528_v5 = vsel %vm6443_vm2, %v6419_v14, 0.0  ;;  %v6357_v56 = vadd.f32 %v13447_v61, %v6286_v2  ;;  %v6289_v0 = vadd.f32 %v9478_v27, %v5579_v18  ;;  %v6422_v47 = vmax.f32 %v6358_v53, 0.0  ;;  %v9401_v14 = vpop.f32.mrf.mxu1 }
 0x2f7   :  { %v6145_v17 = vpop.f32.mrf.mxu0  ;;  %v6529_v7 = vadd.f32 %v6528_v5, %v6527_v57 }
 0x2f8   :  { %v6421_v1 = vmax.f32 %v6357_v56, 0.0  ;;  %v6288_v63 = vadd.f32 %v6145_v17, %v5578_v28  ;;  %v6360_v32 = vadd.f32 %v13447_v61, %v6289_v0  ;;  %v6534_v38 = vsel %vm6443_vm2, %v6422_v47, 0.0  ;;  %v14094_v56 = vld [vmem:[#allocation26_spill] sm:$0xff]  ;;  %v5505_v17 = vpop.f32.mrf.mxu1 }
 0x2f9   :  { %v9481_v19 = vpop.f32.mrf.mxu0  ;;  %v6531_v35 = vadd.f32 %v6530_v62, %v6529_v7  ;;  %v5586_v0 = vadd.f32 %v13656_v39, %v14094_v56  ;;  %v14095_v62 = vld [vmem:[#allocation27_spill] sm:$0xff] }
 0x2fa   :  { %v6532_v51 = vsel %vm6443_vm2, %v6421_v1, 0.0  ;;  %v6359_v34 = vadd.f32 %v13447_v61, %v6288_v63  ;;  %v6291_v10 = vadd.f32 %v9481_v19, %v5581_v55  ;;  %v6424_v9 = vmax.f32 %v6360_v32, 0.0  ;;  %v14096_v19 = vld [vmem:[#allocation28_spill] sm:$0xff] }
 0x2fb   :  { %v6155_v26 = vpop.f32.mrf.mxu0  ;;  %v6533_v23 = vadd.f32 %v6532_v51, %v6531_v35  ;;  %v5589_v24 = vadd.f32 %v13666_v11, %v14095_v62  ;;  %v5588_v35 = vadd.f32 %v13676_v52, %v14096_v19 }
 0x2fc   :  { %v6423_v12 = vmax.f32 %v6359_v34, 0.0  ;;  %v6290_v22 = vadd.f32 %v6155_v26, %v5580_v37  ;;  %v6362_v3 = vadd.f32 %v13447_v61, %v6291_v10  ;;  %v6538_v6 = vsel %vm6443_vm2, %v6424_v9, 0.0  ;;  %v9404_v26 = vpop.f32.mrf.mxu1 }
 0x2fd   :  { %v9484_v42 = vpop.f32.mrf.mxu0  ;;  %v6535_v44 = vadd.f32 %v6534_v38, %v6533_v23 }
 0x2fe   :  { %v6536_v15 = vsel %vm6443_vm2, %v6423_v12, 0.0  ;;  %v6361_v16 = vadd.f32 %v13447_v61, %v6290_v22  ;;  %v6293_v41 = vadd.f32 %v9484_v42, %v5583_v54  ;;  %v6426_v59 = vmax.f32 %v6362_v3, 0.0  ;;  %v14097_v42 = vld [vmem:[#allocation29_spill] sm:$0xff] }
 0x2ff   :  { %v6165_v8 = vpop.f32.mrf.mxu0  ;;  %v6537_v58 = vadd.f32 %v6536_v15, %v6535_v44  ;;  %v5591_v52 = vadd.f32 %v13686_v31, %v14097_v42 }
 0x300   :  { %v6425_v29 = vmax.f32 %v6361_v16, 0.0  ;;  %v6292_v33 = vadd.f32 %v6165_v8, %v5582_v13  ;;  %v6364_v36 = vadd.f32 %v13447_v61, %v6293_v41  ;;  %v6542_v20 = vsel %vm6443_vm2, %v6426_v59, 0.0  ;;  %v14098_v41 = vld [vmem:[#allocation30_spill] sm:$0xff]  ;;  %v14099_v59 = vld [vmem:[#allocation31_spill] sm:$0xff] }
 0x301   :  { %v9487_v60 = vpop.f32.mrf.mxu0  ;;  %v6539_v2 = vadd.f32 %v6538_v6, %v6537_v58  ;;  %v5590_v8 = vadd.f32 %v5495_v46, %v14098_v41 }
 0x302   :  { %v6540_v18 = vsel %vm6443_vm2, %v6425_v29, 0.0  ;;  %v6363_v30 = vadd.f32 %v13447_v61, %v6292_v33  ;;  %v6295_v45 = vadd.f32 %v9487_v60, %v5585_v4  ;;  %v6428_v28 = vmax.f32 %v6364_v36, 0.0  ;;  %v5515_v4 = vpop.f32.mrf.mxu1 }
 0x303   :  { %v6175_v43 = vpop.f32.mrf.mxu0  ;;  %v6541_v50 = vadd.f32 %v6540_v18, %v6539_v2  ;;  %v5593_v36 = vadd.f32 %v9401_v14, %v14099_v59  ;;  %v14100_v18 = vld [vmem:[#allocation32_spill] sm:$0xff] }
 0x304   :  { %v6427_v53 = vmax.f32 %v6363_v30, 0.0  ;;  %v6294_v27 = vadd.f32 %v6175_v43, %v5584_v48  ;;  %v6366_v57 = vadd.f32 %v13447_v61, %v6295_v45  ;;  %v6546_v51 = vsel %vm6443_vm2, %v6428_v28, 0.0 }
 0x305   :  { %v9490_v5 = vpop.f32.mrf.mxu0  ;;  %v6543_v55 = vadd.f32 %v6542_v20, %v6541_v50  ;;  %v5592_v30 = vadd.f32 %v5505_v17, %v14100_v18 }
 0x306   :  { %v6544_v7 = vsel %vm6443_vm2, %v6427_v53, 0.0  ;;  %v6365_v1 = vadd.f32 %v13447_v61, %v6294_v27  ;;  %v6297_v63 = vadd.f32 %v9490_v5, %v5587_v40  ;;  %v6430_v39 = vmax.f32 %v6366_v57, 0.0  ;;  %v9407_v53 = vpop.f32.mrf.mxu1 }
 0x307   :  { %v6185_v37 = vpop.f32.mrf.mxu0  ;;  %v6545_v25 = vadd.f32 %v6544_v7, %v6543_v55 }
 0x308   :  { %v6429_v47 = vmax.f32 %v6365_v1, 0.0  ;;  %v6296_v32 = vadd.f32 %v6185_v37, %v5586_v0  ;;  %v6368_v34 = vadd.f32 %v13447_v61, %v6297_v63  ;;  %v6550_v13 = vsel %vm6443_vm2, %v6430_v39, 0.0  ;;  %v14101_v0 = vld [vmem:[#allocation33_spill] sm:$0xff]  ;;  %v14102_v37 = vld [vmem:[#allocation36_spill] sm:$0xff] }
 0x309   :  { %v9493_v10 = vpop.f32.mrf.mxu0  ;;  %v6547_v23 = vadd.f32 %v6546_v51, %v6545_v25  ;;  %v5595_v55 = vadd.f32 %v9404_v26, %v14101_v0  ;;  %v5594_v62 = vadd.f32 %v5515_v4, %v14102_v37  ;;  %v14103_v51 = vld [vmem:[#allocation34_spill] sm:$0xff] }
 0x30a   :  { %v6548_v12 = vsel %vm6443_vm2, %v6429_v47, 0.0  ;;  %v6367_v22 = vadd.f32 %v13447_v61, %v6296_v32  ;;  %v6299_v54 = vadd.f32 %v9493_v10, %v5589_v24  ;;  %v6432_v44 = vmax.f32 %v6368_v34, 0.0  ;;  %v5525_v24 = vpop.f32.mrf.mxu1 }
 0x30b   :  { %v6195_v11 = vpop.f32.mrf.mxu0  ;;  %v6549_v38 = vadd.f32 %v6548_v12, %v6547_v23  ;;  %v5597_v39 = vadd.f32 %v9407_v53, %v14103_v51  ;;  %v14104_v23 = vld [vmem:[#allocation37_spill] sm:$0xff] }
 0x30c   :  { %v6431_v9 = vmax.f32 %v6367_v22, 0.0  ;;  %v6298_v3 = vadd.f32 %v6195_v11, %v5588_v35  ;;  %v6370_v15 = vadd.f32 %v13447_v61, %v6299_v54  ;;  %v6554_v45 = vsel %vm6443_vm2, %v6432_v44, 0.0  ;;  %v6828_v51 = vld [vmem:[%s13858_s8 + $0x10] sm:$0xff] }
 0x30d   :  { %v9496_v16 = vpop.f32.mrf.mxu0  ;;  %v6551_v58 = vadd.f32 %v6550_v13, %v6549_v38  ;;  %v5596_v12 = vadd.f32 %v5525_v24, %v14104_v23  ;;  %v6507_v44 = vrot.slane %v13636_v49, 4 }
 0x30e   :  { %v6552_v29 = vsel %vm6443_vm2, %v6431_v9, 0.0  ;;  %v6369_v33 = vadd.f32 %v13447_v61, %v6298_v3  ;;  %v6301_v48 = vadd.f32 %v9496_v16, %v5591_v52  ;;  %v6434_v43 = vmax.f32 %v6370_v15, 0.0 }
 0x30f   :  { %v6205_v6 = vpop.f32.mrf.mxu0  ;;  %v6553_v60 = vadd.f32 %v6552_v29, %v6551_v58 }
 0x310   :  { %v6433_v31 = vmax.f32 %v6369_v33, 0.0  ;;  %v6300_v2 = vadd.f32 %v6205_v6, %v5590_v8  ;;  %v6372_v46 = vadd.f32 %v13447_v61, %v6301_v48  ;;  %v6558_v17 = vsel %vm6443_vm2, %v6434_v43, 0.0 }
 0x311   :  { %v9499_v50 = vpop.f32.mrf.mxu0  ;;  %v6555_v27 = vadd.f32 %v6554_v45, %v6553_v60  ;;  %v6508_v6 = vadd.f32 %v6507_v44, %v13636_v49  ;;  %v6920_v44 = vld [vmem:[%s13860_s10 + $0x20] sm:$0xff] }
 0x312   :  { %v6556_v40 = vsel %vm6443_vm2, %v6433_v31, 0.0  ;;  %v6371_v20 = vadd.f32 %v13447_v61, %v6300_v2  ;;  %v6303_v28 = vadd.f32 %v9499_v50, %v5593_v36  ;;  %v6436_v7 = vmax.f32 %v6372_v46, 0.0 }
 0x313   :  { %v6215_v57 = vpop.f32.mrf.mxu0  ;;  %v6557_v14 = vadd.f32 %v6556_v40, %v6555_v27 }
 0x314   :  { %v6435_v5 = vmax.f32 %v6371_v20, 0.0  ;;  %v6302_v56 = vadd.f32 %v6215_v57, %v5592_v30  ;;  %v6374_v1 = vadd.f32 %v13447_v61, %v6303_v28  ;;  %v6562_v22 = vsel %vm6443_vm2, %v6436_v7, 0.0 }
 0x315   :  { %v9502_v63 = vpop.f32.mrf.mxu0  ;;  %v6559_v25 = vadd.f32 %v6558_v17, %v6557_v14  ;;  %v6509_v30 = vrot.slane %v6508_v6, 2  ;;  %v6744_v17 = vld [vmem:[%s13856_s6] sm:$0xff] }
 0x316   :  { %v6560_v47 = vsel %vm6443_vm2, %v6435_v5, 0.0  ;;  %v6373_v32 = vadd.f32 %v13447_v61, %v6302_v56  ;;  %v6305_v19 = vadd.f32 %v9502_v63, %v5595_v55  ;;  %v6438_v54 = vmax.f32 %v6374_v1, 0.0  ;;  %v8008_v1 = vld [vmem:[%s13857_s5] ss:$0 sm:$0xff] }
 0x317   :  { %v6225_v35 = vpop.f32.mrf.mxu0  ;;  %v6561_v34 = vadd.f32 %v6560_v47, %v6559_v25  ;;  %v6510_v50 = vadd.f32 %v6509_v30, %v6508_v6  ;;  %v6833_v25 = vld [vmem:[%s13858_s8 + $0x38] sm:$0xff]  ;;  %v6832_v47 = vld [vmem:[%s13858_s8 + $0x30] sm:$0xff] }
 0x318   :  { %v6437_v10 = vmax.f32 %v6373_v32, 0.0  ;;  %v6304_v26 = vadd.f32 %v6225_v35, %v5594_v62  ;;  %v6376_v11 = vadd.f32 %v13447_v61, %v6305_v19  ;;  %v6566_v8 = vsel %vm6443_vm2, %v6438_v54, 0.0  ;;  %v6831_v32 = vld [vmem:[%s13858_s8 + $0x28] sm:$0xff]  ;;  %v6830_v19 = vld [vmem:[%s13858_s8 + $0x20] sm:$0xff]  ;;  %v6829_v35 = vld [vmem:[%s13858_s8 + $0x18] sm:$0xff] }
 0x319   :  { %v9505_v38 = vpop.f32.mrf.mxu0  ;;  %v6563_v9 = vadd.f32 %v6562_v22, %v6561_v34  ;;  %v6511_v40 = vrot.slane %v6510_v50, 1  ;;  %v6826_v34 = vld [vmem:[%s13858_s8] sm:$0xff] }
 0x31a   :  { %v6564_v3 = vsel %vm6443_vm2, %v6437_v10, 0.0  ;;  %v6375_v42 = vadd.f32 %v13447_v61, %v6304_v26  ;;  %v6307_v52 = vadd.f32 %v9505_v38, %v5597_v39  ;;  %v6440_v4 = vmax.f32 %v6376_v11, 0.0  ;;  %v6827_v39 = vld [vmem:[%s13858_s8 + $0x8] sm:$0xff]  ;;  %v8009_v54 = vld [vmem:[%s13859_s7] ss:$0 sm:$0xff] }
 0x31b   :  { %v6235_v13 = vpop.f32.mrf.mxu0  ;;  %v6565_v15 = vadd.f32 %v6564_v3, %v6563_v9  ;;  %v6512_v28 = vadd.f32 %v6511_v40, %v6510_v50 }
 0x31c   :  { %v6439_v16 = vmax.f32 %v6375_v42, 0.0  ;;  %v6306_v41 = vadd.f32 %v6235_v13, %v5596_v12  ;;  %v6378_v58 = vadd.f32 %v13447_v61, %v6307_v52  ;;  %v6570_v60 = vsel %vm6443_vm2, %v6440_v4, 0.0  ;;  %v6923_v42 = vld [vmem:[%s13860_s10 + $0x38] sm:$0xff]  ;;  %v6922_v52 = vld [vmem:[%s13860_s10 + $0x30] sm:$0xff]  ;;  %v6921_v13 = vld [vmem:[%s13860_s10 + $0x28] sm:$0xff] }
 0x31d   :  { %v6567_v29 = vadd.f32 %v6566_v8, %v6565_v15  ;;  %v6582_v14 = vmul.f32 0.00390625, %v6512_v28  ;;  %v6919_v15 = vld [vmem:[%s13860_s10 + $0x18] sm:$0xff]  ;;  %v6916_v8 = vld [vmem:[%s13860_s10] sm:$0xff]  ;;  %v17_v4 = vstv %s13861_s11 }
 0x31e   :  { %v6568_v33 = vsel %vm6443_vm2, %v6439_v16, 0.0  ;;  %v6377_v48 = vadd.f32 %v13447_v61, %v6306_v41  ;;  %v6442_v31 = vmax.f32 %v6378_v58, 0.0  ;;  %v6918_v16 = vld [vmem:[%s13860_s10 + $0x10] sm:$0xff]  ;;  %v6917_v41 = vld [vmem:[%s13860_s10 + $0x8] sm:$0xff]  ;;  %18 = vst [vmem:[#allocation2] sm:$0x1] %v17_v4 }
 0x31f   :  { %v6569_v59 = vadd.f32 %v6568_v33, %v6567_v29  ;;  %v8011_v58 = vld [vmem:[%s13862_s9] ss:$0 sm:$0xff]  ;;  %s9570_s10 = smov 8  }
 0x320   :  { %v6441_v36 = vmax.f32 %v6377_v48, 0.0  ;;  %v6574_v43 = vsel %vm6443_vm2, %v6442_v31, 0.0 }
 0x321   :  { %v6571_v2 = vadd.f32 %v6570_v60, %v6569_v59 }
 0x322   :  { %v6572_v18 = vsel %vm6443_vm2, %v6441_v36, 0.0 }
 0x323   :  { %v6573_v45 = vadd.f32 %v6572_v18, %v6571_v2 }
 0x325   :  { %v6575_v46 = vadd.f32 %v6574_v43, %v6573_v45  ;;  %v8013_v59 = vld [vmem:[#allocation2] ss:$0 sm:$0xff] }
 0x327   :  { %v6576_v53 = vrot.slane %v6575_v46, 4 }
 0x329   :  { %v6577_v27 = vadd.f32 %v6576_v53, %v6575_v46 }
 0x32b   :  { %v6578_v61 = vrot.slane %v6577_v27, 2 }
 0x32d   :  { %v6579_v20 = vadd.f32 %v6578_v61, %v6577_v27 }
 0x32f   :  { %v6580_v49 = vrot.slane %v6579_v20, 1 }
 0x331   :  { %v6581_v57 = vadd.f32 %v6580_v49, %v6579_v20 }
 0x333   :  { %v6583_v5 = vmul.f32 0.00390625, %v6581_v57 }
 0x335   :  { %v6663_v56 = vsel %vm6662_vm4, %v6583_v5, %v6582_v14 }
 0x336   :  { %9514 = vmatmul.mubr.msk.f32.vlgmr.msra.gmra.mxu1 %vm6443_vm2, %v6663_v56 }
 0x337   :  { %9518 = vmatprep.mubr.msk.f32.mxu1 %vm9569_vm3, %v14088_v21  ;;  %9517 = vmatpush3.msra.mxu1 %v6744_v17 }
 0x338   :  { %9521 = vmatprep.subr.mxu1 %v14088_v21 }
 0x36f   :  { %v6656_v0 = vpop.f32.mrf.mxu1 }
 0x371   :  { %v9510_v55 = vpop.f32.mrf.mxu1 }
 0x3f6   :  { %v6732_v7 = vpop.f32.mrf.mxu1 }
 0x3f7   :  { %v6733_v63 = vadd.f32 %v6732_v7, %v6656_v0 }
 0x3f8   :  { %v9515_v37 = vpop.f32.mrf.mxu1 }
 0x3f9   :  { %v6743_v62 = vadd.f32 %v8008_v1, %v6733_v63 }
 0x3fb   :  { %9519 = vmatmul.mubr.msk.f32.vlgmr.msra.gmra.mxu1 %vm6443_vm2, %v6743_v62  ;;  %v7005_v24 = vsel %vm7004_vm5, %v6743_v62, -inf }
 0x3fc   :  { %7006 = vmax.xlane.f32.xlu0 %v7005_v24  ;;  %9537 = vmatprep.mubr.msk.f32.mxu1 %vm9569_vm3, %v14088_v21 }
 0x3fd   :  { %9522 = vmatpush3.msra.mxu1 %v6833_v25 }
 0x3fe   :  { %9523 = vmatprep.subr.mxu1 %v14088_v21 }
 0x3ff   :  { %9524 = vmatpush3.msra.mxu1 %v6832_v47 }
 0x400   :  { %9525 = vmatprep.subr.mxu1 %v14088_v21 }
 0x401   :  { %9526 = vmatpush3.msra.mxu1 %v6831_v32 }
 0x402   :  { %9527 = vmatprep.subr.mxu1 %v14088_v21 }
 0x403   :  { %9528 = vmatpush3.msra.mxu1 %v6830_v19 }
 0x404   :  { %9529 = vmatprep.subr.mxu1 %v14088_v21 }
 0x405   :  { %9530 = vmatpush3.msra.mxu1 %v6829_v35 }
 0x406   :  { %9531 = vmatprep.subr.mxu1 %v14088_v21 }
 0x407   :  { %9532 = vmatpush3.msra.mxu1 %v6828_v51 }
 0x408   :  { %9533 = vmatprep.subr.mxu1 %v14088_v21 }
 0x409   :  { %9534 = vmatpush3.msra.mxu1 %v6827_v39 }
 0x40a   :  { %9535 = vmatprep.subr.mxu1 %v14088_v21 }
 0x40b   :  { %9536 = vmatpush3.msra.mxu1 %v6826_v34 }
 0x40c   :  { %9540 = vmatprep.subr.mxu1 %v14088_v21 }
 0x485   :  { %v7007_v10 = vpop.xlane.xlu0 %7006 }
 0x486   :  { %v7008_v26 = vsub.f32 %v6743_v62, %v7007_v10 }
 0x488   :  { %v7009_v23 = vmul.f32 1.442695, %v7008_v26 }
 0x48a   :  { %9564 = vpow2.f32 %v7009_v23 }
 0x497   :  { %v9565_v12 = vpop.eup %9564 }
 0x498   :  { %v7011_v22 = vsel %vm7004_vm5, %v9565_v12, 0.0 }
 0x499   :  { %7012 = vadd.xlane.f32.xlu0 %v7011_v22 }
 0x4bb   :  { %v6821_v11 = vpop.f32.mrf.mxu1 }
 0x4bc   :  { %v6822_v38 = vadd.f32 %v8009_v54, %v6821_v11 }
 0x4bd   :  { %v9520_v9 = vpop.f32.mrf.mxu1 }
 0x4be   :  { %v6825_v3 = vmax.f32 %v6822_v38, 0.0 }
 0x4c0   :  { %9538 = vmatmul.mubr.msk.f32.vlgmr.msra.gmra.mxu1 %vm6841_vm6, %v6825_v3 }
 0x4c1   :  { %9541 = vmatpush3.msra.mxu1 %v6923_v42  ;;  %9556 = vmatprep.mubr.msk.f32.mxu1 %vm9569_vm3, %v14088_v21 }
 0x4c2   :  { %9542 = vmatprep.subr.mxu1 %v14088_v21 }
 0x4c3   :  { %9543 = vmatpush3.msra.mxu1 %v6922_v52 }
 0x4c4   :  { %9544 = vmatprep.subr.mxu1 %v14088_v21 }
 0x4c5   :  { %9545 = vmatpush3.msra.mxu1 %v6921_v13 }
 0x4c6   :  { %9546 = vmatprep.subr.mxu1 %v14088_v21 }
 0x4c7   :  { %9547 = vmatpush3.msra.mxu1 %v6920_v44 }
 0x4c8   :  { %9548 = vmatprep.subr.mxu1 %v14088_v21 }
 0x4c9   :  { %9549 = vmatpush3.msra.mxu1 %v6919_v15 }
 0x4ca   :  { %9550 = vmatprep.subr.mxu1 %v14088_v21 }
 0x4cb   :  { %9551 = vmatpush3.msra.mxu1 %v6918_v16 }
 0x4cc   :  { %9552 = vmatprep.subr.mxu1 %v14088_v21 }
 0x4cd   :  { %9553 = vmatpush3.msra.mxu1 %v6917_v41 }
 0x4ce   :  { %9554 = vmatprep.subr.mxu1 %v14088_v21 }
 0x4cf   :  { %9555 = vmatpush3.msra.mxu1 %v6916_v8 }
 0x522   :  { %v7013_v31 = vpop.xlane.xlu0 %7012 }
 0x523   :  { %9566 = vrcp.f32 %v7013_v31 }
 0x530   :  { %v9567_v2 = vpop.eup %9566 }
 0x531   :  { %v7015_v18 = vmul.f32 %v9567_v2, %v9565_v12 }
 0x580   :  { %v6911_v29 = vpop.f32.mrf.mxu1 }
 0x581   :  { %v6912_v33 = vadd.f32 %v8011_v58, %v6911_v29 }
 0x582   :  { %v9539_v48 = vpop.f32.mrf.mxu1 }
 0x583   :  { %v6915_v6 = vmax.f32 %v6912_v33, 0.0 }
 0x585   :  { %9557 = vmatmul.mubr.msk.f32.vlgmr.msra.gmra.mxu1 %vm6841_vm6, %v6915_v6 }
 0x645   :  { %v7000_v36 = vpop.f32.mrf.mxu1 }
 0x646   :  { %v7001_v60 = vadd.f32 %v8013_v59, %v7000_v36 }
 0x647   :  { %v9558_v21 = vpop.f32.mrf.mxu1 }
 0x648   :  { %7017 = vrot.lane.b32.xlu1 %v7001_v60, %s9570_s10 }
 0x6ba   :  { %v7018_v30 = vpop.permute.xlu1 %7017 }
 0x6bb   :  { %v7020_v45 = vsel %vm6443_vm2, %v7015_v18, %v7018_v30 }
 0x6bc   :  { %v7022_v43 = vsel %vm7021_vm7, %v7020_v45, 0.0 }
 0x6bd   :  { %7023 = vst [vmem:[%s13863_s12] sm:$0x3] %v7022_v43 }

</bundles_post_ra>
